<compile_context>
chip_gen: v7x
topology: tpu7x:2x2x1
jax: 0.10.0
libtpu: 0.0.40
codegen_flags: <defaults>
</compile_context>

<pallas_src>
import jax
import jax.numpy as jnp
import numpy as np
from jax.experimental import pallas as pl
from jax.experimental.pallas import tpu as pltpu

# Network constants (pinned by the FC layer: 32x32x3 input).
H1, W1, CIN = 32, 32, 3
C1 = 16                       # conv1 out channels
H2, W2 = 16, 16               # after pool1
C2 = 32                       # conv2 out channels
H3, W3 = 8, 8                 # after pool2
NCLS = 10
NCLS_PAD = 128                # FC output padded to a full lane width
L1IN = W1 * CIN               # 96
L1OUT = W1 * C1               # 512  (even-w half | odd-w half)
L2IN = W2 * C1                # 256
L2OUT = W2 * C2               # 512  (even-w half | odd-w half)
L3IN = W3 * C2                # 256

TB = 16                       # batch tile: samples per grid step, stacked on M


# ----------------------------------------------------------------------------
# One-time weight preprocessing (host side): banded conv matrices, tiled
# biases, FC weights permuted into the pooled-activation lane layout and
# padded to 128 output lanes.
# ----------------------------------------------------------------------------
def _build_conv_band(w_hwio, W, in_stride, l_in):
    """band[dh, j*in_stride+ci, out_lane(w,co)] = w[dh, dw, ci, co], j=w+dw-1.

    Output lane layout: lane(w, co) = (w//2)*cout + (w%2)*(W//2)*cout, i.e.
    even-w columns in the low lane half, odd-w columns in the high half, so
    the 2x2 W-pool is a max of two 128-aligned lane halves.
    """
    kh, kw, cin, cout = w_hwio.shape
    half = (W // 2) * cout
    band = np.zeros((kh, l_in, W * cout), np.float32)
    for dh in range(kh):
        for dw in range(kw):
            for w in range(W):
                j = w + dw - 1
                if 0 <= j < W:                      # horizontal zero padding by omission
                    col0 = (w // 2) * cout + (w % 2) * half
                    band[dh, j * in_stride:j * in_stride + cin,
                         col0:col0 + cout] = w_hwio[dh, dw]
    return band


def _build_fc_band(wfc):
    """fc_band[h, j*C2+c, o] = wfc[o, c*(H3*W3) + h*W3 + j]  (torch CHW flatten)."""
    n_out = wfc.shape[0]
    wr = np.asarray(wfc, np.float32).reshape(n_out, C2, H3, W3)
    band = np.zeros((H3, L3IN, n_out), np.float32)
    for h in range(H3):
        for j in range(W3):
            band[h, j * C2:(j + 1) * C2, :] = wr[:, :, h, j].T
    return band


def prepare_params(params):
    w1, b1, w2, b2, wfc, bfc = params
    band1 = jnp.asarray(_build_conv_band(np.asarray(w1, np.float32), W1, CIN, L1IN),
                        jnp.bfloat16)                                  # (3, 96, 512)
    band2 = jnp.asarray(_build_conv_band(np.asarray(w2, np.float32), W2, C1, L2IN),
                        jnp.bfloat16)                                  # (3, 256, 512)
    # The tiled bias lines up with the even/odd-w split lane layout ONLY
    # because bias depends on the channel alone (lane % cout == channel for
    # both lane halves).  Keep this invariant if the layout ever changes.
    assert L1OUT % C1 == 0 and (L1OUT // 2) % C1 == 0
    assert L2OUT % C2 == 0 and (L2OUT // 2) % C2 == 0
    bias1 = jnp.asarray(np.tile(np.asarray(b1, np.float32), W1).reshape(1, L1OUT))
    bias2 = jnp.asarray(np.tile(np.asarray(b2, np.float32), W2).reshape(1, L2OUT))
    # FC weights/bias padded from 10 -> 128 output lanes (lane-dense store).
    fcw_np = np.zeros((H3, L3IN, NCLS_PAD), np.float32)
    fcw_np[:, :, :NCLS] = _build_fc_band(wfc)
    fcw = jnp.asarray(fcw_np, jnp.bfloat16)                            # (8, 256, 128)
    fcb_np = np.zeros((1, NCLS_PAD), np.float32)
    fcb_np[0, :NCLS] = np.asarray(bfc, np.float32)
    fcb = jnp.asarray(fcb_np)
    return band1, bias1, band2, bias2, fcw, fcb


# ----------------------------------------------------------------------------
# Fused kernel: TB samples per grid step, everything resident in VMEM.
# Row layout of every activation: row = h*TB + t (h-major, sample-minor).
# ----------------------------------------------------------------------------
def fused_cnn_kernel(x_ref, band1_ref, bias1_ref, band2_ref, bias2_ref,
                     fcw_ref, fcb_ref, o_ref, apad1_ref, apad2_ref):

    def conv_relu_pool(apad_ref, band_ref, bias_ref, h, l_out):
        # apad_ref: ((h+2)*TB, l_in) bf16 scratch with TB-row zero halos at
        # top/bottom (= per-sample vertical zero padding in h-major layout).
        # Conv as 3 dense matmuls; the dh operand is an aligned row-slice.
        m = h * TB
        acc = jnp.dot(apad_ref[0:m, :], band_ref[0],
                      preferred_element_type=jnp.float32)
        acc += jnp.dot(apad_ref[TB:TB + m, :], band_ref[1],
                       preferred_element_type=jnp.float32)
        acc += jnp.dot(apad_ref[2 * TB:2 * TB + m, :], band_ref[2],
                       preferred_element_type=jnp.float32)
        acc = jnp.maximum(acc + bias_ref[...], 0.0)          # bias + ReLU (f32)
        # 2x2 max pool: H -> max of adjacent TB-row blocks; W -> max of the
        # two 128-aligned lane halves (even/odd-w split layout).
        a3 = acc.reshape(h // 2, 2 * TB, l_out)
        ph = jnp.maximum(a3[:, :TB, :], a3[:, TB:, :])        # (h//2, TB, l_out)
        half = l_out // 2
        pw = jnp.maximum(ph[..., :half], ph[..., half:])      # (h//2, TB, half)
        return pw.reshape((h // 2) * TB, half)

    # ---- layer 1: input tile (already bf16) into halo scratch ----
    zeros1 = jnp.zeros((TB, L1IN), jnp.bfloat16)
    apad1_ref[0:TB, :] = zeros1                               # top halo
    apad1_ref[(H1 + 1) * TB:(H1 + 2) * TB, :] = zeros1        # bottom halo
    apad1_ref[TB:(H1 + 1) * TB, :] = x_ref[0]                 # interior (no f32 trip)
    p1 = conv_relu_pool(apad1_ref, band1_ref, bias1_ref, H1, L1OUT)   # (H2*TB, 256) f32

    # ---- layer 2 ----
    zeros2 = jnp.zeros((TB, L2IN), jnp.bfloat16)
    apad2_ref[0:TB, :] = zeros2
    apad2_ref[(H2 + 1) * TB:(H2 + 2) * TB, :] = zeros2
    apad2_ref[TB:(H2 + 1) * TB, :] = p1.astype(jnp.bfloat16)  # single bf16 cast
    p2 = conv_relu_pool(apad2_ref, band2_ref, bias2_ref, H2, L2OUT)   # (H3*TB, 256) f32

    # ---- FC: 8 accumulated (TB,256)@(256,128) matmuls over contiguous h-blocks ----
    a3 = p2.astype(jnp.bfloat16)                              # single bf16 cast
    acc = jnp.zeros((TB, NCLS_PAD), jnp.float32)
    for hh in range(H3):
        acc += jnp.dot(a3[hh * TB:(hh + 1) * TB, :], fcw_ref[hh],
                       preferred_element_type=jnp.float32)
    o_ref[0] = acc + fcb_ref[...]                             # lane-dense (TB,128) store


def cnn_forward(x_nchw, prepared):
    band1, bias1, band2, bias2, fcw, fcb = prepared
    N = x_nchw.shape[0]
    n_pad = ((N + TB - 1) // TB) * TB
    if n_pad != N:
        x_nchw = jnp.pad(x_nchw, ((0, n_pad - N), (0, 0), (0, 0), (0, 0)))
    nb = n_pad // TB
    # Boundary relayout (one XLA pass): NCHW -> per-tile h-major lane-dense
    # layout: tile b, row = h*TB + t, lane = w*CIN + c, bf16 for the DMA/MXU.
    # (If a producer can supply this layout directly, this transpose is free
    # to drop.)
    x_l = (x_nchw.reshape(nb, TB, CIN, H1, W1)
                 .transpose(0, 3, 1, 4, 2)                    # (nb, H, TB, W, C)
                 .reshape(nb, H1 * TB, L1IN)
                 .astype(jnp.bfloat16))
    out = pl.pallas_call(
        fused_cnn_kernel,
        out_shape=jax.ShapeDtypeStruct((nb, TB, NCLS_PAD), jnp.float32),
        grid=(nb,),
        in_specs=[
            pl.BlockSpec((1, H1 * TB, L1IN), lambda n: (n, 0, 0)),    # batched input tile
            pl.BlockSpec((3, L1IN, L1OUT), lambda n: (0, 0, 0)),      # conv1 band (resident)
            pl.BlockSpec((1, L1OUT), lambda n: (0, 0)),               # conv1 bias
            pl.BlockSpec((3, L2IN, L2OUT), lambda n: (0, 0, 0)),      # conv2 band (resident)
            pl.BlockSpec((1, L2OUT), lambda n: (0, 0)),               # conv2 bias
            pl.BlockSpec((H3, L3IN, NCLS_PAD), lambda n: (0, 0, 0)),  # FC weights (padded)
            pl.BlockSpec((1, NCLS_PAD), lambda n: (0, 0)),            # FC bias (padded)
        ],
        out_specs=pl.BlockSpec((1, TB, NCLS_PAD), lambda n: (n, 0, 0)),
        scratch_shapes=[
            pltpu.VMEM(((H1 + 2) * TB, L1IN), jnp.bfloat16),          # layer-1 halo scratch
            pltpu.VMEM(((H2 + 2) * TB, L2IN), jnp.bfloat16),          # layer-2 halo scratch
        ],
        compiler_params=pltpu.CompilerParams(dimension_semantics=("parallel",)),
    )(x_l, band1, bias1, band2, bias2, fcw, fcb)
    return out.reshape(n_pad, NCLS_PAD)[:N, :NCLS]


# ----------------------------------------------------------------------------
# Pure-JAX reference (f32) for the correctness check.
# ----------------------------------------------------------------------------
def ref_forward(x_nchw, params):
    w1, b1, w2, b2, wfc, bfc = params
    dn = ("NHWC", "HWIO", "NHWC")
    x = jnp.transpose(x_nchw, (0, 2, 3, 1))
    y = jax.lax.conv_general_dilated(x, w1, (1, 1), "SAME", dimension_numbers=dn) + b1
    y = jax.nn.relu(y)
    y = jax.lax.reduce_window(y, -jnp.inf, jax.lax.max, (1, 2, 2, 1), (1, 2, 2, 1), "VALID")
    y = jax.lax.conv_general_dilated(y, w2, (1, 1), "SAME", dimension_numbers=dn) + b2
    y = jax.nn.relu(y)
    y = jax.lax.reduce_window(y, -jnp.inf, jax.lax.max, (1, 2, 2, 1), (1, 2, 2, 1), "VALID")
    y = jnp.transpose(y, (0, 3, 1, 2)).reshape(x_nchw.shape[0], -1)
    return y @ wfc.T + bfc


if __name__ == "__main__":
    key = jax.random.PRNGKey(0)
    kx, k1, k2, k3, k4, k5, k6 = jax.random.split(key, 7)

    # Parameters (shapes from the module __init__), HWIO conv weights.
    w1 = jax.random.normal(k1, (3, 3, 3, 16), jnp.float32) * 0.1
    b1 = jax.random.normal(k2, (16,), jnp.float32) * 0.1
    w2 = jax.random.normal(k3, (3, 3, 16, 32), jnp.float32) * 0.05
    b2 = jax.random.normal(k4, (32,), jnp.float32) * 0.1
    wfc = jax.random.normal(k5, (10, 32 * 8 * 8), jnp.float32) * 0.02   # torch (out, in)
    bfc = jax.random.normal(k6, (10,), jnp.float32) * 0.1
    params = (w1, b1, w2, b2, wfc, bfc)
    prepared = prepare_params(params)          # one-time weight preprocessing

    # Input: FC layer (32*8*8) pins spatial size to 32x32x3; batch 32 gives
    # 2 grid steps of TB=16 (keeps both v7x TensorCores busy).
    x = jax.random.normal(kx, (32, 3, 32, 32), jnp.float32)

    out = jax.block_until_ready(cnn_forward(x, prepared))
    assert out.shape == (32, 10)

    ref = jax.block_until_ready(ref_forward(x, params))
    # bf16 MXU operands (same rounding XLA's default TPU precision applies) ->
    # allow a looser tolerance than a pure-f32 comparison.
    np.testing.assert_allclose(np.asarray(out), np.asarray(ref), rtol=5e-2, atol=5e-2)

    print("KERNEL_OK")
</pallas_src>

<mosaic_0001>
module attributes {stable_mosaic.version = 11 : i64} {
  func.func @fused_cnn_kernel(%arg0: i32, %arg1: memref<1x512x96xbf16, #tpu.memory_space<vmem>>, %arg2: memref<3x96x512xbf16, #tpu.memory_space<vmem>>, %arg3: memref<1x512xf32, #tpu.memory_space<vmem>>, %arg4: memref<3x256x512xbf16, #tpu.memory_space<vmem>>, %arg5: memref<1x512xf32, #tpu.memory_space<vmem>>, %arg6: memref<8x256x128xbf16, #tpu.memory_space<vmem>>, %arg7: memref<1x128xf32, #tpu.memory_space<vmem>>, %arg8: memref<1x16x128xf32, #tpu.memory_space<vmem>>, %arg9: memref<544x96xbf16, #tpu.memory_space<vmem>>, %arg10: memref<288x256xbf16, #tpu.memory_space<vmem>>) attributes {dimension_semantics = [#tpu.dimension_semantics<parallel>], iteration_bounds = array<i64: 2>, scalar_prefetch = 0 : i64, scratch_operands = 2 : i64, tpu.core_type = #tpu.core_type<tc>, window_params = [{transform_indices = @transform_0, window_bounds = array<i64: 1, 512, 96>}, {pipeline_mode = #tpu.pipeline_mode<synchronous>, transform_indices = @transform_1, window_bounds = array<i64: 3, 96, 512>}, {pipeline_mode = #tpu.pipeline_mode<synchronous>, transform_indices = @transform_2, window_bounds = array<i64: 1, 512>}, {pipeline_mode = #tpu.pipeline_mode<synchronous>, transform_indices = @transform_3, window_bounds = array<i64: 3, 256, 512>}, {pipeline_mode = #tpu.pipeline_mode<synchronous>, transform_indices = @transform_4, window_bounds = array<i64: 1, 512>}, {pipeline_mode = #tpu.pipeline_mode<synchronous>, transform_indices = @transform_5, window_bounds = array<i64: 8, 256, 128>}, {pipeline_mode = #tpu.pipeline_mode<synchronous>, transform_indices = @transform_6, window_bounds = array<i64: 1, 128>}, {transform_indices = @transform_7, window_bounds = array<i64: 1, 16, 128>}]} {
    %cst = arith.constant 0.000000e+00 : bf16
    %0 = vector.broadcast %cst : bf16 to vector<16x96xbf16>
    %c0 = arith.constant 0 : index
    %c0_0 = arith.constant 0 : index
    %1 = vector.load %arg9[%c0, %c0_0] : memref<544x96xbf16, #tpu.memory_space<vmem>>, vector<16x96xbf16>
    tpu.vector_store %arg9[%c0, %c0_0], %0 {strides = array<i32>} : memref<544x96xbf16, #tpu.memory_space<vmem>>, vector<16x96xbf16>,
    %c528 = arith.constant 528 : index
    %c0_1 = arith.constant 0 : index
    %2 = vector.load %arg9[%c528, %c0_1] : memref<544x96xbf16, #tpu.memory_space<vmem>>, vector<16x96xbf16>
    tpu.vector_store %arg9[%c528, %c0_1], %0 {strides = array<i32>} : memref<544x96xbf16, #tpu.memory_space<vmem>>, vector<16x96xbf16>,
    %c0_2 = arith.constant 0 : index
    %c0_3 = arith.constant 0 : index
    %c0_4 = arith.constant 0 : index
    %3 = vector.load %arg1[%c0_2, %c0_3, %c0_4] : memref<1x512x96xbf16, #tpu.memory_space<vmem>>, vector<1x512x96xbf16>
    %4 = vector.shape_cast %3 : vector<1x512x96xbf16> to vector<512x96xbf16>
    %c16 = arith.constant 16 : index
    %c0_5 = arith.constant 0 : index
    %5 = vector.load %arg9[%c16, %c0_5] : memref<544x96xbf16, #tpu.memory_space<vmem>>, vector<512x96xbf16>
    tpu.vector_store %arg9[%c16, %c0_5], %4 {strides = array<i32>} : memref<544x96xbf16, #tpu.memory_space<vmem>>, vector<512x96xbf16>,
    %c0_6 = arith.constant 0 : index
    %c0_7 = arith.constant 0 : index
    %6 = vector.load %arg9[%c0_6, %c0_7] : memref<544x96xbf16, #tpu.memory_space<vmem>>, vector<512x96xbf16>
    %c0_8 = arith.constant 0 : index
    %c0_9 = arith.constant 0 : index
    %c0_10 = arith.constant 0 : index
    %7 = vector.load %arg2[%c0_8, %c0_9, %c0_10] : memref<3x96x512xbf16, #tpu.memory_space<vmem>>, vector<1x96x512xbf16>
    %8 = vector.shape_cast %7 : vector<1x96x512xbf16> to vector<96x512xbf16>
    %cst_11 = arith.constant dense<0.000000e+00> : vector<512x512xf32>
    %9 = tpu.matmul %6, %8, %cst_11 {dimension_numbers = #tpu.dot_dimension_numbers<[1], [0], [0], [1], [0, 0, 1, 1], [], []>} : vector<512x96xbf16>, vector<96x512xbf16>, vector<512x512xf32> -> vector<512x512xf32>
    %c16_12 = arith.constant 16 : index
    %c0_13 = arith.constant 0 : index
    %10 = vector.load %arg9[%c16_12, %c0_13] : memref<544x96xbf16, #tpu.memory_space<vmem>>, vector<512x96xbf16>
    %c1 = arith.constant 1 : index
    %c0_14 = arith.constant 0 : index
    %c0_15 = arith.constant 0 : index
    %11 = vector.load %arg2[%c1, %c0_14, %c0_15] : memref<3x96x512xbf16, #tpu.memory_space<vmem>>, vector<1x96x512xbf16>
    %12 = vector.shape_cast %11 : vector<1x96x512xbf16> to vector<96x512xbf16>
    %cst_16 = arith.constant dense<0.000000e+00> : vector<512x512xf32>
    %13 = tpu.matmul %10, %12, %cst_16 {dimension_numbers = #tpu.dot_dimension_numbers<[1], [0], [0], [1], [0, 0, 1, 1], [], []>} : vector<512x96xbf16>, vector<96x512xbf16>, vector<512x512xf32> -> vector<512x512xf32>
    %14 = arith.addf %9, %13 : vector<512x512xf32>
    %c32 = arith.constant 32 : index
    %c0_17 = arith.constant 0 : index
    %15 = vector.load %arg9[%c32, %c0_17] : memref<544x96xbf16, #tpu.memory_space<vmem>>, vector<512x96xbf16>
    %c2 = arith.constant 2 : index
    %c0_18 = arith.constant 0 : index
    %c0_19 = arith.constant 0 : index
    %16 = vector.load %arg2[%c2, %c0_18, %c0_19] : memref<3x96x512xbf16, #tpu.memory_space<vmem>>, vector<1x96x512xbf16>
    %17 = vector.shape_cast %16 : vector<1x96x512xbf16> to vector<96x512xbf16>
    %cst_20 = arith.constant dense<0.000000e+00> : vector<512x512xf32>
    %18 = tpu.matmul %15, %17, %cst_20 {dimension_numbers = #tpu.dot_dimension_numbers<[1], [0], [0], [1], [0, 0, 1, 1], [], []>} : vector<512x96xbf16>, vector<96x512xbf16>, vector<512x512xf32> -> vector<512x512xf32>
    %19 = arith.addf %14, %18 : vector<512x512xf32>
    %c0_21 = arith.constant 0 : index
    %c0_22 = arith.constant 0 : index
    %20 = vector.load %arg3[%c0_21, %c0_22] : memref<1x512xf32, #tpu.memory_space<vmem>>, vector<1x512xf32>
    %21 = vector.broadcast %20 : vector<1x512xf32> to vector<512x512xf32>
    %22 = arith.addf %19, %21 : vector<512x512xf32>
    %cst_23 = arith.constant 0.000000e+00 : f32
    %23 = vector.broadcast %cst_23 : f32 to vector<512x512xf32>
    %24 = arith.maximumf %22, %23 : vector<512x512xf32>
    %25 = vector.shape_cast %24 : vector<512x512xf32> to vector<16x32x512xf32>
    %26 = vector.extract_strided_slice %25 {offsets = [0, 0, 0], sizes = [16, 16, 512], strides = [1, 1, 1]} : vector<16x32x512xf32> to vector<16x16x512xf32>
    %27 = vector.extract_strided_slice %25 {offsets = [0, 16, 0], sizes = [16, 16, 512], strides = [1, 1, 1]} : vector<16x32x512xf32> to vector<16x16x512xf32>
    %28 = arith.maximumf %26, %27 : vector<16x16x512xf32>
    %29 = vector.extract_strided_slice %28 {offsets = [0, 0, 0], sizes = [16, 16, 256], strides = [1, 1, 1]} : vector<16x16x512xf32> to vector<16x16x256xf32>
    %30 = vector.extract_strided_slice %28 {offsets = [0, 0, 256], sizes = [16, 16, 256], strides = [1, 1, 1]} : vector<16x16x512xf32> to vector<16x16x256xf32>
    %31 = arith.maximumf %29, %30 : vector<16x16x256xf32>
    %32 = vector.shape_cast %31 : vector<16x16x256xf32> to vector<256x256xf32>
    %cst_24 = arith.constant 0.000000e+00 : bf16
    %33 = vector.broadcast %cst_24 : bf16 to vector<16x256xbf16>
    %c0_25 = arith.constant 0 : index
    %c0_26 = arith.constant 0 : index
    %34 = vector.load %arg10[%c0_25, %c0_26] : memref<288x256xbf16, #tpu.memory_space<vmem>>, vector<16x256xbf16>
    tpu.vector_store %arg10[%c0_25, %c0_26], %33 {strides = array<i32>} : memref<288x256xbf16, #tpu.memory_space<vmem>>, vector<16x256xbf16>,
    %c272 = arith.constant 272 : index
    %c0_27 = arith.constant 0 : index
    %35 = vector.load %arg10[%c272, %c0_27] : memref<288x256xbf16, #tpu.memory_space<vmem>>, vector<16x256xbf16>
    tpu.vector_store %arg10[%c272, %c0_27], %33 {strides = array<i32>} : memref<288x256xbf16, #tpu.memory_space<vmem>>, vector<16x256xbf16>,
    %36 = arith.truncf %32 : vector<256x256xf32> to vector<256x256xbf16>
    %c16_28 = arith.constant 16 : index
    %c0_29 = arith.constant 0 : index
    %37 = vector.load %arg10[%c16_28, %c0_29] : memref<288x256xbf16, #tpu.memory_space<vmem>>, vector<256x256xbf16>
    tpu.vector_store %arg10[%c16_28, %c0_29], %36 {strides = array<i32>} : memref<288x256xbf16, #tpu.memory_space<vmem>>, vector<256x256xbf16>,
    %c0_30 = arith.constant 0 : index
    %c0_31 = arith.constant 0 : index
    %38 = vector.load %arg10[%c0_30, %c0_31] : memref<288x256xbf16, #tpu.memory_space<vmem>>, vector<256x256xbf16>
    %c0_32 = arith.constant 0 : index
    %c0_33 = arith.constant 0 : index
    %c0_34 = arith.constant 0 : index
    %39 = vector.load %arg4[%c0_32, %c0_33, %c0_34] : memref<3x256x512xbf16, #tpu.memory_space<vmem>>, vector<1x256x512xbf16>
    %40 = vector.shape_cast %39 : vector<1x256x512xbf16> to vector<256x512xbf16>
    %cst_35 = arith.constant dense<0.000000e+00> : vector<256x512xf32>
    %41 = tpu.matmul %38, %40, %cst_35 {dimension_numbers = #tpu.dot_dimension_numbers<[1], [0], [0], [1], [0, 0, 1, 1], [], []>} : vector<256x256xbf16>, vector<256x512xbf16>, vector<256x512xf32> -> vector<256x512xf32>
    %c16_36 = arith.constant 16 : index
    %c0_37 = arith.constant 0 : index
    %42 = vector.load %arg10[%c16_36, %c0_37] : memref<288x256xbf16, #tpu.memory_space<vmem>>, vector<256x256xbf16>
    %c1_38 = arith.constant 1 : index
    %c0_39 = arith.constant 0 : index
    %c0_40 = arith.constant 0 : index
    %43 = vector.load %arg4[%c1_38, %c0_39, %c0_40] : memref<3x256x512xbf16, #tpu.memory_space<vmem>>, vector<1x256x512xbf16>
    %44 = vector.shape_cast %43 : vector<1x256x512xbf16> to vector<256x512xbf16>
    %cst_41 = arith.constant dense<0.000000e+00> : vector<256x512xf32>
    %45 = tpu.matmul %42, %44, %cst_41 {dimension_numbers = #tpu.dot_dimension_numbers<[1], [0], [0], [1], [0, 0, 1, 1], [], []>} : vector<256x256xbf16>, vector<256x512xbf16>, vector<256x512xf32> -> vector<256x512xf32>
    %46 = arith.addf %41, %45 : vector<256x512xf32>
    %c32_42 = arith.constant 32 : index
    %c0_43 = arith.constant 0 : index
    %47 = vector.load %arg10[%c32_42, %c0_43] : memref<288x256xbf16, #tpu.memory_space<vmem>>, vector<256x256xbf16>
    %c2_44 = arith.constant 2 : index
    %c0_45 = arith.constant 0 : index
    %c0_46 = arith.constant 0 : index
    %48 = vector.load %arg4[%c2_44, %c0_45, %c0_46] : memref<3x256x512xbf16, #tpu.memory_space<vmem>>, vector<1x256x512xbf16>
    %49 = vector.shape_cast %48 : vector<1x256x512xbf16> to vector<256x512xbf16>
    %cst_47 = arith.constant dense<0.000000e+00> : vector<256x512xf32>
    %50 = tpu.matmul %47, %49, %cst_47 {dimension_numbers = #tpu.dot_dimension_numbers<[1], [0], [0], [1], [0, 0, 1, 1], [], []>} : vector<256x256xbf16>, vector<256x512xbf16>, vector<256x512xf32> -> vector<256x512xf32>
    %51 = arith.addf %46, %50 : vector<256x512xf32>
    %c0_48 = arith.constant 0 : index
    %c0_49 = arith.constant 0 : index
    %52 = vector.load %arg5[%c0_48, %c0_49] : memref<1x512xf32, #tpu.memory_space<vmem>>, vector<1x512xf32>
    %53 = vector.broadcast %52 : vector<1x512xf32> to vector<256x512xf32>
    %54 = arith.addf %51, %53 : vector<256x512xf32>
    %cst_50 = arith.constant 0.000000e+00 : f32
    %55 = vector.broadcast %cst_50 : f32 to vector<256x512xf32>
    %56 = arith.maximumf %54, %55 : vector<256x512xf32>
    %57 = vector.shape_cast %56 : vector<256x512xf32> to vector<8x32x512xf32>
    %58 = vector.extract_strided_slice %57 {offsets = [0, 0, 0], sizes = [8, 16, 512], strides = [1, 1, 1]} : vector<8x32x512xf32> to vector<8x16x512xf32>
    %59 = vector.extract_strided_slice %57 {offsets = [0, 16, 0], sizes = [8, 16, 512], strides = [1, 1, 1]} : vector<8x32x512xf32> to vector<8x16x512xf32>
    %60 = arith.maximumf %58, %59 : vector<8x16x512xf32>
    %61 = vector.extract_strided_slice %60 {offsets = [0, 0, 0], sizes = [8, 16, 256], strides = [1, 1, 1]} : vector<8x16x512xf32> to vector<8x16x256xf32>
    %62 = vector.extract_strided_slice %60 {offsets = [0, 0, 256], sizes = [8, 16, 256], strides = [1, 1, 1]} : vector<8x16x512xf32> to vector<8x16x256xf32>
    %63 = arith.maximumf %61, %62 : vector<8x16x256xf32>
    %64 = vector.shape_cast %63 : vector<8x16x256xf32> to vector<128x256xf32>
    %65 = arith.truncf %64 : vector<128x256xf32> to vector<128x256xbf16>
    %cst_51 = arith.constant 0.000000e+00 : f32
    %66 = vector.broadcast %cst_51 : f32 to vector<16x128xf32>
    %67 = vector.extract_strided_slice %65 {offsets = [0, 0], sizes = [16, 256], strides = [1, 1]} : vector<128x256xbf16> to vector<16x256xbf16>
    %c0_52 = arith.constant 0 : index
    %c0_53 = arith.constant 0 : index
    %c0_54 = arith.constant 0 : index
    %68 = vector.load %arg6[%c0_52, %c0_53, %c0_54] : memref<8x256x128xbf16, #tpu.memory_space<vmem>>, vector<1x256x128xbf16>
    %69 = vector.shape_cast %68 : vector<1x256x128xbf16> to vector<256x128xbf16>
    %cst_55 = arith.constant dense<0.000000e+00> : vector<16x128xf32>
    %70 = tpu.matmul %67, %69, %cst_55 {dimension_numbers = #tpu.dot_dimension_numbers<[1], [0], [0], [1], [0, 0, 1, 1], [], []>} : vector<16x256xbf16>, vector<256x128xbf16>, vector<16x128xf32> -> vector<16x128xf32>
    %71 = arith.addf %66, %70 : vector<16x128xf32>
    %72 = vector.extract_strided_slice %65 {offsets = [16, 0], sizes = [16, 256], strides = [1, 1]} : vector<128x256xbf16> to vector<16x256xbf16>
    %c1_56 = arith.constant 1 : index
    %c0_57 = arith.constant 0 : index
    %c0_58 = arith.constant 0 : index
    %73 = vector.load %arg6[%c1_56, %c0_57, %c0_58] : memref<8x256x128xbf16, #tpu.memory_space<vmem>>, vector<1x256x128xbf16>
    %74 = vector.shape_cast %73 : vector<1x256x128xbf16> to vector<256x128xbf16>
    %cst_59 = arith.constant dense<0.000000e+00> : vector<16x128xf32>
    %75 = tpu.matmul %72, %74, %cst_59 {dimension_numbers = #tpu.dot_dimension_numbers<[1], [0], [0], [1], [0, 0, 1, 1], [], []>} : vector<16x256xbf16>, vector<256x128xbf16>, vector<16x128xf32> -> vector<16x128xf32>
    %76 = arith.addf %71, %75 : vector<16x128xf32>
    %77 = vector.extract_strided_slice %65 {offsets = [32, 0], sizes = [16, 256], strides = [1, 1]} : vector<128x256xbf16> to vector<16x256xbf16>
    %c2_60 = arith.constant 2 : index
    %c0_61 = arith.constant 0 : index
    %c0_62 = arith.constant 0 : index
    %78 = vector.load %arg6[%c2_60, %c0_61, %c0_62] : memref<8x256x128xbf16, #tpu.memory_space<vmem>>, vector<1x256x128xbf16>
    %79 = vector.shape_cast %78 : vector<1x256x128xbf16> to vector<256x128xbf16>
    %cst_63 = arith.constant dense<0.000000e+00> : vector<16x128xf32>
    %80 = tpu.matmul %77, %79, %cst_63 {dimension_numbers = #tpu.dot_dimension_numbers<[1], [0], [0], [1], [0, 0, 1, 1], [], []>} : vector<16x256xbf16>, vector<256x128xbf16>, vector<16x128xf32> -> vector<16x128xf32>
    %81 = arith.addf %76, %80 : vector<16x128xf32>
    %82 = vector.extract_strided_slice %65 {offsets = [48, 0], sizes = [16, 256], strides = [1, 1]} : vector<128x256xbf16> to vector<16x256xbf16>
    %c3 = arith.constant 3 : index
    %c0_64 = arith.constant 0 : index
    %c0_65 = arith.constant 0 : index
    %83 = vector.load %arg6[%c3, %c0_64, %c0_65] : memref<8x256x128xbf16, #tpu.memory_space<vmem>>, vector<1x256x128xbf16>
    %84 = vector.shape_cast %83 : vector<1x256x128xbf16> to vector<256x128xbf16>
    %cst_66 = arith.constant dense<0.000000e+00> : vector<16x128xf32>
    %85 = tpu.matmul %82, %84, %cst_66 {dimension_numbers = #tpu.dot_dimension_numbers<[1], [0], [0], [1], [0, 0, 1, 1], [], []>} : vector<16x256xbf16>, vector<256x128xbf16>, vector<16x128xf32> -> vector<16x128xf32>
    %86 = arith.addf %81, %85 : vector<16x128xf32>
    %87 = vector.extract_strided_slice %65 {offsets = [64, 0], sizes = [16, 256], strides = [1, 1]} : vector<128x256xbf16> to vector<16x256xbf16>
    %c4 = arith.constant 4 : index
    %c0_67 = arith.constant 0 : index
    %c0_68 = arith.constant 0 : index
    %88 = vector.load %arg6[%c4, %c0_67, %c0_68] : memref<8x256x128xbf16, #tpu.memory_space<vmem>>, vector<1x256x128xbf16>
    %89 = vector.shape_cast %88 : vector<1x256x128xbf16> to vector<256x128xbf16>
    %cst_69 = arith.constant dense<0.000000e+00> : vector<16x128xf32>
    %90 = tpu.matmul %87, %89, %cst_69 {dimension_numbers = #tpu.dot_dimension_numbers<[1], [0], [0], [1], [0, 0, 1, 1], [], []>} : vector<16x256xbf16>, vector<256x128xbf16>, vector<16x128xf32> -> vector<16x128xf32>
    %91 = arith.addf %86, %90 : vector<16x128xf32>
    %92 = vector.extract_strided_slice %65 {offsets = [80, 0], sizes = [16, 256], strides = [1, 1]} : vector<128x256xbf16> to vector<16x256xbf16>
    %c5 = arith.constant 5 : index
    %c0_70 = arith.constant 0 : index
    %c0_71 = arith.constant 0 : index
    %93 = vector.load %arg6[%c5, %c0_70, %c0_71] : memref<8x256x128xbf16, #tpu.memory_space<vmem>>, vector<1x256x128xbf16>
    %94 = vector.shape_cast %93 : vector<1x256x128xbf16> to vector<256x128xbf16>
    %cst_72 = arith.constant dense<0.000000e+00> : vector<16x128xf32>
    %95 = tpu.matmul %92, %94, %cst_72 {dimension_numbers = #tpu.dot_dimension_numbers<[1], [0], [0], [1], [0, 0, 1, 1], [], []>} : vector<16x256xbf16>, vector<256x128xbf16>, vector<16x128xf32> -> vector<16x128xf32>
    %96 = arith.addf %91, %95 : vector<16x128xf32>
    %97 = vector.extract_strided_slice %65 {offsets = [96, 0], sizes = [16, 256], strides = [1, 1]} : vector<128x256xbf16> to vector<16x256xbf16>
    %c6 = arith.constant 6 : index
    %c0_73 = arith.constant 0 : index
    %c0_74 = arith.constant 0 : index
    %98 = vector.load %arg6[%c6, %c0_73, %c0_74] : memref<8x256x128xbf16, #tpu.memory_space<vmem>>, vector<1x256x128xbf16>
    %99 = vector.shape_cast %98 : vector<1x256x128xbf16> to vector<256x128xbf16>
    %cst_75 = arith.constant dense<0.000000e+00> : vector<16x128xf32>
    %100 = tpu.matmul %97, %99, %cst_75 {dimension_numbers = #tpu.dot_dimension_numbers<[1], [0], [0], [1], [0, 0, 1, 1], [], []>} : vector<16x256xbf16>, vector<256x128xbf16>, vector<16x128xf32> -> vector<16x128xf32>
    %101 = arith.addf %96, %100 : vector<16x128xf32>
    %102 = vector.extract_strided_slice %65 {offsets = [112, 0], sizes = [16, 256], strides = [1, 1]} : vector<128x256xbf16> to vector<16x256xbf16>
    %c7 = arith.constant 7 : index
    %c0_76 = arith.constant 0 : index
    %c0_77 = arith.constant 0 : index
    %103 = vector.load %arg6[%c7, %c0_76, %c0_77] : memref<8x256x128xbf16, #tpu.memory_space<vmem>>, vector<1x256x128xbf16>
    %104 = vector.shape_cast %103 : vector<1x256x128xbf16> to vector<256x128xbf16>
    %cst_78 = arith.constant dense<0.000000e+00> : vector<16x128xf32>
    %105 = tpu.matmul %102, %104, %cst_78 {dimension_numbers = #tpu.dot_dimension_numbers<[1], [0], [0], [1], [0, 0, 1, 1], [], []>} : vector<16x256xbf16>, vector<256x128xbf16>, vector<16x128xf32> -> vector<16x128xf32>
    %106 = arith.addf %101, %105 : vector<16x128xf32>
    %c0_79 = arith.constant 0 : index
    %c0_80 = arith.constant 0 : index
    %107 = vector.load %arg7[%c0_79, %c0_80] : memref<1x128xf32, #tpu.memory_space<vmem>>, vector<1x128xf32>
    %108 = vector.broadcast %107 : vector<1x128xf32> to vector<16x128xf32>
    %109 = arith.addf %106, %108 : vector<16x128xf32>
    %c0_81 = arith.constant 0 : index
    %c0_82 = arith.constant 0 : index
    %c0_83 = arith.constant 0 : index
    %110 = vector.load %arg8[%c0_81, %c0_82, %c0_83] : memref<1x16x128xf32, #tpu.memory_space<vmem>>, vector<1x16x128xf32>
    %111 = vector.shape_cast %110 : vector<1x16x128xf32> to vector<16x128xf32>
    %112 = vector.shape_cast %109 : vector<16x128xf32> to vector<1x16x128xf32>
    tpu.vector_store %arg8[%c0_81, %c0_82, %c0_83], %112 {strides = array<i32>} : memref<1x16x128xf32, #tpu.memory_space<vmem>>, vector<1x16x128xf32>,
    return
  }
  func.func @transform_0(%arg0: i32) -> (i32, i32, i32) {
    %c0_i32 = arith.constant 0 : i32
    %c0_i32_0 = arith.constant 0 : i32
    %c0_i32_1 = arith.constant 0 : i32
    return %arg0, %c0_i32, %c0_i32_0 : i32, i32, i32
  }
  func.func @transform_1(%arg0: i32) -> (i32, i32, i32) {
    %c0_i32 = arith.constant 0 : i32
    %c0_i32_0 = arith.constant 0 : i32
    %c0_i32_1 = arith.constant 0 : i32
    %c0_i32_2 = arith.constant 0 : i32
    return %c0_i32, %c0_i32_0, %c0_i32_1 : i32, i32, i32
  }
  func.func @transform_2(%arg0: i32) -> (i32, i32) {
    %c0_i32 = arith.constant 0 : i32
    %c0_i32_0 = arith.constant 0 : i32
    %c0_i32_1 = arith.constant 0 : i32
    return %c0_i32, %c0_i32_0 : i32, i32
  }
  func.func @transform_3(%arg0: i32) -> (i32, i32, i32) {
    %c0_i32 = arith.constant 0 : i32
    %c0_i32_0 = arith.constant 0 : i32
    %c0_i32_1 = arith.constant 0 : i32
    %c0_i32_2 = arith.constant 0 : i32
    return %c0_i32, %c0_i32_0, %c0_i32_1 : i32, i32, i32
  }
  func.func @transform_4(%arg0: i32) -> (i32, i32) {
    %c0_i32 = arith.constant 0 : i32
    %c0_i32_0 = arith.constant 0 : i32
    %c0_i32_1 = arith.constant 0 : i32
    return %c0_i32, %c0_i32_0 : i32, i32
  }
  func.func @transform_5(%arg0: i32) -> (i32, i32, i32) {
    %c0_i32 = arith.constant 0 : i32
    %c0_i32_0 = arith.constant 0 : i32
    %c0_i32_1 = arith.constant 0 : i32
    %c0_i32_2 = arith.constant 0 : i32
    return %c0_i32, %c0_i32_0, %c0_i32_1 : i32, i32, i32
  }
  func.func @transform_6(%arg0: i32) -> (i32, i32) {
    %c0_i32 = arith.constant 0 : i32
    %c0_i32_0 = arith.constant 0 : i32
    %c0_i32_1 = arith.constant 0 : i32
    return %c0_i32, %c0_i32_0 : i32, i32
  }
  func.func @transform_7(%arg0: i32) -> (i32, i32, i32) {
    %c0_i32 = arith.constant 0 : i32
    %c0_i32_0 = arith.constant 0 : i32
    %c0_i32_1 = arith.constant 0 : i32
    return %arg0, %c0_i32, %c0_i32_0 : i32, i32, i32
  }
}

</mosaic_0001>

<bundles_post_ra>
// kernel: tpu_custom_call.1
= control target key start
LH: loop header
LB: loop body
LE: loop exit
PB: predicated region body
PF: predicated region fallthrough
CT: control target
= control target key end

     0   :  { %12 = vsyncpa [#allocation5], 0  ;;  %s13092_s0 = inlined_call_operand.vmem [shape: bf16[2,512,96], index: 0, kind: input, shape index: {}]   ;;  %s13093_s1 = inlined_call_operand.vmem [shape: bf16[3,96,512], index: 1, kind: input, shape index: {}]   ;;  %s13094_s2 = inlined_call_operand.vmem [shape: f32[1,512], index: 2, kind: input, shape index: {}]   ;;  %s13095_s3 = inlined_call_operand.hbm [shape: bf16[3,256,512], index: 3, kind: input, shape index: {}]   ;;  %s13096_s4 = inlined_call_operand.vmem [shape: f32[1,512], index: 4, kind: input, shape index: {}]   ;;  %s13097_s5 = inlined_call_operand.hbm [shape: bf16[8,256,128], index: 5, kind: input, shape index: {}]   ;;  %s13098_s6 = inlined_call_operand.vmem [shape: f32[1,128], index: 6, kind: input, shape index: {}]   ;;  %s13099_s7 = inlined_call_operand.hbm [shape: f32[2,16,128], index: 7, kind: output, shape index: {}]  }
   0x1   :  { %13 = vsyncpa [#allocation8], 0 }
   0x2   :  { %14 = vsyncpa [#allocation6], 0 }
   0x3   :  { %16 = vsyncpa [#allocation6 + $0x1], 0  ;;  %s11289_s24 = smov 0   ;;  %s11291_s25 = smov 0  }
   0x4   :  { %s11293_s26 = smov 0   ;;  %s11295_s27 = smov 0  }
   0x5 LB: > { %s11310_s28 = sadd.s32 4294967295, %s11237_s27   ;;  %s8837_s29 = sadd.s32 4294967294, %s11237_s27   ;;  %s11237_s27 = sphi %s11295_s27, %s13150_s27   ;;  %s11233_s26 = sphi %s11293_s26, %s13149_s26   ;;  %s11229_s25 = sphi %s11291_s25, %s13148_s25   ;;  %s11225_s24 = sphi %s11289_s24, %s13147_s24  }
   0x6   : > { %s11314_s30 = sadd.s32 1, %s11237_s27   ;;  %s181_s8 = sadd.s32 1, %s11233_s26 }
   0x7   : > { %s178_s9 = ssub.s32 %s11237_s27, %s11314_s30  ;;  %p191_p0 = scmp.ne.s32.totalorder %s11233_s26, %s11229_s25 }
   0x8   : > { %p179_p1 = scmp.eq.s32.totalorder %s178_s9, 0  ;;  %p192_p2 = scmp.eq.s32.totalorder %s11310_s28, 1 }
   0x9   : > { %p197_p3 = scmp.ne.s32.totalorder %s11229_s25, %s11225_s24  ;;  %p198_p4 = scmp.eq.s32.totalorder %s8837_s29, 1 }
   0xa   : > { %s11325_s10 = scalar_select %p179_p1, %s11233_s26, %s181_s8  }
   0xb   : > { %p11327_p5 = por %p192_p2, %p191_p0  ;;  %p11331_p6 = por %p198_p4, %p197_p3 }
   0xc   : > { %13119 = sst [smem:[#allocation13_spill]] %s11325_s10  ;;  %p8838_p7 = scmp.ge.s32.totalorder %s11237_s27, 1 }
   0xd   : > { %s13120_s11 = scalar_select %p11327_p5, 1, 0 }
   0xe   : > { %s13121_s12 = scalar_select %p11331_p6, 1, 0 }
   0xf   : > { %p205_p8 = scmp.lt.s32.totalorder %s11237_s27, 3  ;;  %p13100_p9 = scmp.eq.s32.totalorder %s11310_s28, 0 }
  0x10   : > { %s11239_s14 = smov [#allocation4]   ;;  %s11240_s17 = smov [#allocation7]  }
  0x11   : > { %p11338_p10 = pnand %p8838_p7, %p205_p8  ;;  %s223_s15 = sshll.u32 %s11239_s14, 4  ;;  %s224_s15 = int_to_ptr.vmem [resolvable:$true] %s223_s15 }
  0x12   : > { %s239_s18 = sshll.u32 %s11240_s17, 4  ;;  %s11111_s21 = scalar_lea.hbm %s13095_s3, 24576  ;;  %s11350_s18 = int_to_ptr.vmem [resolvable:$true] %s239_s18 }
  0x13   : > { %s13122_s13 = scalar_select %p11338_p10, 1, 0 }
  0x14   : > { %p10474_p11 = pneg %p11338_p10  ;;  %p11112_p13 = scmp.ne.s32.totalorder %s13095_s3, %s11111_s21 }
  0x15   : > { %p11118_p3 = scmp.lt.u32.totalorder %s11111_s21, %s13095_s3 }
  0x16   : > { %p11346_p12 = pnand %p13100_p9, %p10474_p11 }
  0x18   : > { %p11113_p0 = pneg %p11346_p12 }
  0x1a   : > { %p11114_p1 = pnand %p11113_p0, %p11112_p13 }
  0x1c   : > { %p11115_p2 = pneg %p11114_p1 }
  0x1e   : > { %p11120_p4 = pnand %p11118_p3, %p11115_p2 }
  0x20   : > { %11123 = shalt.err (!%p11120_p4)
}
  0x21   : > { %s11124_s9 = scalar_lea.vmem %s224_s15, 24576  ;;  %p11132_p9 = scmp.lt.s32.totalorder %s224_s15, %s224_s15 }
  0x22   : > { %p11125_p7 = scmp.ne.s32.totalorder %s224_s15, %s11124_s9  ;;  %p11133_p6 = scmp.lt.s32.totalorder %s11124_s9, %s11124_s9 }
  0x24   : > { %p11127_p8 = pnand %p11125_p7, %p11113_p0  ;;  %p11134_p5 = por %p11133_p6, %p11132_p9 }
  0x26   : > { %p11128_p11 = pneg %p11127_p8 }
  0x28   : > { %p11135_p10 = pnand %p11134_p5, %p11128_p11 }
  0x2a   : > { %11138 = shalt.err (!%p11135_p10)
}
  0x2b   : > { %s11241_s14 = smov 256   ;;  %s11242_s17 = smov 16  }
  0x2c   : > { %10477 = dma.hbm_to_vmem [thread:$0]  (!%p11346_p12), %s13095_s3, 24576, %s224_s15, [#allocation5], %s11241_s14, %s11241_s14, %s11242_s17  }
  0x2d   : > { %s11139_s23 = scalar_lea.hbm %s13097_s5, 16384 }
  0x2e   : > { %p11140_p13 = scmp.ne.s32.totalorder %s13097_s5, %s11139_s23  ;;  %p11146_p9 = scmp.lt.u32.totalorder %s11139_s23, %s13097_s5 }
  0x30   : > { %p11142_p5 = pnand %p11140_p13, %p11113_p0 }
  0x32   : > { %p11143_p6 = pneg %p11142_p5 }
  0x34   : > { %p11148_p10 = pnand %p11146_p9, %p11143_p6 }
  0x36   : > { %11151 = shalt.err (!%p11148_p10)
}
  0x37   : > { %s11152_s15 = scalar_lea.vmem %s11350_s18, 16384  ;;  %p11160_p4 = scmp.lt.s32.totalorder %s11350_s18, %s11350_s18 }
  0x38   : > { %p11153_p1 = scmp.ne.s32.totalorder %s11350_s18, %s11152_s15  ;;  %p11161_p7 = scmp.lt.s32.totalorder %s11152_s15, %s11152_s15 }
  0x3a   : > { %p11155_p2 = pnand %p11153_p1, %p11113_p0  ;;  %p11162_p8 = por %p11161_p7, %p11160_p4 }
  0x3c   : > { %p11156_p3 = pneg %p11155_p2 }
  0x3e   : > { %p11163_p11 = pnand %p11162_p8, %p11156_p3 }
  0x40   : > { %11166 = shalt.err (!%p11163_p11)
}
  0x41   : > { %s11243_s10 = smov 64   ;;  %s11244_s14 = smov 4  }
  0x42   : > { %10480 = dma.hbm_to_vmem [thread:$0]  (!%p11346_p12), %s13097_s5, 16384, %s11350_s18, [#allocation8], %s11243_s10, %s11243_s10, %s11244_s14  }
  0x43   : > { %p13124_p13 = scmp.ne.s32.totalorder %s13122_s13, 0 }
  0x45   : > { %266 = sbr.rel (%p13124_p13) target bundleno = 1814 (0x716), region = 48 }
  0x4c   : > { %p13125_p0 = scmp.eq.s32.totalorder %s11310_s28, 0 }
  0x4e   : > { %11212 = dma.done.wait (%p13125_p0), [#allocation5], 24576   ;;  %p13126_p5 = pmov %p13125_p0 }
  0x4f   : > { %p13127_p6 = pmov %p13125_p0 }
  0x50   : > { %11214 = vsyncadd (%p13126_p5), [#allocation5], 4294942720 }
  0x51   : > { %11216 = dma.done.wait (%p13127_p6), [#allocation8], 16384   ;;  %p13128_p9 = pmov %p13125_p0 }
  0x52   : > { %vm308_vm0 = vcmask 785408   ;;  %v13107_v0 = vmov 0   ;;  %v10531_v1 = vld [vmem:[%s13093_s1 + $0xc4] ss:$16 sps:$4 sm:$0xff]   ;;  %v10533_v2 = vld [vmem:[%s13093_s1 + $0xcc] ss:$16 sps:$4 sm:$0xff]  }
  0x53   : > { %11218 = vsyncadd (%p13128_p9), [#allocation8], 4294950912  ;;  %929 = vmatprep.mubr.bf16.mxu0 %v13107_v0  ;;  %1282 = vmatprep.mubr.bf16.mxu1 %v13107_v0  ;;  %309 = vst.msk [vmem:[#allocation2] sm:$0xff] %vm308_vm0, %v13107_v0  ;;  %v10535_v3 = vld [vmem:[%s13093_s1 + $0xc0] ss:$16 sps:$4 sm:$0xff]   ;;  %p302_p12 = scmp.lt.s32.totalorder %s11310_s28, 1 }
  0x54   : > { %310 = vst.msk [vmem:[#allocation2 + $0x108] sm:$0xff] %vm308_vm0, %v13107_v0  ;;  %897 = vmatprep.subr.bf16.mxu0 %v10531_v1  ;;  %v10536_v4 = vld [vmem:[%s13093_s1 + $0xc8] ss:$16 sps:$4 sm:$0xff]   ;;  %1250 = vmatprep.subr.bf16.mxu1 %v10533_v2  ;;  %v10537_v5 = vld [vmem:[%s13093_s1 + $0xe4] ss:$16 sps:$4 sm:$0xff]   ;;  %s299_s29 = sand.u32 1, %s11229_s25  }
  0x55   : > { %898 = vmatpush1.bf16.msra.mxu0 %v10535_v3  ;;  %1251 = vmatpush1.bf16.msra.mxu1 %v10536_v4  ;;  %v10539_v6 = vld [vmem:[%s13093_s1 + $0xec] ss:$16 sps:$4 sm:$0xff]   ;;  %v10541_v7 = vld [vmem:[%s13093_s1 + $0xe0] ss:$16 sps:$4 sm:$0xff]   ;;  %v10542_v8 = vld [vmem:[%s13093_s1 + $0xe8] ss:$16 sps:$4 sm:$0xff]  }
  0x56   : > { %899 = vmatprep.subr.bf16.mxu0 %v10537_v5  ;;  %1252 = vmatprep.subr.bf16.mxu1 %v10539_v6  ;;  %v10543_v9 = vld [vmem:[%s13093_s1 + $0x104] ss:$16 sps:$4 sm:$0xff]   ;;  %s303_s20 = scalar_select %p302_p12, %s11310_s28, 1  ;;  %v10545_v10 = vld [vmem:[%s13093_s1 + $0x10c] ss:$16 sps:$4 sm:$0xff]  }
  0x57   : > { %v10547_v11 = vld [vmem:[%s13093_s1 + $0x100] ss:$16 sps:$4 sm:$0xff]   ;;  %v10548_v12 = vld [vmem:[%s13093_s1 + $0x108] ss:$16 sps:$4 sm:$0xff]   ;;  %v10549_v13 = vld [vmem:[%s13093_s1 + $0x124] ss:$16 sps:$4 sm:$0xff]  }
  0x58   : > { %v10551_v14 = vld [vmem:[%s13093_s1 + $0x12c] ss:$16 sps:$4 sm:$0xff]   ;;  %s9518_s19 = sshll.u32 %s303_s20, 8  ;;  %v10553_v15 = vld [vmem:[%s13093_s1 + $0x120] ss:$16 sps:$4 sm:$0xff]   ;;  %s8845_s8 = sshll.u32 %s299_s29, 4 }
  0x59   : > { %900 = vmatpush1.bf16.msra.mxu0 %v10541_v7  ;;  %1253 = vmatpush1.bf16.msra.mxu1 %v10542_v8  ;;  %v10554_v16 = vld [vmem:[%s13093_s1 + $0x128] ss:$16 sps:$4 sm:$0xff]   ;;  %v10555_v17 = vld [vmem:[%s13093_s1 + $0x144] ss:$16 sps:$4 sm:$0xff]   ;;  %v10557_v18 = vld [vmem:[%s13093_s1 + $0x14c] ss:$16 sps:$4 sm:$0xff]   ;;  %s11474_s15 = scalar_lea.vmem %s13092_s0, %s9518_s19 }
  0x5a   : > { %901 = vmatprep.subr.bf16.mxu0 %v10543_v9  ;;  %1254 = vmatprep.subr.bf16.mxu1 %v10545_v10  ;;  %v10559_v19 = vld [vmem:[%s13093_s1 + $0x140] ss:$16 sps:$4 sm:$0xff]   ;;  %v10560_v20 = vld [vmem:[%s13093_s1 + $0x148] ss:$16 sps:$4 sm:$0xff]   ;;  %v10561_v21 = vld [vmem:[%s13093_s1 + $0x164] ss:$16 sps:$4 sm:$0xff]  }
  0x5b   : > { %v10567_v22 = vld [vmem:[%s11474_s15] sm:$0xff]   ;;  %v10563_v23 = vld [vmem:[%s13093_s1 + $0x16c] ss:$16 sps:$4 sm:$0xff]   ;;  %v10566_v25 = vld [vmem:[%s13093_s1 + $0x168] ss:$16 sps:$4 sm:$0xff]   ;;  %s301_s10 = scalar_lea.vmem [#allocation9], %s8845_s8 }
  0x5c   : > { %v10565_v24 = vld [vmem:[%s13093_s1 + $0x160] ss:$16 sps:$4 sm:$0xff]   ;;  %567 = vst.msk [vmem:[#allocation2 + $0x8] sm:$0xff] %vm308_vm0, %v10567_v22  ;;  %v10570_v26 = vld [vmem:[%s13093_s1 + $0x4] ss:$16 sps:$4 sm:$0xff]   ;;  %v10574_v28 = vld [vmem:[%s11474_s15 + $0x8] sm:$0xff]  }
  0x5d   : > { %902 = vmatpush1.bf16.msra.mxu0 %v10547_v11  ;;  %1255 = vmatpush1.bf16.msra.mxu1 %v10548_v12  ;;  %v10573_v27 = vld [vmem:[%s13093_s1 + $0xc] ss:$16 sps:$4 sm:$0xff]   ;;  %v10575_v29 = vld [vmem:[%s11474_s15 + $0x10] sm:$0xff]   ;;  %v10571_v31 = vld [vmem:[%s13093_s1 + $0x8] ss:$16 sps:$4 sm:$0xff]   ;;  %568 = vst.msk [vmem:[#allocation2 + $0x10] sm:$0xff] %vm308_vm0, %v10574_v28 }
  0x5e   : > { %903 = vmatprep.subr.bf16.mxu0 %v10549_v13  ;;  %1256 = vmatprep.subr.bf16.mxu1 %v10551_v14  ;;  %v10568_v30 = vld [vmem:[%s13093_s1] ss:$16 sps:$4 sm:$0xff]   ;;  %v10576_v32 = vld [vmem:[%s11474_s15 + $0x18] sm:$0xff]   ;;  %569 = vst.msk [vmem:[#allocation2 + $0x18] sm:$0xff] %vm308_vm0, %v10575_v29  ;;  %v10578_v34 = vld [vmem:[%s11474_s15 + $0x28] sm:$0xff]   ;;  %s8753_s14 = sshll.u32 %s301_s10, 4  ;;  %s13044_s14 = int_to_ptr.vmem [resolvable:$true] %s8753_s14 }
  0x5f   : > { %v10577_v33 = vld [vmem:[%s11474_s15 + $0x20] sm:$0xff]   ;;  %570 = vst.msk [vmem:[#allocation2 + $0x20] sm:$0xff] %vm308_vm0, %v10576_v32  ;;  %572 = vst.msk [vmem:[#allocation2 + $0x30] sm:$0xff] %vm308_vm0, %v10578_v34  ;;  %v10582_v38 = vld [vmem:[%s13093_s1 + $0x28] ss:$16 sps:$4 sm:$0xff]   ;;  %s9519_s17 = sshll.u32 %s11310_s28, 8 }
  0x60   : > { %571 = vst.msk [vmem:[#allocation2 + $0x28] sm:$0xff] %vm308_vm0, %v10577_v33  ;;  %v10579_v36 = vld [vmem:[%s13093_s1 + $0x20] ss:$16 sps:$4 sm:$0xff]   ;;  %v10581_v37 = vld [vmem:[%s13093_s1 + $0x24] ss:$16 sps:$4 sm:$0xff]   ;;  %v10586_v41 = vld [vmem:[%s11474_s15 + $0x38] sm:$0xff]   ;;  %s13049_s16 = scalar_lea.hbm %s13099_s7, %s9519_s17 }
  0x61   : > { %904 = vmatpush1.bf16.msra.mxu0 %v10553_v15  ;;  %1257 = vmatpush1.bf16.msra.mxu1 %v10554_v16  ;;  %v10584_v39 = vld [vmem:[%s13093_s1 + $0x2c] ss:$16 sps:$4 sm:$0xff]   ;;  %v10585_v40 = vld [vmem:[%s11474_s15 + $0x30] sm:$0xff]   ;;  %574 = vst.msk [vmem:[#allocation2 + $0x40] sm:$0xff] %vm308_vm0, %v10586_v41  ;;  %v10587_v42 = vld [vmem:[%s11474_s15 + $0x40] sm:$0xff]   ;;  %s13051_s18 = scalar_lea.sflag [#allocation6], %s299_s29 }
  0x62   : > { %905 = vmatprep.subr.bf16.mxu0 %v10555_v17  ;;  %1258 = vmatprep.subr.bf16.mxu1 %v10557_v18  ;;  %573 = vst.msk [vmem:[#allocation2 + $0x38] sm:$0xff] %vm308_vm0, %v10585_v40  ;;  %v10588_v44 = vld [vmem:[%s11474_s15 + $0x48] sm:$0xff]   ;;  %575 = vst.msk [vmem:[#allocation2 + $0x48] sm:$0xff] %vm308_vm0, %v10587_v42  ;;  %v10589_v45 = vld [vmem:[%s11474_s15 + $0x50] sm:$0xff]   ;;  %s11167_s19 = scalar_lea.vmem %s13044_s14, 256  ;;  %p13144_p1 = scmp.ne.s32.totalorder %s13120_s11, 0 }
  0x63   : > { %v600_v35 = vld [vmem:[#allocation2 + $0x8] sm:$0xff]  ;;  %576 = vst.msk [vmem:[#allocation2 + $0x50] sm:$0xff] %vm308_vm0, %v10588_v44  ;;  %v10590_v46 = vld [vmem:[%s13093_s1 + $0x40] ss:$16 sps:$4 sm:$0xff]   ;;  %v10592_v47 = vld [vmem:[%s13093_s1 + $0x44] ss:$16 sps:$4 sm:$0xff]   ;;  %p11168_p10 = scmp.ne.s32.totalorder %s13044_s14, %s11167_s19 }
  0x64   : > { %v601_v43 = vld [vmem:[#allocation2 + $0x10] sm:$0xff]  ;;  %577 = vst.msk [vmem:[#allocation2 + $0x58] sm:$0xff] %vm308_vm0, %v10589_v45  ;;  %v10593_v48 = vld [vmem:[%s13093_s1 + $0x48] ss:$16 sps:$4 sm:$0xff]   ;;  %v10595_v49 = vld [vmem:[%s13093_s1 + $0x4c] ss:$16 sps:$4 sm:$0xff]  }
  0x65   : > { %906 = vmatpush1.bf16.msra.mxu0 %v10559_v19  ;;  %1259 = vmatpush1.bf16.msra.mxu1 %v10560_v20  ;;  %v10596_v50 = vld [vmem:[%s11474_s15 + $0x58] sm:$0xff]   ;;  %v10597_v51 = vld [vmem:[%s11474_s15 + $0x60] sm:$0xff]   ;;  %v10598_v53 = vld [vmem:[%s11474_s15 + $0x68] sm:$0xff]   ;;  %p11169_p2 = pnand %p11168_p10, %p13144_p1  ;;  %s11246_s28 = smov [#allocation9]  }
  0x66   : > { %907 = vmatprep.subr.bf16.mxu0 %v10561_v21  ;;  %1260 = vmatprep.subr.bf16.mxu1 %v10563_v23  ;;  %v602_v52 = vld [vmem:[#allocation2 + $0x18] sm:$0xff]  ;;  %578 = vst.msk [vmem:[#allocation2 + $0x60] sm:$0xff] %vm308_vm0, %v10596_v50  ;;  %579 = vst.msk [vmem:[#allocation2 + $0x68] sm:$0xff] %vm308_vm0, %v10597_v51  ;;  %v10599_v54 = vld [vmem:[%s11474_s15 + $0x70] sm:$0xff]   ;;  %s11171_s21 = sshll.u32 %s11246_s28, 4  ;;  %s11172_s21 = int_to_ptr.vmem [resolvable:$false] %s11171_s21 }
  0x67   : > { %580 = vst.msk [vmem:[#allocation2 + $0x70] sm:$0xff] %vm308_vm0, %v10598_v53  ;;  %v10600_v55 = vld [vmem:[%s11474_s15 + $0x78] sm:$0xff]   ;;  %581 = vst.msk [vmem:[#allocation2 + $0x78] sm:$0xff] %vm308_vm0, %v10599_v54  ;;  %v10601_v56 = vld [vmem:[%s11474_s15 + $0x80] sm:$0xff]   ;;  %p11170_p3 = pneg %p11169_p2  ;;  %s11173_s22 = scalar_lea.vmem %s11172_s21, 512 }
  0x68   : > { %582 = vst.msk [vmem:[#allocation2 + $0x80] sm:$0xff] %vm308_vm0, %v10600_v55  ;;  %v10602_v57 = vld [vmem:[%s13093_s1 + $0x60] ss:$16 sps:$4 sm:$0xff]   ;;  %v10604_v58 = vld [vmem:[%s13093_s1 + $0x64] ss:$16 sps:$4 sm:$0xff]   ;;  %583 = vst.msk [vmem:[#allocation2 + $0x88] sm:$0xff] %vm308_vm0, %v10601_v56  ;;  %p11174_p4 = scmp.lt.s32.totalorder %s13044_s14, %s11172_s21  ;;  %p11175_p7 = scmp.lt.s32.totalorder %s11173_s22, %s11167_s19 }
  0x69   : > { %908 = vmatpush1.bf16.msra.mxu0 %v10565_v24  ;;  %1261 = vmatpush1.bf16.msra.mxu1 %v10566_v25  ;;  %v10605_v59 = vld [vmem:[%s13093_s1 + $0x68] ss:$16 sps:$4 sm:$0xff]   ;;  %v10607_v60 = vld [vmem:[%s13093_s1 + $0x6c] ss:$16 sps:$4 sm:$0xff]   ;;  %v603_v61 = vld [vmem:[#allocation2 + $0x20] sm:$0xff] }
  0x6a   : > { %1726 = vmatprep.subr.bf16.mxu0 %v10570_v26  ;;  %2079 = vmatprep.subr.bf16.mxu1 %v10573_v27  ;;  %v10608_v62 = vld [vmem:[%s11474_s15 + $0x88] sm:$0xff]   ;;  %v10609_v63 = vld [vmem:[%s11474_s15 + $0x90] sm:$0xff]   ;;  %v10610_v1 = vld [vmem:[%s11474_s15 + $0x98] sm:$0xff]   ;;  %p11176_p8 = por %p11175_p7, %p11174_p4 }
  0x6b   : > { %584 = vst.msk [vmem:[#allocation2 + $0x90] sm:$0xff] %vm308_vm0, %v10608_v62  ;;  %585 = vst.msk [vmem:[#allocation2 + $0x98] sm:$0xff] %vm308_vm0, %v10609_v63  ;;  %v10611_v2 = vld [vmem:[%s11474_s15 + $0xa0] sm:$0xff]   ;;  %v604_v3 = vld [vmem:[#allocation2 + $0x28] sm:$0xff] }
  0x6c   : > { %8928 = vmatmul.mubr.msk.bf16.vlgmr.msra.gmra.mrb[0].mxu0 %vm308_vm0, %v600_v35  ;;  %8960 = vmatmul.mubr.msk.bf16.vlgmr.msra.gmra.mrb[0].mxu1 %vm308_vm0, %v600_v35  ;;  %586 = vst.msk [vmem:[#allocation2 + $0xa0] sm:$0xff] %vm308_vm0, %v10610_v1  ;;  %587 = vst.msk [vmem:[#allocation2 + $0xa8] sm:$0xff] %vm308_vm0, %v10611_v2  ;;  %v10612_v4 = vld [vmem:[%s11474_s15 + $0xa8] sm:$0xff]   ;;  %v605_v5 = vld [vmem:[#allocation2 + $0x30] sm:$0xff]  ;;  %p11177_p11 = pnand %p11176_p8, %p11170_p3 }
  0x6d   : > { %1727 = vmatpush1.bf16.msra.mxu0 %v10568_v30  ;;  %2080 = vmatpush1.bf16.msra.mxu1 %v10571_v31  ;;  %588 = vst.msk [vmem:[#allocation2 + $0xb0] sm:$0xff] %vm308_vm0, %v10612_v4  ;;  %v10619_v6 = vld [vmem:[%s11474_s15 + $0xb0] sm:$0xff]   ;;  %v10616_v9 = vld [vmem:[%s13093_s1 + $0x88] ss:$16 sps:$4 sm:$0xff]   ;;  %v10618_v10 = vld [vmem:[%s13093_s1 + $0x8c] ss:$16 sps:$4 sm:$0xff]  }
  0x6e   : > { %939 = vmatprep.mubr.bf16.mxu0 %v13107_v0  ;;  %1292 = vmatprep.mubr.bf16.mxu1 %v13107_v0  ;;  %v10613_v7 = vld [vmem:[%s13093_s1 + $0x80] ss:$16 sps:$4 sm:$0xff]   ;;  %v10615_v8 = vld [vmem:[%s13093_s1 + $0x84] ss:$16 sps:$4 sm:$0xff]   ;;  %589 = vst.msk [vmem:[#allocation2 + $0xb8] sm:$0xff] %vm308_vm0, %v10619_v6  ;;  %v606_v11 = vld [vmem:[#allocation2 + $0x38] sm:$0xff] }
  0x6f   : > { %1728 = vmatprep.subr.bf16.mxu0 %v10581_v37  ;;  %2081 = vmatprep.subr.bf16.mxu1 %v10584_v39  ;;  %v10620_v12 = vld [vmem:[%s11474_s15 + $0xb8] sm:$0xff]   ;;  %v607_v13 = vld [vmem:[#allocation2 + $0x40] sm:$0xff]  ;;  %v608_v15 = vld [vmem:[#allocation2 + $0x48] sm:$0xff] }
  0x70   : > { %590 = vst.msk [vmem:[#allocation2 + $0xc0] sm:$0xff] %vm308_vm0, %v10620_v12  ;;  %v10621_v14 = vld [vmem:[%s11474_s15 + $0xc0] sm:$0xff]   ;;  %v10622_v16 = vld [vmem:[%s11474_s15 + $0xc8] sm:$0xff]   ;;  %v609_v17 = vld [vmem:[#allocation2 + $0x50] sm:$0xff] }
  0x71   : > { %1729 = vmatpush1.bf16.msra.mxu0 %v10579_v36  ;;  %2082 = vmatpush1.bf16.msra.mxu1 %v10582_v38  ;;  %591 = vst.msk [vmem:[#allocation2 + $0xc8] sm:$0xff] %vm308_vm0, %v10621_v14  ;;  %592 = vst.msk [vmem:[#allocation2 + $0xd0] sm:$0xff] %vm308_vm0, %v10622_v16  ;;  %v10623_v18 = vld [vmem:[%s11474_s15 + $0xd0] sm:$0xff]   ;;  %v610_v19 = vld [vmem:[#allocation2 + $0x58] sm:$0xff] }
  0x72   : > { %1730 = vmatprep.subr.bf16.mxu0 %v10592_v47  ;;  %2083 = vmatprep.subr.bf16.mxu1 %v10595_v49  ;;  %593 = vst.msk [vmem:[#allocation2 + $0xd8] sm:$0xff] %vm308_vm0, %v10623_v18  ;;  %v10630_v20 = vld [vmem:[%s11474_s15 + $0xd8] sm:$0xff]   ;;  %v10624_v21 = vld [vmem:[%s13093_s1 + $0xa0] ss:$16 sps:$4 sm:$0xff]   ;;  %v10626_v22 = vld [vmem:[%s13093_s1 + $0xa4] ss:$16 sps:$4 sm:$0xff]  }
  0x73   : > { %v10627_v23 = vld [vmem:[%s13093_s1 + $0xa8] ss:$16 sps:$4 sm:$0xff]   ;;  %594 = vst.msk [vmem:[#allocation2 + $0xe0] sm:$0xff] %vm308_vm0, %v10630_v20  ;;  %v10629_v24 = vld [vmem:[%s13093_s1 + $0xac] ss:$16 sps:$4 sm:$0xff]   ;;  %v611_v25 = vld [vmem:[#allocation2 + $0x60] sm:$0xff] }
  0x74   : > { %8929 = vmatmul.mubr.msk.bf16.gmra.mrb[4].mxu0 %vm308_vm0, %v601_v43  ;;  %8961 = vmatmul.mubr.msk.bf16.gmra.mrb[4].mxu1 %vm308_vm0, %v601_v43  ;;  %v10631_v26 = vld [vmem:[%s11474_s15 + $0xe0] sm:$0xff]   ;;  %v612_v27 = vld [vmem:[#allocation2 + $0x68] sm:$0xff]  ;;  %v613_v29 = vld [vmem:[#allocation2 + $0x70] sm:$0xff] }
  0x75   : > { %949 = vmatprep.mubr.bf16.mxu0 %v13107_v0  ;;  %1302 = vmatprep.mubr.bf16.mxu1 %v13107_v0  ;;  %595 = vst.msk [vmem:[#allocation2 + $0xe8] sm:$0xff] %vm308_vm0, %v10631_v26  ;;  %v10632_v28 = vld [vmem:[%s11474_s15 + $0xe8] sm:$0xff]   ;;  %v10633_v30 = vld [vmem:[%s11474_s15 + $0xf0] sm:$0xff]   ;;  %v11684_v31 = vld [vmem:[#allocation2 + $0x78] sm:$0xff] }
  0x76   : > { %1731 = vmatpush1.bf16.msra.mxu0 %v10590_v46  ;;  %2084 = vmatpush1.bf16.msra.mxu1 %v10593_v48  ;;  %596 = vst.msk [vmem:[#allocation2 + $0xf0] sm:$0xff] %vm308_vm0, %v10632_v28  ;;  %597 = vst.msk [vmem:[#allocation2 + $0xf8] sm:$0xff] %vm308_vm0, %v10633_v30  ;;  %v10634_v32 = vld [vmem:[%s11474_s15 + $0xf8] sm:$0xff]   ;;  %v11694_v33 = vld [vmem:[#allocation2 + $0x80] sm:$0xff] }
  0x77   : > { %1732 = vmatprep.subr.bf16.mxu0 %v10604_v58  ;;  %2085 = vmatprep.subr.bf16.mxu1 %v10607_v60  ;;  %598 = vst.msk [vmem:[#allocation2 + $0x100] sm:$0xff] %vm308_vm0, %v10634_v32  ;;  %v11702_v34 = vld [vmem:[#allocation2 + $0x88] sm:$0xff]  ;;  %v10637_v35 = vld [vmem:[%s13093_s1 + $0x184] ss:$16 sps:$4 sm:$0xff]   ;;  %v11724_v38 = vld [vmem:[#allocation2 + $0x98] sm:$0xff] }
  0x78   : > { %v10640_v36 = vld [vmem:[%s13093_s1 + $0x18c] ss:$16 sps:$4 sm:$0xff]   ;;  %v11716_v37 = vld [vmem:[#allocation2 + $0x90] sm:$0xff]  ;;  %v11732_v39 = vld [vmem:[#allocation2 + $0xa0] sm:$0xff] }
  0x79   : > { %v11740_v40 = vld [vmem:[#allocation2 + $0xa8] sm:$0xff]  ;;  %v11748_v41 = vld [vmem:[#allocation2 + $0xb0] sm:$0xff]  ;;  %v11756_v42 = vld [vmem:[#allocation2 + $0xb8] sm:$0xff] }
  0x7a   : > { %1733 = vmatpush1.bf16.msra.mxu0 %v10602_v57  ;;  %2086 = vmatpush1.bf16.msra.mxu1 %v10605_v59  ;;  %v11764_v43 = vld [vmem:[#allocation2 + $0xc0] sm:$0xff]  ;;  %v11772_v44 = vld [vmem:[#allocation2 + $0xc8] sm:$0xff]  ;;  %v11780_v45 = vld [vmem:[#allocation2 + $0xd0] sm:$0xff] }
  0x7b   : > { %1734 = vmatprep.subr.bf16.mxu0 %v10615_v8  ;;  %2087 = vmatprep.subr.bf16.mxu1 %v10618_v10  ;;  %v11788_v46 = vld [vmem:[#allocation2 + $0xd8] sm:$0xff]  ;;  %v11796_v47 = vld [vmem:[#allocation2 + $0xe0] sm:$0xff]  ;;  %v11087_v2 = vld [vmem:[#allocation2 + $0x8] sm:$0xff] }
  0x7c   : > { %8930 = vmatmul.mubr.msk.bf16.gmra.mrb[8].mxu0 %vm308_vm0, %v602_v52  ;;  %8962 = vmatmul.mubr.msk.bf16.gmra.mrb[8].mxu1 %vm308_vm0, %v602_v52  ;;  %v11804_v48 = vld [vmem:[#allocation2 + $0xe8] sm:$0xff]  ;;  %v599_v52 = vld [vmem:[#allocation2] sm:$0xff]  ;;  %v11089_v6 = vld [vmem:[#allocation2 + $0x18] sm:$0xff] }
  0x7d   : > { %959 = vmatprep.mubr.bf16.mxu0 %v13107_v0  ;;  %1312 = vmatprep.mubr.bf16.mxu1 %v13107_v0  ;;  %v11812_v49 = vld [vmem:[#allocation2 + $0xf0] sm:$0xff]  ;;  %v11820_v50 = vld [vmem:[#allocation2 + $0xf8] sm:$0xff]  ;;  %v11091_v8 = vld [vmem:[#allocation2 + $0x28] sm:$0xff] }
  0x7e   : > { %1735 = vmatpush1.bf16.msra.mxu0 %v10613_v7  ;;  %2088 = vmatpush1.bf16.msra.mxu1 %v10616_v9  ;;  %v655_v51 = vld [vmem:[#allocation2 + $0x100] sm:$0xff]  ;;  %v10638_v54 = vld [vmem:[%s13093_s1 + $0x188] ss:$16 sps:$4 sm:$0xff]   ;;  %v10646_v56 = vld [vmem:[%s13093_s1 + $0x1ac] ss:$16 sps:$4 sm:$0xff]  }
  0x7f   : > { %1736 = vmatprep.subr.bf16.mxu0 %v10626_v22  ;;  %2089 = vmatprep.subr.bf16.mxu1 %v10629_v24  ;;  %v10635_v53 = vld [vmem:[%s13093_s1 + $0x180] ss:$16 sps:$4 sm:$0xff]   ;;  %v10643_v55 = vld [vmem:[%s13093_s1 + $0x1a4] ss:$16 sps:$4 sm:$0xff]   ;;  %v10644_v58 = vld [vmem:[%s13093_s1 + $0x1a8] ss:$16 sps:$4 sm:$0xff]  }
  0x80   : > { %v10641_v57 = vld [vmem:[%s13093_s1 + $0x1a0] ss:$16 sps:$4 sm:$0xff]   ;;  %v10649_v59 = vld [vmem:[%s13093_s1 + $0x1c4] ss:$16 sps:$4 sm:$0xff]   ;;  %v10652_v60 = vld [vmem:[%s13093_s1 + $0x1cc] ss:$16 sps:$4 sm:$0xff]  }
  0x81   : > { %v10650_v62 = vld [vmem:[%s13093_s1 + $0x1c8] ss:$16 sps:$4 sm:$0xff]   ;;  %v10655_v63 = vld [vmem:[%s13093_s1 + $0x1e4] ss:$16 sps:$4 sm:$0xff]   ;;  %v10658_v1 = vld [vmem:[%s13093_s1 + $0x1ec] ss:$16 sps:$4 sm:$0xff]  }
  0x82   : > { %1737 = vmatpush1.bf16.msra.mxu0 %v10624_v21  ;;  %2090 = vmatpush1.bf16.msra.mxu1 %v10627_v23  ;;  %v10656_v4 = vld [vmem:[%s13093_s1 + $0x1e8] ss:$16 sps:$4 sm:$0xff]   ;;  %v11090_v7 = vld [vmem:[#allocation2 + $0x20] sm:$0xff]  ;;  %v10664_v12 = vld [vmem:[%s13093_s1 + $0x20c] ss:$16 sps:$4 sm:$0xff]  }
  0x83   : > { %2705 = vmatprep.subr.bf16.mxu0 %v10637_v35  ;;  %3058 = vmatprep.subr.bf16.mxu1 %v10640_v36  ;;  %v10659_v9 = vld [vmem:[%s13093_s1 + $0x200] ss:$16 sps:$4 sm:$0xff]   ;;  %v10661_v10 = vld [vmem:[%s13093_s1 + $0x204] ss:$16 sps:$4 sm:$0xff]   ;;  %v11914_v14 = vld [vmem:[#allocation2 + $0x38] sm:$0xff] }
  0x84   : > { %8931 = vmatmul.mubr.msk.bf16.gmra.mrb[12].mxu0 %vm308_vm0, %v603_v61  ;;  %8963 = vmatmul.mubr.msk.bf16.gmra.mrb[12].mxu1 %vm308_vm0, %v603_v61  ;;  %v10647_v61 = vld [vmem:[%s13093_s1 + $0x1c0] ss:$16 sps:$4 sm:$0xff]   ;;  %v11930_v16 = vld [vmem:[#allocation2 + $0x48] sm:$0xff]  ;;  %v11958_v22 = vld [vmem:[#allocation2 + $0x58] sm:$0xff] }
  0x85   : > { %969 = vmatprep.mubr.bf16.mxu0 %v13107_v0  ;;  %1322 = vmatprep.mubr.bf16.mxu1 %v13107_v0  ;;  %v10665_v18 = vld [vmem:[%s13093_s1 + $0x220] ss:$16 sps:$4 sm:$0xff]   ;;  %v10668_v20 = vld [vmem:[%s13093_s1 + $0x228] ss:$16 sps:$4 sm:$0xff]   ;;  %v10670_v21 = vld [vmem:[%s13093_s1 + $0x22c] ss:$16 sps:$4 sm:$0xff]  }
  0x86   : > { %v11966_v23 = vld [vmem:[#allocation2 + $0x60] sm:$0xff]  ;;  %v11974_v24 = vld [vmem:[#allocation2 + $0x68] sm:$0xff]  ;;  %v2432_v28 = vld [vmem:[#allocation2 + $0x10] sm:$0xff] }
  0x87   : > { %v10673_v26 = vld [vmem:[#allocation4 + $0x204] ss:$16 sps:$4 sm:$0xff]   ;;  %v10674_v30 = vld [vmem:[#allocation4 + $0x208] ss:$16 sps:$4 sm:$0xff]   ;;  %v10682_v32 = vld [vmem:[#allocation4 + $0x22c] ss:$16 sps:$4 sm:$0xff]  }
  0x88   : > { %v10685_v35 = vld [vmem:[#allocation4 + $0x244] ss:$16 sps:$4 sm:$0xff]   ;;  %v10688_v36 = vld [vmem:[#allocation4 + $0x24c] ss:$16 sps:$4 sm:$0xff]  }
  0x8c   : > { %8932 = vmatmul.mubr.msk.bf16.gmra.mrb[16].mxu0 %vm308_vm0, %v604_v3  ;;  %8964 = vmatmul.mubr.msk.bf16.gmra.mrb[16].mxu1 %vm308_vm0, %v604_v3  ;;  %v10653_v3 = vld [vmem:[%s13093_s1 + $0x1e0] ss:$16 sps:$4 sm:$0xff]  }
  0x8d   : > { %979 = vmatprep.mubr.bf16.mxu0 %v13107_v0  ;;  %1332 = vmatprep.mubr.bf16.mxu1 %v13107_v0 }
  0x94   : > { %8933 = vmatmul.mubr.msk.bf16.gmra.mrb[20].mxu0 %vm308_vm0, %v605_v5  ;;  %8965 = vmatmul.mubr.msk.bf16.gmra.mrb[20].mxu1 %vm308_vm0, %v605_v5  ;;  %v11088_v5 = vld [vmem:[#allocation2 + $0x10] sm:$0xff] }
  0x95   : > { %989 = vmatprep.mubr.bf16.mxu0 %v13107_v0  ;;  %1342 = vmatprep.mubr.bf16.mxu1 %v13107_v0 }
  0x9c   : > { %8934 = vmatmul.mubr.msk.bf16.gmra.mrb[24].mxu0 %vm308_vm0, %v606_v11  ;;  %8966 = vmatmul.mubr.msk.bf16.gmra.mrb[24].mxu1 %vm308_vm0, %v606_v11  ;;  %v10662_v11 = vld [vmem:[%s13093_s1 + $0x208] ss:$16 sps:$4 sm:$0xff]  }
  0x9d   : > { %999 = vmatprep.mubr.bf16.mxu0 %v13107_v0  ;;  %1352 = vmatprep.mubr.bf16.mxu1 %v13107_v0 }
  0xa4   : > { %8935 = vmatmul.mubr.msk.bf16.gmra.mrb[28].mxu0 %vm308_vm0, %v607_v13  ;;  %8967 = vmatmul.mubr.msk.bf16.gmra.mrb[28].mxu1 %vm308_vm0, %v607_v13  ;;  %v11092_v13 = vld [vmem:[#allocation2 + $0x30] sm:$0xff] }
  0xa5   : > { %1009 = vmatprep.mubr.bf16.mxu0 %v13107_v0  ;;  %1362 = vmatprep.mubr.bf16.mxu1 %v13107_v0 }
  0xac   : > { %8936 = vmatmul.mubr.msk.bf16.gmra.mrb[32].mxu0 %vm308_vm0, %v608_v15  ;;  %8968 = vmatmul.mubr.msk.bf16.gmra.mrb[32].mxu1 %vm308_vm0, %v608_v15  ;;  %v11922_v15 = vld [vmem:[#allocation2 + $0x40] sm:$0xff] }
  0xad   : > { %1019 = vmatprep.mubr.bf16.mxu0 %v13107_v0  ;;  %1372 = vmatprep.mubr.bf16.mxu1 %v13107_v0 }
  0xb4   : > { %8937 = vmatmul.mubr.msk.bf16.gmra.mrb[36].mxu0 %vm308_vm0, %v609_v17  ;;  %8969 = vmatmul.mubr.msk.bf16.gmra.mrb[36].mxu1 %vm308_vm0, %v609_v17  ;;  %v11938_v17 = vld [vmem:[#allocation2 + $0x50] sm:$0xff] }
  0xb5   : > { %1029 = vmatprep.mubr.bf16.mxu0 %v13107_v0  ;;  %1382 = vmatprep.mubr.bf16.mxu1 %v13107_v0 }
  0xbc   : > { %8938 = vmatmul.mubr.msk.bf16.gmra.mrb[40].mxu0 %vm308_vm0, %v610_v19  ;;  %8970 = vmatmul.mubr.msk.bf16.gmra.mrb[40].mxu1 %vm308_vm0, %v610_v19  ;;  %v10667_v19 = vld [vmem:[%s13093_s1 + $0x224] ss:$16 sps:$4 sm:$0xff]  }
  0xbd   : > { %1039 = vmatprep.mubr.bf16.mxu0 %v13107_v0  ;;  %1392 = vmatprep.mubr.bf16.mxu1 %v13107_v0 }
  0xc4   : > { %8939 = vmatmul.mubr.msk.bf16.gmra.mrb[44].mxu0 %vm308_vm0, %v611_v25  ;;  %8971 = vmatmul.mubr.msk.bf16.gmra.mrb[44].mxu1 %vm308_vm0, %v611_v25  ;;  %v11982_v25 = vld [vmem:[#allocation2 + $0x70] sm:$0xff] }
  0xc5   : > { %1049 = vmatprep.mubr.bf16.mxu0 %v13107_v0  ;;  %1402 = vmatprep.mubr.bf16.mxu1 %v13107_v0 }
  0xcc   : > { %8940 = vmatmul.mubr.msk.bf16.gmra.mrb[48].mxu0 %vm308_vm0, %v612_v27  ;;  %8972 = vmatmul.mubr.msk.bf16.gmra.mrb[48].mxu1 %vm308_vm0, %v612_v27  ;;  %v10676_v27 = vld [vmem:[#allocation4 + $0x20c] ss:$16 sps:$4 sm:$0xff]  }
  0xcd   : > { %1059 = vmatprep.mubr.bf16.mxu0 %v13107_v0  ;;  %1412 = vmatprep.mubr.bf16.mxu1 %v13107_v0 }
  0xd4   : > { %8941 = vmatmul.mubr.msk.bf16.gmra.mrb[52].mxu0 %vm308_vm0, %v613_v29  ;;  %8973 = vmatmul.mubr.msk.bf16.gmra.mrb[52].mxu1 %vm308_vm0, %v613_v29  ;;  %v10671_v29 = vld [vmem:[#allocation4 + $0x200] ss:$16 sps:$4 sm:$0xff]  }
  0xd5   : > { %1069 = vmatprep.mubr.bf16.mxu0 %v13107_v0  ;;  %1422 = vmatprep.mubr.bf16.mxu1 %v13107_v0 }
  0xdc   : > { %8942 = vmatmul.mubr.msk.bf16.gmra.mrb[56].mxu0 %vm308_vm0, %v11684_v31  ;;  %8974 = vmatmul.mubr.msk.bf16.gmra.mrb[56].mxu1 %vm308_vm0, %v11684_v31 }
  0xdd   : > { %1079 = vmatprep.mubr.bf16.mxu0 %v13107_v0  ;;  %1432 = vmatprep.mubr.bf16.mxu1 %v13107_v0 }
  0xe4   : > { %8943 = vmatmul.mubr.msk.bf16.gmra.mrb[60].mxu0 %vm308_vm0, %v11694_v33  ;;  %8975 = vmatmul.mubr.msk.bf16.gmra.mrb[60].mxu1 %vm308_vm0, %v11694_v33 }
  0xe5   : > { %1089 = vmatprep.mubr.bf16.mxu0 %v13107_v0  ;;  %1442 = vmatprep.mubr.bf16.mxu1 %v13107_v0 }
  0xec   : > { %8944 = vmatmul.mubr.msk.bf16.gmra.mrb[64].mxu0 %vm308_vm0, %v11702_v34  ;;  %8976 = vmatmul.mubr.msk.bf16.gmra.mrb[64].mxu1 %vm308_vm0, %v11702_v34 }
  0xed   : > { %1099 = vmatprep.mubr.bf16.mxu0 %v13107_v0  ;;  %1452 = vmatprep.mubr.bf16.mxu1 %v13107_v0 }
  0xf4   : > { %8945 = vmatmul.mubr.msk.bf16.gmra.mrb[68].mxu0 %vm308_vm0, %v11716_v37  ;;  %8977 = vmatmul.mubr.msk.bf16.gmra.mrb[68].mxu1 %vm308_vm0, %v11716_v37 }
  0xf5   : > { %1109 = vmatprep.mubr.bf16.mxu0 %v13107_v0  ;;  %1462 = vmatprep.mubr.bf16.mxu1 %v13107_v0 }
  0xfc   : > { %8946 = vmatmul.mubr.msk.bf16.gmra.mrb[72].mxu0 %vm308_vm0, %v11724_v38  ;;  %8978 = vmatmul.mubr.msk.bf16.gmra.mrb[72].mxu1 %vm308_vm0, %v11724_v38 }
  0xfd   : > { %1119 = vmatprep.mubr.bf16.mxu0 %v13107_v0  ;;  %1472 = vmatprep.mubr.bf16.mxu1 %v13107_v0 }
 0x104   : > { %8947 = vmatmul.mubr.msk.bf16.gmra.mrb[76].mxu0 %vm308_vm0, %v11732_v39  ;;  %8979 = vmatmul.mubr.msk.bf16.gmra.mrb[76].mxu1 %vm308_vm0, %v11732_v39 }
 0x105   : > { %1129 = vmatprep.mubr.bf16.mxu0 %v13107_v0  ;;  %1482 = vmatprep.mubr.bf16.mxu1 %v13107_v0 }
 0x10c   : > { %8948 = vmatmul.mubr.msk.bf16.gmra.mrb[80].mxu0 %vm308_vm0, %v11740_v40  ;;  %8980 = vmatmul.mubr.msk.bf16.gmra.mrb[80].mxu1 %vm308_vm0, %v11740_v40 }
 0x10d   : > { %1139 = vmatprep.mubr.bf16.mxu0 %v13107_v0  ;;  %1492 = vmatprep.mubr.bf16.mxu1 %v13107_v0 }
 0x114   : > { %8949 = vmatmul.mubr.msk.bf16.gmra.mrb[84].mxu0 %vm308_vm0, %v11748_v41  ;;  %8981 = vmatmul.mubr.msk.bf16.gmra.mrb[84].mxu1 %vm308_vm0, %v11748_v41 }
 0x115   : > { %1149 = vmatprep.mubr.bf16.mxu0 %v13107_v0  ;;  %1502 = vmatprep.mubr.bf16.mxu1 %v13107_v0 }
 0x11c   : > { %8950 = vmatmul.mubr.msk.bf16.gmra.mrb[88].mxu0 %vm308_vm0, %v11756_v42  ;;  %8982 = vmatmul.mubr.msk.bf16.gmra.mrb[88].mxu1 %vm308_vm0, %v11756_v42 }
 0x11d   : > { %1159 = vmatprep.mubr.bf16.mxu0 %v13107_v0  ;;  %1512 = vmatprep.mubr.bf16.mxu1 %v13107_v0 }
 0x124   : > { %8951 = vmatmul.mubr.msk.bf16.gmra.mrb[92].mxu0 %vm308_vm0, %v11764_v43  ;;  %8983 = vmatmul.mubr.msk.bf16.gmra.mrb[92].mxu1 %vm308_vm0, %v11764_v43 }
 0x125   : > { %1169 = vmatprep.mubr.bf16.mxu0 %v13107_v0  ;;  %1522 = vmatprep.mubr.bf16.mxu1 %v13107_v0 }
 0x12c   : > { %8952 = vmatmul.mubr.msk.bf16.gmra.mrb[96].mxu0 %vm308_vm0, %v11772_v44  ;;  %8984 = vmatmul.mubr.msk.bf16.gmra.mrb[96].mxu1 %vm308_vm0, %v11772_v44 }
 0x12d   : > { %1179 = vmatprep.mubr.bf16.mxu0 %v13107_v0  ;;  %1532 = vmatprep.mubr.bf16.mxu1 %v13107_v0 }
 0x134   : > { %8953 = vmatmul.mubr.msk.bf16.gmra.mrb[100].mxu0 %vm308_vm0, %v11780_v45  ;;  %8985 = vmatmul.mubr.msk.bf16.gmra.mrb[100].mxu1 %vm308_vm0, %v11780_v45 }
 0x135   : > { %1189 = vmatprep.mubr.bf16.mxu0 %v13107_v0  ;;  %1542 = vmatprep.mubr.bf16.mxu1 %v13107_v0 }
 0x13c   : > { %8954 = vmatmul.mubr.msk.bf16.gmra.mrb[104].mxu0 %vm308_vm0, %v11788_v46  ;;  %8986 = vmatmul.mubr.msk.bf16.gmra.mrb[104].mxu1 %vm308_vm0, %v11788_v46 }
 0x13d   : > { %1199 = vmatprep.mubr.bf16.mxu0 %v13107_v0  ;;  %1552 = vmatprep.mubr.bf16.mxu1 %v13107_v0 }
 0x144   : > { %8955 = vmatmul.mubr.msk.bf16.gmra.mrb[108].mxu0 %vm308_vm0, %v11796_v47  ;;  %8987 = vmatmul.mubr.msk.bf16.gmra.mrb[108].mxu1 %vm308_vm0, %v11796_v47 }
 0x145   : > { %1209 = vmatprep.mubr.bf16.mxu0 %v13107_v0  ;;  %1562 = vmatprep.mubr.bf16.mxu1 %v13107_v0 }
 0x14c   : > { %8956 = vmatmul.mubr.msk.bf16.gmra.mrb[112].mxu0 %vm308_vm0, %v11804_v48  ;;  %8988 = vmatmul.mubr.msk.bf16.gmra.mrb[112].mxu1 %vm308_vm0, %v11804_v48 }
 0x14d   : > { %1219 = vmatprep.mubr.bf16.mxu0 %v13107_v0  ;;  %1572 = vmatprep.mubr.bf16.mxu1 %v13107_v0 }
 0x154   : > { %8957 = vmatmul.mubr.msk.bf16.gmra.mrb[116].mxu0 %vm308_vm0, %v11812_v49  ;;  %8989 = vmatmul.mubr.msk.bf16.gmra.mrb[116].mxu1 %vm308_vm0, %v11812_v49 }
 0x155   : > { %1229 = vmatprep.mubr.bf16.mxu0 %v13107_v0  ;;  %1582 = vmatprep.mubr.bf16.mxu1 %v13107_v0 }
 0x15c   : > { %8958 = vmatmul.mubr.msk.bf16.gmra.mrb[120].mxu0 %vm308_vm0, %v11820_v50  ;;  %8990 = vmatmul.mubr.msk.bf16.gmra.mrb[120].mxu1 %vm308_vm0, %v11820_v50 }
 0x15d   : > { %1239 = vmatprep.mubr.bf16.mxu0 %v13107_v0  ;;  %1592 = vmatprep.mubr.bf16.mxu1 %v13107_v0 }
 0x164   : > { %8959 = vmatmul.mubr.msk.bf16.gmra.mrb[124].mxu0 %vm308_vm0, %v655_v51  ;;  %8991 = vmatmul.mubr.msk.bf16.gmra.mrb[124].mxu1 %vm308_vm0, %v655_v51  ;;  %v2436_v51 = vld [vmem:[#allocation2 + $0x30] sm:$0xff] }
 0x165   : > { %1758 = vmatprep.mubr.bf16.mxu0 %v13107_v0  ;;  %2111 = vmatprep.mubr.bf16.mxu1 %v13107_v0 }
 0x16c   : > { %9016 = vmatmul.mubr.msk.bf16.vlgmr.msra.gmra.mrb[0].mxu0 %vm308_vm0, %v599_v52  ;;  %9048 = vmatmul.mubr.msk.bf16.vlgmr.msra.gmra.mrb[0].mxu1 %vm308_vm0, %v599_v52  ;;  %v10695_v52 = vld [vmem:[#allocation4 + $0x280] ss:$16 sps:$4 sm:$0xff]  }
 0x16d   : > { %2706 = vmatpush1.bf16.msra.mxu0 %v10635_v53  ;;  %3059 = vmatpush1.bf16.msra.mxu1 %v10638_v54  ;;  %v10697_v53 = vld [vmem:[#allocation4 + $0x284] ss:$16 sps:$4 sm:$0xff]   ;;  %v10698_v54 = vld [vmem:[#allocation4 + $0x288] ss:$16 sps:$4 sm:$0xff]  }
 0x16e   : > { %1768 = vmatprep.mubr.bf16.mxu0 %v13107_v0  ;;  %2121 = vmatprep.mubr.bf16.mxu1 %v13107_v0 }
 0x16f   : > { %2707 = vmatprep.subr.bf16.mxu0 %v10643_v55  ;;  %3060 = vmatprep.subr.bf16.mxu1 %v10646_v56  ;;  %v10700_v55 = vld [vmem:[#allocation4 + $0x28c] ss:$16 sps:$4 sm:$0xff]   ;;  %v10701_v56 = vld [vmem:[#allocation4 + $0x2a0] ss:$16 sps:$4 sm:$0xff]  }
 0x171   : > { %2708 = vmatpush1.bf16.msra.mxu0 %v10641_v57  ;;  %3061 = vmatpush1.bf16.msra.mxu1 %v10644_v58  ;;  %v10703_v57 = vld [vmem:[#allocation4 + $0x2a4] ss:$16 sps:$4 sm:$0xff]   ;;  %v10704_v58 = vld [vmem:[#allocation4 + $0x2a8] ss:$16 sps:$4 sm:$0xff]  }
 0x172   : > { %2709 = vmatprep.subr.bf16.mxu0 %v10649_v59  ;;  %3062 = vmatprep.subr.bf16.mxu1 %v10652_v60  ;;  %v10706_v59 = vld [vmem:[#allocation4 + $0x2ac] ss:$16 sps:$4 sm:$0xff]   ;;  %v10707_v60 = vld [vmem:[#allocation4 + $0x2c0] ss:$16 sps:$4 sm:$0xff]  }
 0x174   : > { %9017 = vmatmul.mubr.msk.bf16.gmra.mrb[4].mxu0 %vm308_vm0, %v11087_v2  ;;  %9049 = vmatmul.mubr.msk.bf16.gmra.mrb[4].mxu1 %vm308_vm0, %v11087_v2  ;;  %v10715_v2 = vld [vmem:[#allocation4 + $0x2e4] ss:$16 sps:$4 sm:$0xff]  }
 0x175   : > { %1778 = vmatprep.mubr.bf16.mxu0 %v13107_v0  ;;  %2131 = vmatprep.mubr.bf16.mxu1 %v13107_v0 }
 0x176   : > { %2710 = vmatpush1.bf16.msra.mxu0 %v10647_v61  ;;  %3063 = vmatpush1.bf16.msra.mxu1 %v10650_v62  ;;  %v10709_v61 = vld [vmem:[#allocation4 + $0x2c4] ss:$16 sps:$4 sm:$0xff]   ;;  %v10710_v62 = vld [vmem:[#allocation4 + $0x2c8] ss:$16 sps:$4 sm:$0xff]  }
 0x177   : > { %2711 = vmatprep.subr.bf16.mxu0 %v10655_v63  ;;  %3064 = vmatprep.subr.bf16.mxu1 %v10658_v1  ;;  %v10712_v63 = vld [vmem:[#allocation4 + $0x2cc] ss:$16 sps:$4 sm:$0xff]   ;;  %v10713_v1 = vld [vmem:[#allocation4 + $0x2e0] ss:$16 sps:$4 sm:$0xff]  }
 0x17a   : > { %2712 = vmatpush1.bf16.msra.mxu0 %v10653_v3  ;;  %3065 = vmatpush1.bf16.msra.mxu1 %v10656_v4  ;;  %v10716_v3 = vld [vmem:[#allocation4 + $0x2e8] ss:$16 sps:$4 sm:$0xff]   ;;  %v10718_v4 = vld [vmem:[#allocation4 + $0x2ec] ss:$16 sps:$4 sm:$0xff]  }
 0x17b   : > { %2713 = vmatprep.subr.bf16.mxu0 %v10661_v10  ;;  %3066 = vmatprep.subr.bf16.mxu1 %v10664_v12  ;;  %v10730_v10 = vld [vmem:[#allocation4 + $0x32c] ss:$16 sps:$4 sm:$0xff]   ;;  %v10728_v12 = vld [vmem:[#allocation4 + $0x328] ss:$16 sps:$4 sm:$0xff]  }
 0x17c   : > { %9018 = vmatmul.mubr.msk.bf16.gmra.mrb[8].mxu0 %vm308_vm0, %v11088_v5  ;;  %9050 = vmatmul.mubr.msk.bf16.gmra.mrb[8].mxu1 %vm308_vm0, %v11088_v5  ;;  %v10721_v5 = vld [vmem:[#allocation4 + $0x304] ss:$16 sps:$4 sm:$0xff]  }
 0x17d   : > { %1788 = vmatprep.mubr.bf16.mxu0 %v13107_v0  ;;  %2141 = vmatprep.mubr.bf16.mxu1 %v13107_v0 }
 0x17e   : > { %2714 = vmatpush1.bf16.msra.mxu0 %v10659_v9  ;;  %3067 = vmatpush1.bf16.msra.mxu1 %v10662_v11  ;;  %v10727_v9 = vld [vmem:[#allocation4 + $0x324] ss:$16 sps:$4 sm:$0xff]   ;;  %v10725_v11 = vld [vmem:[#allocation4 + $0x320] ss:$16 sps:$4 sm:$0xff]  }
 0x17f   : > { %2715 = vmatprep.subr.bf16.mxu0 %v10667_v19  ;;  %3068 = vmatprep.subr.bf16.mxu1 %v10670_v21  ;;  %v10742_v19 = vld [vmem:[#allocation4 + $0x36c] ss:$16 sps:$4 sm:$0xff]   ;;  %v10740_v21 = vld [vmem:[#allocation4 + $0x368] ss:$16 sps:$4 sm:$0xff]  }
 0x182   : > { %2716 = vmatpush1.bf16.msra.mxu0 %v10665_v18  ;;  %3069 = vmatpush1.bf16.msra.mxu1 %v10668_v20  ;;  %v10739_v18 = vld [vmem:[#allocation4 + $0x364] ss:$16 sps:$4 sm:$0xff]   ;;  %v10737_v20 = vld [vmem:[#allocation4 + $0x360] ss:$16 sps:$4 sm:$0xff]  }
 0x183   : > { %4944 = vmatprep.subr.bf16.mxu0 %v10673_v26  ;;  %5137 = vmatprep.subr.bf16.mxu1 %v10676_v27  ;;  %v10746_v26 = vld [vmem:[#allocation4 + $0x388] ss:$16 sps:$4 sm:$0xff]   ;;  %v10751_v27 = vld [vmem:[#allocation4 + $0x3a4] ss:$16 sps:$4 sm:$0xff]  }
 0x184   : > { %9019 = vmatmul.mubr.msk.bf16.gmra.mrb[12].mxu0 %vm308_vm0, %v11089_v6  ;;  %9051 = vmatmul.mubr.msk.bf16.gmra.mrb[12].mxu1 %vm308_vm0, %v11089_v6  ;;  %v10724_v6 = vld [vmem:[#allocation4 + $0x30c] ss:$16 sps:$4 sm:$0xff]  }
 0x185   : > { %1798 = vmatprep.mubr.bf16.mxu0 %v13107_v0  ;;  %2151 = vmatprep.mubr.bf16.mxu1 %v13107_v0 }
 0x18c   : > { %9020 = vmatmul.mubr.msk.bf16.gmra.mrb[16].mxu0 %vm308_vm0, %v11090_v7  ;;  %9052 = vmatmul.mubr.msk.bf16.gmra.mrb[16].mxu1 %vm308_vm0, %v11090_v7  ;;  %v10719_v7 = vld [vmem:[#allocation4 + $0x300] ss:$16 sps:$4 sm:$0xff]  }
 0x18d   : > { %1808 = vmatprep.mubr.bf16.mxu0 %v13107_v0  ;;  %2161 = vmatprep.mubr.bf16.mxu1 %v13107_v0 }
 0x194   : > { %9021 = vmatmul.mubr.msk.bf16.gmra.mrb[20].mxu0 %vm308_vm0, %v11091_v8  ;;  %9053 = vmatmul.mubr.msk.bf16.gmra.mrb[20].mxu1 %vm308_vm0, %v11091_v8  ;;  %v10722_v8 = vld [vmem:[#allocation4 + $0x308] ss:$16 sps:$4 sm:$0xff]  }
 0x195   : > { %1818 = vmatprep.mubr.bf16.mxu0 %v13107_v0  ;;  %2171 = vmatprep.mubr.bf16.mxu1 %v13107_v0 }
 0x19c   : > { %9022 = vmatmul.mubr.msk.bf16.gmra.mrb[24].mxu0 %vm308_vm0, %v11092_v13  ;;  %9054 = vmatmul.mubr.msk.bf16.gmra.mrb[24].mxu1 %vm308_vm0, %v11092_v13  ;;  %v10733_v13 = vld [vmem:[#allocation4 + $0x344] ss:$16 sps:$4 sm:$0xff]  }
 0x19d   : > { %1828 = vmatprep.mubr.bf16.mxu0 %v13107_v0  ;;  %2181 = vmatprep.mubr.bf16.mxu1 %v13107_v0 }
 0x1a4   : > { %9023 = vmatmul.mubr.msk.bf16.gmra.mrb[28].mxu0 %vm308_vm0, %v11914_v14  ;;  %9055 = vmatmul.mubr.msk.bf16.gmra.mrb[28].mxu1 %vm308_vm0, %v11914_v14 }
 0x1a5   : > { %1838 = vmatprep.mubr.bf16.mxu0 %v13107_v0  ;;  %2191 = vmatprep.mubr.bf16.mxu1 %v13107_v0 }
 0x1ac   : > { %9024 = vmatmul.mubr.msk.bf16.gmra.mrb[32].mxu0 %vm308_vm0, %v11922_v15  ;;  %9056 = vmatmul.mubr.msk.bf16.gmra.mrb[32].mxu1 %vm308_vm0, %v11922_v15 }
 0x1ad   : > { %1848 = vmatprep.mubr.bf16.mxu0 %v13107_v0  ;;  %2201 = vmatprep.mubr.bf16.mxu1 %v13107_v0 }
 0x1b4   : > { %9025 = vmatmul.mubr.msk.bf16.gmra.mrb[36].mxu0 %vm308_vm0, %v11930_v16  ;;  %9057 = vmatmul.mubr.msk.bf16.gmra.mrb[36].mxu1 %vm308_vm0, %v11930_v16 }
 0x1b5   : > { %1858 = vmatprep.mubr.bf16.mxu0 %v13107_v0  ;;  %2211 = vmatprep.mubr.bf16.mxu1 %v13107_v0 }
 0x1bc   : > { %9026 = vmatmul.mubr.msk.bf16.gmra.mrb[40].mxu0 %vm308_vm0, %v11938_v17  ;;  %9058 = vmatmul.mubr.msk.bf16.gmra.mrb[40].mxu1 %vm308_vm0, %v11938_v17 }
 0x1bd   : > { %1868 = vmatprep.mubr.bf16.mxu0 %v13107_v0  ;;  %2221 = vmatprep.mubr.bf16.mxu1 %v13107_v0 }
 0x1c4   : > { %9027 = vmatmul.mubr.msk.bf16.gmra.mrb[44].mxu0 %vm308_vm0, %v11958_v22  ;;  %9059 = vmatmul.mubr.msk.bf16.gmra.mrb[44].mxu1 %vm308_vm0, %v11958_v22 }
 0x1c5   : > { %1878 = vmatprep.mubr.bf16.mxu0 %v13107_v0  ;;  %2231 = vmatprep.mubr.bf16.mxu1 %v13107_v0 }
 0x1cc   : > { %9028 = vmatmul.mubr.msk.bf16.gmra.mrb[48].mxu0 %vm308_vm0, %v11966_v23  ;;  %9060 = vmatmul.mubr.msk.bf16.gmra.mrb[48].mxu1 %vm308_vm0, %v11966_v23 }
 0x1cd   : > { %1888 = vmatprep.mubr.bf16.mxu0 %v13107_v0  ;;  %2241 = vmatprep.mubr.bf16.mxu1 %v13107_v0 }
 0x1d4   : > { %9029 = vmatmul.mubr.msk.bf16.gmra.mrb[52].mxu0 %vm308_vm0, %v11974_v24  ;;  %9061 = vmatmul.mubr.msk.bf16.gmra.mrb[52].mxu1 %vm308_vm0, %v11974_v24 }
 0x1d5   : > { %1898 = vmatprep.mubr.bf16.mxu0 %v13107_v0  ;;  %2251 = vmatprep.mubr.bf16.mxu1 %v13107_v0 }
 0x1dc   : > { %9030 = vmatmul.mubr.msk.bf16.gmra.mrb[56].mxu0 %vm308_vm0, %v11982_v25  ;;  %9062 = vmatmul.mubr.msk.bf16.gmra.mrb[56].mxu1 %vm308_vm0, %v11982_v25 }
 0x1dd   : > { %1908 = vmatprep.mubr.bf16.mxu0 %v13107_v0  ;;  %2261 = vmatprep.mubr.bf16.mxu1 %v13107_v0 }
 0x1e4   : > { %9031 = vmatmul.mubr.msk.bf16.gmra.mrb[60].mxu0 %vm308_vm0, %v11684_v31  ;;  %9063 = vmatmul.mubr.msk.bf16.gmra.mrb[60].mxu1 %vm308_vm0, %v11684_v31  ;;  %v10679_v31 = vld [vmem:[#allocation4 + $0x224] ss:$16 sps:$4 sm:$0xff]  }
 0x1e5   : > { %1918 = vmatprep.mubr.bf16.mxu0 %v13107_v0  ;;  %2271 = vmatprep.mubr.bf16.mxu1 %v13107_v0 }
 0x1ec   : > { %9032 = vmatmul.mubr.msk.bf16.gmra.mrb[64].mxu0 %vm308_vm0, %v11694_v33  ;;  %9064 = vmatmul.mubr.msk.bf16.gmra.mrb[64].mxu1 %vm308_vm0, %v11694_v33  ;;  %v10677_v33 = vld [vmem:[#allocation4 + $0x220] ss:$16 sps:$4 sm:$0xff]  }
 0x1ed   : > { %1928 = vmatprep.mubr.bf16.mxu0 %v13107_v0  ;;  %2281 = vmatprep.mubr.bf16.mxu1 %v13107_v0 }
 0x1f4   : > { %9033 = vmatmul.mubr.msk.bf16.gmra.mrb[68].mxu0 %vm308_vm0, %v11702_v34  ;;  %9065 = vmatmul.mubr.msk.bf16.gmra.mrb[68].mxu1 %vm308_vm0, %v11702_v34  ;;  %v10680_v34 = vld [vmem:[#allocation4 + $0x228] ss:$16 sps:$4 sm:$0xff]  }
 0x1f5   : > { %1938 = vmatprep.mubr.bf16.mxu0 %v13107_v0  ;;  %2291 = vmatprep.mubr.bf16.mxu1 %v13107_v0 }
 0x1fc   : > { %9034 = vmatmul.mubr.msk.bf16.gmra.mrb[72].mxu0 %vm308_vm0, %v11716_v37  ;;  %9066 = vmatmul.mubr.msk.bf16.gmra.mrb[72].mxu1 %vm308_vm0, %v11716_v37  ;;  %v2433_v37 = vld [vmem:[#allocation2 + $0x18] sm:$0xff] }
 0x1fd   : > { %1948 = vmatprep.mubr.bf16.mxu0 %v13107_v0  ;;  %2301 = vmatprep.mubr.bf16.mxu1 %v13107_v0 }
 0x204   : > { %9035 = vmatmul.mubr.msk.bf16.gmra.mrb[76].mxu0 %vm308_vm0, %v11724_v38  ;;  %9067 = vmatmul.mubr.msk.bf16.gmra.mrb[76].mxu1 %vm308_vm0, %v11724_v38  ;;  %v10683_v38 = vld [vmem:[#allocation4 + $0x240] ss:$16 sps:$4 sm:$0xff]  }
 0x205   : > { %1958 = vmatprep.mubr.bf16.mxu0 %v13107_v0  ;;  %2311 = vmatprep.mubr.bf16.mxu1 %v13107_v0 }
 0x20c   : > { %9036 = vmatmul.mubr.msk.bf16.gmra.mrb[80].mxu0 %vm308_vm0, %v11732_v39  ;;  %9068 = vmatmul.mubr.msk.bf16.gmra.mrb[80].mxu1 %vm308_vm0, %v11732_v39  ;;  %v10686_v39 = vld [vmem:[#allocation4 + $0x248] ss:$16 sps:$4 sm:$0xff]  }
 0x20d   : > { %1968 = vmatprep.mubr.bf16.mxu0 %v13107_v0  ;;  %2321 = vmatprep.mubr.bf16.mxu1 %v13107_v0 }
 0x214   : > { %9037 = vmatmul.mubr.msk.bf16.gmra.mrb[84].mxu0 %vm308_vm0, %v11740_v40  ;;  %9069 = vmatmul.mubr.msk.bf16.gmra.mrb[84].mxu1 %vm308_vm0, %v11740_v40  ;;  %v2434_v40 = vld [vmem:[#allocation2 + $0x20] sm:$0xff] }
 0x215   : > { %1978 = vmatprep.mubr.bf16.mxu0 %v13107_v0  ;;  %2331 = vmatprep.mubr.bf16.mxu1 %v13107_v0 }
 0x21c   : > { %9038 = vmatmul.mubr.msk.bf16.gmra.mrb[88].mxu0 %vm308_vm0, %v11748_v41  ;;  %9070 = vmatmul.mubr.msk.bf16.gmra.mrb[88].mxu1 %vm308_vm0, %v11748_v41  ;;  %v10689_v41 = vld [vmem:[#allocation4 + $0x260] ss:$16 sps:$4 sm:$0xff]  }
 0x21d   : > { %1988 = vmatprep.mubr.bf16.mxu0 %v13107_v0  ;;  %2341 = vmatprep.mubr.bf16.mxu1 %v13107_v0 }
 0x224   : > { %9039 = vmatmul.mubr.msk.bf16.gmra.mrb[92].mxu0 %vm308_vm0, %v11756_v42  ;;  %9071 = vmatmul.mubr.msk.bf16.gmra.mrb[92].mxu1 %vm308_vm0, %v11756_v42  ;;  %v10691_v42 = vld [vmem:[#allocation4 + $0x264] ss:$16 sps:$4 sm:$0xff]  }
 0x225   : > { %1998 = vmatprep.mubr.bf16.mxu0 %v13107_v0  ;;  %2351 = vmatprep.mubr.bf16.mxu1 %v13107_v0 }
 0x22c   : > { %9040 = vmatmul.mubr.msk.bf16.gmra.mrb[96].mxu0 %vm308_vm0, %v11764_v43  ;;  %9072 = vmatmul.mubr.msk.bf16.gmra.mrb[96].mxu1 %vm308_vm0, %v11764_v43  ;;  %v10692_v43 = vld [vmem:[#allocation4 + $0x268] ss:$16 sps:$4 sm:$0xff]  }
 0x22d   : > { %2008 = vmatprep.mubr.bf16.mxu0 %v13107_v0  ;;  %2361 = vmatprep.mubr.bf16.mxu1 %v13107_v0 }
 0x234   : > { %9041 = vmatmul.mubr.msk.bf16.gmra.mrb[100].mxu0 %vm308_vm0, %v11772_v44  ;;  %9073 = vmatmul.mubr.msk.bf16.gmra.mrb[100].mxu1 %vm308_vm0, %v11772_v44 }
 0x235   : > { %2018 = vmatprep.mubr.bf16.mxu0 %v13107_v0  ;;  %2371 = vmatprep.mubr.bf16.mxu1 %v13107_v0 }
 0x23c   : > { %9042 = vmatmul.mubr.msk.bf16.gmra.mrb[104].mxu0 %vm308_vm0, %v11780_v45  ;;  %9074 = vmatmul.mubr.msk.bf16.gmra.mrb[104].mxu1 %vm308_vm0, %v11780_v45 }
 0x23d   : > { %2028 = vmatprep.mubr.bf16.mxu0 %v13107_v0  ;;  %2381 = vmatprep.mubr.bf16.mxu1 %v13107_v0 }
 0x244   : > { %9043 = vmatmul.mubr.msk.bf16.gmra.mrb[108].mxu0 %vm308_vm0, %v11788_v46  ;;  %9075 = vmatmul.mubr.msk.bf16.gmra.mrb[108].mxu1 %vm308_vm0, %v11788_v46 }
 0x245   : > { %2038 = vmatprep.mubr.bf16.mxu0 %v13107_v0  ;;  %2391 = vmatprep.mubr.bf16.mxu1 %v13107_v0 }
 0x24c   : > { %9044 = vmatmul.mubr.msk.bf16.gmra.mrb[112].mxu0 %vm308_vm0, %v11796_v47  ;;  %9076 = vmatmul.mubr.msk.bf16.gmra.mrb[112].mxu1 %vm308_vm0, %v11796_v47 }
 0x24d   : > { %2048 = vmatprep.mubr.bf16.mxu0 %v13107_v0  ;;  %2401 = vmatprep.mubr.bf16.mxu1 %v13107_v0 }
 0x254   : > { %9045 = vmatmul.mubr.msk.bf16.gmra.mrb[116].mxu0 %vm308_vm0, %v11804_v48  ;;  %9077 = vmatmul.mubr.msk.bf16.gmra.mrb[116].mxu1 %vm308_vm0, %v11804_v48 }
 0x255   : > { %2058 = vmatprep.mubr.bf16.mxu0 %v13107_v0  ;;  %2411 = vmatprep.mubr.bf16.mxu1 %v13107_v0 }
 0x25c   : > { %9046 = vmatmul.mubr.msk.bf16.gmra.mrb[120].mxu0 %vm308_vm0, %v11812_v49  ;;  %9078 = vmatmul.mubr.msk.bf16.gmra.mrb[120].mxu1 %vm308_vm0, %v11812_v49  ;;  %v10694_v49 = vld [vmem:[#allocation4 + $0x26c] ss:$16 sps:$4 sm:$0xff]  }
 0x25d   : > { %2068 = vmatprep.mubr.bf16.mxu0 %v13107_v0  ;;  %2421 = vmatprep.mubr.bf16.mxu1 %v13107_v0 }
 0x264   : > { %9047 = vmatmul.mubr.msk.bf16.gmra.mrb[124].mxu0 %vm308_vm0, %v11820_v50  ;;  %9079 = vmatmul.mubr.msk.bf16.gmra.mrb[124].mxu1 %vm308_vm0, %v11820_v50  ;;  %v2435_v50 = vld [vmem:[#allocation2 + $0x28] sm:$0xff] }
 0x265   : > { %2737 = vmatprep.mubr.bf16.mxu0 %v13107_v0  ;;  %3090 = vmatprep.mubr.bf16.mxu1 %v13107_v0 }
 0x26c   : > { %9128 = vmatmul.mubr.msk.bf16.vlgmr.msra.gmra.mrb[0].mxu0 %vm308_vm0, %v2432_v28  ;;  %9160 = vmatmul.mubr.msk.bf16.vlgmr.msra.gmra.mrb[0].mxu1 %vm308_vm0, %v2432_v28  ;;  %v10754_v28 = vld [vmem:[#allocation4 + $0x3ac] ss:$16 sps:$4 sm:$0xff]  }
 0x26d   : > { %2747 = vmatprep.mubr.bf16.mxu0 %v13107_v0  ;;  %3100 = vmatprep.mubr.bf16.mxu1 %v13107_v0 }
 0x26e   : > { %4945 = vmatpush1.bf16.msra.mxu0 %v10671_v29  ;;  %5138 = vmatpush1.bf16.msra.mxu1 %v10674_v30  ;;  %v10749_v29 = vld [vmem:[#allocation4 + $0x3a0] ss:$16 sps:$4 sm:$0xff]   ;;  %v10752_v30 = vld [vmem:[#allocation4 + $0x3a8] ss:$16 sps:$4 sm:$0xff]  }
 0x26f   : > { %4946 = vmatprep.subr.bf16.mxu0 %v10679_v31  ;;  %5139 = vmatprep.subr.bf16.mxu1 %v10682_v32  ;;  %v10757_v31 = vld [vmem:[#allocation4 + $0x3c4] ss:$16 sps:$4 sm:$0xff]   ;;  %v10760_v32 = vld [vmem:[#allocation4 + $0x3cc] ss:$16 sps:$4 sm:$0xff]  }
 0x272   : > { %4947 = vmatpush1.bf16.msra.mxu0 %v10677_v33  ;;  %5140 = vmatpush1.bf16.msra.mxu1 %v10680_v34  ;;  %v11103_v33 = vld [vmem:[#allocation2 + $0x88] sm:$0xff]  ;;  %v10755_v34 = vld [vmem:[#allocation4 + $0x3c0] ss:$16 sps:$4 sm:$0xff]  }
 0x273   : > { %4948 = vmatprep.subr.bf16.mxu0 %v10685_v35  ;;  %5141 = vmatprep.subr.bf16.mxu1 %v10688_v36  ;;  %v10758_v35 = vld [vmem:[#allocation4 + $0x3c8] ss:$16 sps:$4 sm:$0xff]   ;;  %v10763_v36 = vld [vmem:[#allocation4 + $0x3e4] ss:$16 sps:$4 sm:$0xff]  }
 0x274   : > { %9129 = vmatmul.mubr.msk.bf16.gmra.mrb[4].mxu0 %vm308_vm0, %v2433_v37  ;;  %9161 = vmatmul.mubr.msk.bf16.gmra.mrb[4].mxu1 %vm308_vm0, %v2433_v37  ;;  %v10766_v37 = vld [vmem:[#allocation4 + $0x3ec] ss:$16 sps:$4 sm:$0xff]  }
 0x275   : > { %2757 = vmatprep.mubr.bf16.mxu0 %v13107_v0  ;;  %3110 = vmatprep.mubr.bf16.mxu1 %v13107_v0 }
 0x276   : > { %4949 = vmatpush1.bf16.msra.mxu0 %v10683_v38  ;;  %5142 = vmatpush1.bf16.msra.mxu1 %v10686_v39  ;;  %v10761_v38 = vld [vmem:[#allocation4 + $0x3e0] ss:$16 sps:$4 sm:$0xff]   ;;  %v10764_v39 = vld [vmem:[#allocation4 + $0x3e8] ss:$16 sps:$4 sm:$0xff]  }
 0x277   : > { %4950 = vmatprep.subr.bf16.mxu0 %v10691_v42  ;;  %5143 = vmatprep.subr.bf16.mxu1 %v10694_v49  ;;  %v11106_v42 = vld [vmem:[#allocation2 + $0xa0] sm:$0xff]  ;;  %v11108_v49 = vld [vmem:[#allocation2 + $0xb0] sm:$0xff] }
 0x27a   : > { %4951 = vmatpush1.bf16.msra.mxu0 %v10689_v41  ;;  %5144 = vmatpush1.bf16.msra.mxu1 %v10692_v43  ;;  %v11105_v41 = vld [vmem:[#allocation2 + $0x98] sm:$0xff]  ;;  %v11107_v43 = vld [vmem:[#allocation2 + $0xa8] sm:$0xff] }
 0x27b   : > { %4952 = vmatprep.subr.bf16.mxu0 %v10697_v53  ;;  %5145 = vmatprep.subr.bf16.mxu1 %v10700_v55 }
 0x27c   : > { %9130 = vmatmul.mubr.msk.bf16.gmra.mrb[8].mxu0 %vm308_vm0, %v2434_v40  ;;  %9162 = vmatmul.mubr.msk.bf16.gmra.mrb[8].mxu1 %vm308_vm0, %v2434_v40  ;;  %v11104_v40 = vld [vmem:[#allocation2 + $0x90] sm:$0xff] }
 0x27d   : > { %2767 = vmatprep.mubr.bf16.mxu0 %v13107_v0  ;;  %3120 = vmatprep.mubr.bf16.mxu1 %v13107_v0 }
 0x27e   : > { %4953 = vmatpush1.bf16.msra.mxu0 %v10695_v52  ;;  %5146 = vmatpush1.bf16.msra.mxu1 %v10698_v54  ;;  %v3669_v52 = vlaneseq }
 0x27f   : > { %4954 = vmatprep.subr.bf16.mxu0 %v10703_v57  ;;  %5147 = vmatprep.subr.bf16.mxu1 %v10706_v59 }
 0x282   : > { %4955 = vmatpush1.bf16.msra.mxu0 %v10701_v56  ;;  %5148 = vmatpush1.bf16.msra.mxu1 %v10704_v58 }
 0x283   : > { %4956 = vmatprep.subr.bf16.mxu0 %v10709_v61  ;;  %5149 = vmatprep.subr.bf16.mxu1 %v10712_v63 }
 0x284   : > { %9131 = vmatmul.mubr.msk.bf16.gmra.mrb[12].mxu0 %vm308_vm0, %v2435_v50  ;;  %9163 = vmatmul.mubr.msk.bf16.gmra.mrb[12].mxu1 %vm308_vm0, %v2435_v50  ;;  %v11109_v50 = vld [vmem:[#allocation2 + $0xb8] sm:$0xff] }
 0x285   : > { %2777 = vmatprep.mubr.bf16.mxu0 %v13107_v0  ;;  %3130 = vmatprep.mubr.bf16.mxu1 %v13107_v0 }
 0x286   : > { %4957 = vmatpush1.bf16.msra.mxu0 %v10707_v60  ;;  %5150 = vmatpush1.bf16.msra.mxu1 %v10710_v62 }
 0x287   : > { %4958 = vmatprep.subr.bf16.mxu0 %v10715_v2  ;;  %5151 = vmatprep.subr.bf16.mxu1 %v10718_v4 }
 0x28a   : > { %4959 = vmatpush1.bf16.msra.mxu0 %v10713_v1  ;;  %5152 = vmatpush1.bf16.msra.mxu1 %v10716_v3 }
 0x28b   : > { %4960 = vmatprep.subr.bf16.mxu0 %v10721_v5  ;;  %5153 = vmatprep.subr.bf16.mxu1 %v10724_v6 }
 0x28c   : > { %9132 = vmatmul.mubr.msk.bf16.gmra.mrb[16].mxu0 %vm308_vm0, %v2436_v51  ;;  %9164 = vmatmul.mubr.msk.bf16.gmra.mrb[16].mxu1 %vm308_vm0, %v2436_v51  ;;  %v11110_v51 = vld [vmem:[#allocation2 + $0xc0] sm:$0xff] }
 0x28d   : > { %2787 = vmatprep.mubr.bf16.mxu0 %v13107_v0  ;;  %3140 = vmatprep.mubr.bf16.mxu1 %v13107_v0 }
 0x28e   : > { %4961 = vmatpush1.bf16.msra.mxu0 %v10719_v7  ;;  %5154 = vmatpush1.bf16.msra.mxu1 %v10722_v8 }
 0x28f   : > { %4962 = vmatprep.subr.bf16.mxu0 %v10727_v9  ;;  %5155 = vmatprep.subr.bf16.mxu1 %v10730_v10 }
 0x292   : > { %4963 = vmatpush1.bf16.msra.mxu0 %v10725_v11  ;;  %5156 = vmatpush1.bf16.msra.mxu1 %v10728_v12 }
 0x293   : > { %4964 = vmatprep.subr.bf16.mxu0 %v10733_v13 }
 0x294   : > { %9133 = vmatmul.mubr.msk.bf16.gmra.mrb[20].mxu0 %vm308_vm0, %v11914_v14  ;;  %9165 = vmatmul.mubr.msk.bf16.gmra.mrb[20].mxu1 %vm308_vm0, %v11914_v14  ;;  %v10736_v14 = vld [vmem:[#allocation4 + $0x34c] ss:$16 sps:$4 sm:$0xff]  }
 0x295   : > { %2797 = vmatprep.mubr.bf16.mxu0 %v13107_v0  ;;  %3150 = vmatprep.mubr.bf16.mxu1 %v13107_v0 }
 0x296   : > { %5157 = vmatprep.subr.bf16.mxu1 %v10736_v14 }
 0x29c   : > { %9134 = vmatmul.mubr.msk.bf16.gmra.mrb[24].mxu0 %vm308_vm0, %v11922_v15  ;;  %9166 = vmatmul.mubr.msk.bf16.gmra.mrb[24].mxu1 %vm308_vm0, %v11922_v15  ;;  %v11101_v15 = vld [vmem:[#allocation2 + $0x78] sm:$0xff] }
 0x29d   : > { %2807 = vmatprep.mubr.bf16.mxu0 %v13107_v0  ;;  %3160 = vmatprep.mubr.bf16.mxu1 %v13107_v0 }
 0x2a4   : > { %9135 = vmatmul.mubr.msk.bf16.gmra.mrb[28].mxu0 %vm308_vm0, %v11930_v16  ;;  %9167 = vmatmul.mubr.msk.bf16.gmra.mrb[28].mxu1 %vm308_vm0, %v11930_v16  ;;  %v10731_v16 = vld [vmem:[#allocation4 + $0x340] ss:$16 sps:$4 sm:$0xff]  }
 0x2a5   : > { %2817 = vmatprep.mubr.bf16.mxu0 %v13107_v0  ;;  %3170 = vmatprep.mubr.bf16.mxu1 %v13107_v0 }
 0x2a6   : > { %4965 = vmatpush1.bf16.msra.mxu0 %v10731_v16 }
 0x2a7   : > { %4966 = vmatprep.subr.bf16.mxu0 %v10739_v18 }
 0x2aa   : > { %4967 = vmatpush1.bf16.msra.mxu0 %v10737_v20 }
 0x2ac   : > { %9136 = vmatmul.mubr.msk.bf16.gmra.mrb[32].mxu0 %vm308_vm0, %v11938_v17  ;;  %9168 = vmatmul.mubr.msk.bf16.gmra.mrb[32].mxu1 %vm308_vm0, %v11938_v17  ;;  %v10734_v17 = vld [vmem:[#allocation4 + $0x348] ss:$16 sps:$4 sm:$0xff]  }
 0x2ad   : > { %2827 = vmatprep.mubr.bf16.mxu0 %v13107_v0  ;;  %3180 = vmatprep.mubr.bf16.mxu1 %v13107_v0 }
 0x2ae   : > { %5158 = vmatpush1.bf16.msra.mxu1 %v10734_v17 }
 0x2af   : > { %5159 = vmatprep.subr.bf16.mxu1 %v10742_v19 }
 0x2b2   : > { %5160 = vmatpush1.bf16.msra.mxu1 %v10740_v21 }
 0x2b4   : > { %9137 = vmatmul.mubr.msk.bf16.gmra.mrb[36].mxu0 %vm308_vm0, %v11958_v22  ;;  %9169 = vmatmul.mubr.msk.bf16.gmra.mrb[36].mxu1 %vm308_vm0, %v11958_v22  ;;  %v10745_v22 = vld [vmem:[#allocation4 + $0x384] ss:$16 sps:$4 sm:$0xff]  }
 0x2b5   : > { %2837 = vmatprep.mubr.bf16.mxu0 %v13107_v0  ;;  %3190 = vmatprep.mubr.bf16.mxu1 %v13107_v0 }
 0x2b6   : > { %4968 = vmatprep.subr.bf16.mxu0 %v10745_v22 }
 0x2bc   : > { %9138 = vmatmul.mubr.msk.bf16.gmra.mrb[40].mxu0 %vm308_vm0, %v11966_v23  ;;  %9170 = vmatmul.mubr.msk.bf16.gmra.mrb[40].mxu1 %vm308_vm0, %v11966_v23  ;;  %v10748_v23 = vld [vmem:[#allocation4 + $0x38c] ss:$16 sps:$4 sm:$0xff]  }
 0x2bd   : > { %2847 = vmatprep.mubr.bf16.mxu0 %v13107_v0  ;;  %3200 = vmatprep.mubr.bf16.mxu1 %v13107_v0 }
 0x2be   : > { %5161 = vmatprep.subr.bf16.mxu1 %v10748_v23 }
 0x2bf   : > { %5162 = vmatpush1.bf16.msra.mxu1 %v10746_v26 }
 0x2c0   : > { %5163 = vmatprep.subr.bf16.mxu1 %v10754_v28 }
 0x2c3   : > { %5164 = vmatpush1.bf16.msra.mxu1 %v10752_v30 }
 0x2c4   : > { %9139 = vmatmul.mubr.msk.bf16.gmra.mrb[44].mxu0 %vm308_vm0, %v11974_v24  ;;  %9171 = vmatmul.mubr.msk.bf16.gmra.mrb[44].mxu1 %vm308_vm0, %v11974_v24  ;;  %v11102_v24 = vld [vmem:[#allocation2 + $0x80] sm:$0xff] }
 0x2c5   : > { %2857 = vmatprep.mubr.bf16.mxu0 %v13107_v0  ;;  %3210 = vmatprep.mubr.bf16.mxu1 %v13107_v0 }
 0x2c6   : > { %5165 = vmatprep.subr.bf16.mxu1 %v10760_v32 }
 0x2c7   : > { %5166 = vmatpush1.bf16.msra.mxu1 %v10758_v35 }
 0x2c8   : > { %5167 = vmatprep.subr.bf16.mxu1 %v10766_v37 }
 0x2cb   : > { %5168 = vmatpush1.bf16.msra.mxu1 %v10764_v39 }
 0x2cc   : > { %9140 = vmatmul.mubr.msk.bf16.gmra.mrb[48].mxu0 %vm308_vm0, %v11982_v25  ;;  %9172 = vmatmul.mubr.msk.bf16.gmra.mrb[48].mxu1 %vm308_vm0, %v11982_v25  ;;  %v10743_v25 = vld [vmem:[#allocation4 + $0x380] ss:$16 sps:$4 sm:$0xff]  }
 0x2cd   : > { %2867 = vmatprep.mubr.bf16.mxu0 %v13107_v0  ;;  %3220 = vmatprep.mubr.bf16.mxu1 %v13107_v0 }
 0x2ce   : > { %4969 = vmatpush1.bf16.msra.mxu0 %v10743_v25 }
 0x2cf   : > { %4970 = vmatprep.subr.bf16.mxu0 %v10751_v27 }
 0x2d2   : > { %4971 = vmatpush1.bf16.msra.mxu0 %v10749_v29  ;;  %v2460_v29 = vld [vmem:[#allocation2 + $0xf0] sm:$0xff] }
 0x2d3   : > { %4972 = vmatprep.subr.bf16.mxu0 %v10757_v31 }
 0x2d4   : > { %9141 = vmatmul.mubr.msk.bf16.gmra.mrb[52].mxu0 %vm308_vm0, %v11101_v15  ;;  %9173 = vmatmul.mubr.msk.bf16.gmra.mrb[52].mxu1 %vm308_vm0, %v11101_v15 }
 0x2d5   : > { %2877 = vmatprep.mubr.bf16.mxu0 %v13107_v0  ;;  %3230 = vmatprep.mubr.bf16.mxu1 %v13107_v0 }
 0x2d6   : > { %4973 = vmatpush1.bf16.msra.mxu0 %v10755_v34 }
 0x2d7   : > { %4974 = vmatprep.subr.bf16.mxu0 %v10763_v36 }
 0x2da   : > { %4975 = vmatpush1.bf16.msra.mxu0 %v10761_v38 }
 0x2dc   : > { %9142 = vmatmul.mubr.msk.bf16.gmra.mrb[56].mxu0 %vm308_vm0, %v11102_v24  ;;  %9174 = vmatmul.mubr.msk.bf16.gmra.mrb[56].mxu1 %vm308_vm0, %v11102_v24 }
 0x2dd   : > { %2887 = vmatprep.mubr.bf16.mxu0 %v13107_v0  ;;  %3240 = vmatprep.mubr.bf16.mxu1 %v13107_v0 }
 0x2e4   : > { %9143 = vmatmul.mubr.msk.bf16.gmra.mrb[60].mxu0 %vm308_vm0, %v11103_v33  ;;  %9175 = vmatmul.mubr.msk.bf16.gmra.mrb[60].mxu1 %vm308_vm0, %v11103_v33 }
 0x2e5   : > { %2897 = vmatprep.mubr.bf16.mxu0 %v13107_v0  ;;  %3250 = vmatprep.mubr.bf16.mxu1 %v13107_v0 }
 0x2ec   : > { %9144 = vmatmul.mubr.msk.bf16.gmra.mrb[64].mxu0 %vm308_vm0, %v11104_v40  ;;  %9176 = vmatmul.mubr.msk.bf16.gmra.mrb[64].mxu1 %vm308_vm0, %v11104_v40 }
 0x2ed   : > { %2907 = vmatprep.mubr.bf16.mxu0 %v13107_v0  ;;  %3260 = vmatprep.mubr.bf16.mxu1 %v13107_v0 }
 0x2f4   : > { %9145 = vmatmul.mubr.msk.bf16.gmra.mrb[68].mxu0 %vm308_vm0, %v11105_v41  ;;  %9177 = vmatmul.mubr.msk.bf16.gmra.mrb[68].mxu1 %vm308_vm0, %v11105_v41 }
 0x2f5   : > { %2917 = vmatprep.mubr.bf16.mxu0 %v13107_v0  ;;  %3270 = vmatprep.mubr.bf16.mxu1 %v13107_v0 }
 0x2fc   : > { %9146 = vmatmul.mubr.msk.bf16.gmra.mrb[72].mxu0 %vm308_vm0, %v11106_v42  ;;  %9178 = vmatmul.mubr.msk.bf16.gmra.mrb[72].mxu1 %vm308_vm0, %v11106_v42 }
 0x2fd   : > { %2927 = vmatprep.mubr.bf16.mxu0 %v13107_v0  ;;  %3280 = vmatprep.mubr.bf16.mxu1 %v13107_v0 }
 0x304   : > { %9147 = vmatmul.mubr.msk.bf16.gmra.mrb[76].mxu0 %vm308_vm0, %v11107_v43  ;;  %9179 = vmatmul.mubr.msk.bf16.gmra.mrb[76].mxu1 %vm308_vm0, %v11107_v43 }
 0x305   : > { %2937 = vmatprep.mubr.bf16.mxu0 %v13107_v0  ;;  %3290 = vmatprep.mubr.bf16.mxu1 %v13107_v0 }
 0x30c   : > { %9148 = vmatmul.mubr.msk.bf16.gmra.mrb[80].mxu0 %vm308_vm0, %v11108_v49  ;;  %9180 = vmatmul.mubr.msk.bf16.gmra.mrb[80].mxu1 %vm308_vm0, %v11108_v49 }
 0x30d   : > { %2947 = vmatprep.mubr.bf16.mxu0 %v13107_v0  ;;  %3300 = vmatprep.mubr.bf16.mxu1 %v13107_v0 }
 0x314   : > { %9149 = vmatmul.mubr.msk.bf16.gmra.mrb[84].mxu0 %vm308_vm0, %v11109_v50  ;;  %9181 = vmatmul.mubr.msk.bf16.gmra.mrb[84].mxu1 %vm308_vm0, %v11109_v50 }
 0x315   : > { %2957 = vmatprep.mubr.bf16.mxu0 %v13107_v0  ;;  %3310 = vmatprep.mubr.bf16.mxu1 %v13107_v0 }
 0x31c   : > { %9150 = vmatmul.mubr.msk.bf16.gmra.mrb[88].mxu0 %vm308_vm0, %v11110_v51  ;;  %9182 = vmatmul.mubr.msk.bf16.gmra.mrb[88].mxu1 %vm308_vm0, %v11110_v51 }
 0x31d   : > { %2967 = vmatprep.mubr.bf16.mxu0 %v13107_v0  ;;  %3320 = vmatprep.mubr.bf16.mxu1 %v13107_v0 }
 0x324   : > { %9151 = vmatmul.mubr.msk.bf16.gmra.mrb[92].mxu0 %vm308_vm0, %v11772_v44  ;;  %9183 = vmatmul.mubr.msk.bf16.gmra.mrb[92].mxu1 %vm308_vm0, %v11772_v44  ;;  %v12218_v44 = vshrl.u32 %v3669_v52, 7 }
 0x325   : > { %2977 = vmatprep.mubr.bf16.mxu0 %v13107_v0  ;;  %3330 = vmatprep.mubr.bf16.mxu1 %v13107_v0 }
 0x326   : > { %13129 = vst [vmem:[#allocation14_spill] sm:$0xff] %v12218_v44  ;;  %v13106_v53 = vsub.s32 0, %v12218_v44  ;;  %v13104_v54 = vsub.s32 1, %v12218_v44  ;;  %v13103_v55 = vsub.s32 3, %v12218_v44 }
 0x32c   : > { %9152 = vmatmul.mubr.msk.bf16.gmra.mrb[96].mxu0 %vm308_vm0, %v11780_v45  ;;  %9184 = vmatmul.mubr.msk.bf16.gmra.mrb[96].mxu1 %vm308_vm0, %v11780_v45  ;;  %v13105_v45 = vsub.s32 2, %v12218_v44 }
 0x32d   : > { %2987 = vmatprep.mubr.bf16.mxu0 %v13107_v0  ;;  %3340 = vmatprep.mubr.bf16.mxu1 %v13107_v0 }
 0x334   : > { %9153 = vmatmul.mubr.msk.bf16.gmra.mrb[100].mxu0 %vm308_vm0, %v11788_v46  ;;  %9185 = vmatmul.mubr.msk.bf16.gmra.mrb[100].mxu1 %vm308_vm0, %v11788_v46  ;;  %v3667_v46 = vld [vmem:[%s13094_s2] sm:$0xf] }
 0x335   : > { %2997 = vmatprep.mubr.bf16.mxu0 %v13107_v0  ;;  %3350 = vmatprep.mubr.bf16.mxu1 %v13107_v0  ;;  %v12235_v57 = vrot.slane %v3667_v46, %v13106_v53  ;;  %v12239_v59 = vrot.slane %v3667_v46, %v13105_v45  ;;  %v12247_v60 = vrot.slane %v3667_v46, %v13103_v55 }
 0x33c   : > { %9154 = vmatmul.mubr.msk.bf16.gmra.mrb[104].mxu0 %vm308_vm0, %v11796_v47  ;;  %9186 = vmatmul.mubr.msk.bf16.gmra.mrb[104].mxu1 %vm308_vm0, %v11796_v47  ;;  %v12243_v47 = vrot.slane %v3667_v46, %v13104_v54 }
 0x33d   : > { %3007 = vmatprep.mubr.bf16.mxu0 %v13107_v0  ;;  %3360 = vmatprep.mubr.bf16.mxu1 %v13107_v0 }
 0x33f   : > { %v2739_v56 = vpop.f32.mrb[0].mxu0  ;;  %v3092_v58 = vpop.f32.mrb[0].mxu1 }
 0x340   : > { %v2741_v61 = vpop.f32.mrb[1].mxu0  ;;  %v3094_v62 = vpop.f32.mrb[1].mxu1  ;;  %v3689_v4 = vadd.f32 %v12235_v57, %v2739_v56  ;;  %v3691_v5 = vadd.f32 %v12239_v59, %v3092_v58 }
 0x341   : > { %v2743_v63 = vpop.f32.mrb[2].mxu0  ;;  %v3096_v1 = vpop.f32.mrb[2].mxu1  ;;  %v3690_v6 = vadd.f32 %v12243_v47, %v2741_v61  ;;  %v3692_v7 = vadd.f32 %v12247_v60, %v3094_v62 }
 0x342   : > { %v2745_v2 = vpop.f32.mrb[3].mxu0  ;;  %v3098_v3 = vpop.f32.mrb[3].mxu1  ;;  %v3693_v8 = vadd.f32 %v12235_v57, %v2743_v63  ;;  %v3695_v9 = vadd.f32 %v12239_v59, %v3096_v1  ;;  %v3945_v12 = vmax.f32 %v3689_v4, 0.0  ;;  %v3947_v13 = vmax.f32 %v3691_v5, 0.0 }
 0x343   : > { %v3694_v10 = vadd.f32 %v12243_v47, %v2745_v2  ;;  %v3696_v11 = vadd.f32 %v12247_v60, %v3098_v3  ;;  %v3946_v14 = vmax.f32 %v3690_v6, 0.0  ;;  %v3948_v15 = vmax.f32 %v3692_v7, 0.0 }
 0x344   : > { %9155 = vmatmul.mubr.msk.bf16.gmra.mrb[108].mxu0 %vm308_vm0, %v11804_v48  ;;  %9187 = vmatmul.mubr.msk.bf16.gmra.mrb[108].mxu1 %vm308_vm0, %v11804_v48  ;;  %v3949_v18 = vmax.f32 %v3693_v8, 0.0  ;;  %v3951_v19 = vmax.f32 %v3695_v9, 0.0  ;;  %v2461_v9 = vld [vmem:[#allocation2 + $0xf8] sm:$0xff] }
 0x345   : > { %3017 = vmatprep.mubr.bf16.mxu0 %v13107_v0  ;;  %3370 = vmatprep.mubr.bf16.mxu1 %v13107_v0  ;;  %v3950_v23 = vmax.f32 %v3694_v10, 0.0  ;;  %v3952_v24 = vmax.f32 %v3696_v11, 0.0 }
 0x347   : > { %v2749_v16 = vpop.f32.mrb[4].mxu0  ;;  %v3102_v17 = vpop.f32.mrb[4].mxu1 }
 0x348   : > { %v3697_v20 = vadd.f32 %v12235_v57, %v2749_v16  ;;  %v3699_v48 = vadd.f32 %v12239_v59, %v3102_v17  ;;  %v2751_v21 = vpop.f32.mrb[5].mxu0  ;;  %v3104_v22 = vpop.f32.mrb[5].mxu1 }
 0x349   : > { %v3698_v25 = vadd.f32 %v12243_v47, %v2751_v21  ;;  %v3700_v26 = vadd.f32 %v12247_v60, %v3104_v22  ;;  %v2753_v27 = vpop.f32.mrb[6].mxu0  ;;  %v3106_v28 = vpop.f32.mrb[6].mxu1 }
 0x34a   : > { %v3953_v30 = vmax.f32 %v3697_v20, 0.0  ;;  %v3955_v31 = vmax.f32 %v3699_v48, 0.0  ;;  %v3701_v32 = vadd.f32 %v12235_v57, %v2753_v27  ;;  %v3703_v33 = vadd.f32 %v12239_v59, %v3106_v28  ;;  %v2755_v34 = vpop.f32.mrb[7].mxu0  ;;  %v3108_v35 = vpop.f32.mrb[7].mxu1  ;;  %v10772_v48 = vld [vmem:[#allocation4 + $0xc] ss:$16 sps:$4 sm:$0xff]  }
 0x34b   : > { %v3954_v36 = vmax.f32 %v3698_v25, 0.0  ;;  %v3956_v37 = vmax.f32 %v3700_v26, 0.0  ;;  %v3702_v38 = vadd.f32 %v12243_v47, %v2755_v34  ;;  %v3704_v39 = vadd.f32 %v12247_v60, %v3108_v35  ;;  %5843 = vmatprep.subr.bf16.mxu1 %v10772_v48 }
 0x34c   : > { %v4201_v40 = vmax.f32 %v3945_v12, %v3953_v30  ;;  %v4203_v41 = vmax.f32 %v3947_v13, %v3955_v31  ;;  %v3957_v42 = vmax.f32 %v3701_v32, 0.0  ;;  %v3959_v43 = vmax.f32 %v3703_v33, 0.0  ;;  %9156 = vmatmul.mubr.msk.bf16.gmra.mrb[112].mxu0 %vm308_vm0, %v2460_v29  ;;  %9188 = vmatmul.mubr.msk.bf16.gmra.mrb[112].mxu1 %vm308_vm0, %v2460_v29 }
 0x34d   : > { %v4202_v49 = vmax.f32 %v3946_v14, %v3954_v36  ;;  %v4204_v50 = vmax.f32 %v3948_v15, %v3956_v37  ;;  %v3958_v51 = vmax.f32 %v3702_v38, 0.0  ;;  %v3960_v52 = vmax.f32 %v3704_v39, 0.0  ;;  %3027 = vmatprep.mubr.bf16.mxu0 %v13107_v0  ;;  %3380 = vmatprep.mubr.bf16.mxu1 %v13107_v0 }
 0x34e   : > { %v4329_v46 = vmax.f32 %v4201_v40, %v4203_v41  ;;  %v4205_v56 = vmax.f32 %v3949_v18, %v3957_v42  ;;  %v4207_v58 = vmax.f32 %v3951_v19, %v3959_v43  ;;  %v10769_v18 = vld [vmem:[#allocation4 + $0x4] ss:$16 sps:$4 sm:$0xff]  }
 0x34f   : > { %v4330_v61 = vmax.f32 %v4202_v49, %v4204_v50  ;;  %v4206_v62 = vmax.f32 %v3950_v23, %v3958_v51  ;;  %v4208_v63 = vmax.f32 %v3952_v24, %v3960_v52  ;;  %v2759_v1 = vpop.f32.mrb[8].mxu0  ;;  %v3112_v2 = vpop.f32.mrb[8].mxu1  ;;  %5650 = vmatprep.subr.bf16.mxu0 %v10769_v18  ;;  %v2462_v41 = vld [vmem:[#allocation2 + $0x100] sm:$0xff] }
 0x350   : > { %v4331_v3 = vmax.f32 %v4205_v56, %v4207_v58  ;;  %v2761_v4 = vpop.f32.mrb[9].mxu0  ;;  %v3114_v5 = vpop.f32.mrb[9].mxu1  ;;  %v3705_v11 = vadd.f32 %v12235_v57, %v2759_v1  ;;  %v3707_v15 = vadd.f32 %v12239_v59, %v3112_v2 }
 0x351   : > { %v4332_v6 = vmax.f32 %v4206_v62, %v4208_v63  ;;  %v2763_v7 = vpop.f32.mrb[10].mxu0  ;;  %v3116_v8 = vpop.f32.mrb[10].mxu1  ;;  %v3706_v16 = vadd.f32 %v12243_v47, %v2761_v4  ;;  %v3708_v17 = vadd.f32 %v12247_v60, %v3114_v5 }
 0x352   : > { %v12275_v10 = vpack.c.bf16 %v4331_v3, %v4329_v46  ;;  %v2765_v12 = vpop.f32.mrb[11].mxu0  ;;  %v3118_v13 = vpop.f32.mrb[11].mxu1  ;;  %v3709_v19 = vadd.f32 %v12235_v57, %v2763_v7  ;;  %v3711_v20 = vadd.f32 %v12239_v59, %v3116_v8  ;;  %v3961_v23 = vmax.f32 %v3705_v11, 0.0 }
 0x353   : > { %v12278_v14 = vpack.c.bf16 %v4332_v6, %v4330_v61  ;;  %v3710_v21 = vadd.f32 %v12243_v47, %v2765_v12  ;;  %v3712_v22 = vadd.f32 %v12247_v60, %v3118_v13  ;;  %v3963_v24 = vmax.f32 %v3707_v15, 0.0 }
 0x354   : > { %9157 = vmatmul.mubr.msk.bf16.gmra.mrb[116].mxu0 %vm308_vm0, %v2461_v9  ;;  %9189 = vmatmul.mubr.msk.bf16.gmra.mrb[116].mxu1 %vm308_vm0, %v2461_v9  ;;  %v3962_v25 = vmax.f32 %v3706_v16, 0.0  ;;  %v3964_v26 = vmax.f32 %v3708_v17, 0.0  ;;  %v3965_v29 = vmax.f32 %v3709_v19, 0.0  ;;  %v3967_v30 = vmax.f32 %v3711_v20, 0.0 }
 0x355   : > { %3037 = vmatprep.mubr.bf16.mxu0 %v13107_v0  ;;  %3390 = vmatprep.mubr.bf16.mxu1 %v13107_v0  ;;  %v3966_v35 = vmax.f32 %v3710_v21, 0.0  ;;  %v3968_v36 = vmax.f32 %v3712_v22, 0.0  ;;  %v2463_v22 = vld [vmem:[#allocation2 + $0x108] sm:$0xff] }
 0x357   : > { %v2769_v27 = vpop.f32.mrb[12].mxu0  ;;  %v3122_v28 = vpop.f32.mrb[12].mxu1 }
 0x358   : > { %v3713_v31 = vadd.f32 %v12235_v57, %v2769_v27  ;;  %v3715_v32 = vadd.f32 %v12239_v59, %v3122_v28  ;;  %v2771_v33 = vpop.f32.mrb[13].mxu0  ;;  %v3124_v34 = vpop.f32.mrb[13].mxu1 }
 0x359   : > { %v3714_v37 = vadd.f32 %v12243_v47, %v2771_v33  ;;  %v3716_v38 = vadd.f32 %v12247_v60, %v3124_v34  ;;  %v2773_v39 = vpop.f32.mrb[14].mxu0  ;;  %v3126_v40 = vpop.f32.mrb[14].mxu1 }
 0x35a   : > { %v3969_v42 = vmax.f32 %v3713_v31, 0.0  ;;  %v3971_v43 = vmax.f32 %v3715_v32, 0.0  ;;  %v3717_v49 = vadd.f32 %v12235_v57, %v2773_v39  ;;  %v3719_v50 = vadd.f32 %v12239_v59, %v3126_v40  ;;  %v2775_v51 = vpop.f32.mrb[15].mxu0  ;;  %v3128_v52 = vpop.f32.mrb[15].mxu1 }
 0x35b   : > { %v3970_v46 = vmax.f32 %v3714_v37, 0.0  ;;  %v3972_v56 = vmax.f32 %v3716_v38, 0.0  ;;  %v3718_v58 = vadd.f32 %v12243_v47, %v2775_v51  ;;  %v3720_v61 = vadd.f32 %v12247_v60, %v3128_v52 }
 0x35c   : > { %v4209_v62 = vmax.f32 %v3961_v23, %v3969_v42  ;;  %v4211_v63 = vmax.f32 %v3963_v24, %v3971_v43  ;;  %v3973_v1 = vmax.f32 %v3717_v49, 0.0  ;;  %v3975_v2 = vmax.f32 %v3719_v50, 0.0  ;;  %9158 = vmatmul.mubr.msk.bf16.gmra.mrb[120].mxu0 %vm308_vm0, %v2462_v41  ;;  %9190 = vmatmul.mubr.msk.bf16.gmra.mrb[120].mxu1 %vm308_vm0, %v2462_v41 }
 0x35d   : > { %v4210_v3 = vmax.f32 %v3962_v25, %v3970_v46  ;;  %v4212_v4 = vmax.f32 %v3964_v26, %v3972_v56  ;;  %v3974_v5 = vmax.f32 %v3718_v58, 0.0  ;;  %v3976_v6 = vmax.f32 %v3720_v61, 0.0  ;;  %3047 = vmatprep.mubr.bf16.mxu0 %v13107_v0  ;;  %3400 = vmatprep.mubr.bf16.mxu1 %v13107_v0 }
 0x35e   : > { %v4333_v7 = vmax.f32 %v4209_v62, %v4211_v63  ;;  %v4213_v8 = vmax.f32 %v3965_v29, %v3973_v1  ;;  %v4215_v9 = vmax.f32 %v3967_v30, %v3975_v2  ;;  %v10767_v63 = vld [vmem:[#allocation4] ss:$16 sps:$4 sm:$0xff]  }
 0x35f   : > { %v4334_v11 = vmax.f32 %v4210_v3, %v4212_v4  ;;  %v4214_v12 = vmax.f32 %v3966_v35, %v3974_v5  ;;  %v4216_v13 = vmax.f32 %v3968_v36, %v3976_v6  ;;  %v2779_v15 = vpop.f32.mrb[16].mxu0  ;;  %v3132_v16 = vpop.f32.mrb[16].mxu1 }
 0x360   : > { %v4335_v17 = vmax.f32 %v4213_v8, %v4215_v9  ;;  %v2781_v18 = vpop.f32.mrb[17].mxu0  ;;  %v3134_v19 = vpop.f32.mrb[17].mxu1  ;;  %v3721_v24 = vadd.f32 %v12235_v57, %v2779_v15  ;;  %v3723_v28 = vadd.f32 %v12239_v59, %v3132_v16  ;;  %v10778_v15 = vld [vmem:[#allocation4 + $0x2c] ss:$16 sps:$4 sm:$0xff]  }
 0x361   : > { %v4336_v20 = vmax.f32 %v4214_v12, %v4216_v13  ;;  %v2783_v48 = vpop.f32.mrb[18].mxu0  ;;  %v3136_v21 = vpop.f32.mrb[18].mxu1  ;;  %v3722_v29 = vadd.f32 %v12243_v47, %v2781_v18  ;;  %v3724_v30 = vadd.f32 %v12247_v60, %v3134_v19  ;;  %v10775_v13 = vld [vmem:[#allocation4 + $0x24] ss:$16 sps:$4 sm:$0xff]  }
 0x362   : > { %v12303_v23 = vpack.c.bf16 %v4335_v17, %v4333_v7  ;;  %v2785_v25 = vpop.f32.mrb[19].mxu0  ;;  %v3138_v26 = vpop.f32.mrb[19].mxu1  ;;  %v3725_v31 = vadd.f32 %v12235_v57, %v2783_v48  ;;  %v3727_v32 = vadd.f32 %v12239_v59, %v3136_v21  ;;  %v3977_v35 = vmax.f32 %v3721_v24, 0.0  ;;  %v10770_v7 = vld [vmem:[#allocation4 + $0x8] ss:$16 sps:$4 sm:$0xff]  }
 0x363   : > { %v12306_v27 = vpack.c.bf16 %v4336_v20, %v4334_v11  ;;  %v3726_v33 = vadd.f32 %v12243_v47, %v2785_v25  ;;  %v3728_v34 = vadd.f32 %v12247_v60, %v3138_v26  ;;  %v3979_v36 = vmax.f32 %v3723_v28, 0.0  ;;  %v10773_v28 = vld [vmem:[#allocation4 + $0x20] ss:$16 sps:$4 sm:$0xff]  }
 0x364   : > { %9159 = vmatmul.mubr.msk.bf16.gmra.mrb[124].mxu0 %vm308_vm0, %v2463_v22  ;;  %9191 = vmatmul.mubr.msk.bf16.gmra.mrb[124].mxu1 %vm308_vm0, %v2463_v22  ;;  %v3978_v37 = vmax.f32 %v3722_v29, 0.0  ;;  %v3980_v38 = vmax.f32 %v3724_v30, 0.0  ;;  %v3981_v41 = vmax.f32 %v3725_v31, 0.0  ;;  %v3983_v42 = vmax.f32 %v3727_v32, 0.0  ;;  %v10776_v29 = vld [vmem:[#allocation4 + $0x28] ss:$16 sps:$4 sm:$0xff]  }
 0x365   : > { %4976 = vmatprep.mubr.bf16.mxu0 %v12278_v14  ;;  %5169 = vmatprep.mubr.bf16.mxu1 %v12278_v14  ;;  %v3982_v52 = vmax.f32 %v3726_v33, 0.0  ;;  %v3984_v46 = vmax.f32 %v3728_v34, 0.0 }
 0x367   : > { %v2789_v39 = vpop.f32.mrb[20].mxu0  ;;  %v3142_v40 = vpop.f32.mrb[20].mxu1 }
 0x368   : > { %v3729_v43 = vadd.f32 %v12235_v57, %v2789_v39  ;;  %v3731_v49 = vadd.f32 %v12239_v59, %v3142_v40  ;;  %v2791_v50 = vpop.f32.mrb[21].mxu0  ;;  %v3144_v51 = vpop.f32.mrb[21].mxu1 }
 0x369   : > { %v3730_v56 = vadd.f32 %v12243_v47, %v2791_v50  ;;  %v3732_v58 = vadd.f32 %v12247_v60, %v3144_v51  ;;  %v2793_v61 = vpop.f32.mrb[22].mxu0  ;;  %v3146_v62 = vpop.f32.mrb[22].mxu1 }
 0x36a   : > { %v3985_v1 = vmax.f32 %v3729_v43, 0.0  ;;  %v3987_v2 = vmax.f32 %v3731_v49, 0.0  ;;  %v3733_v3 = vadd.f32 %v12235_v57, %v2793_v61  ;;  %v3735_v4 = vadd.f32 %v12239_v59, %v3146_v62  ;;  %v2795_v5 = vpop.f32.mrb[23].mxu0  ;;  %v3148_v6 = vpop.f32.mrb[23].mxu1  ;;  %v10782_v61 = vld [vmem:[#allocation4 + $0x48] ss:$16 sps:$4 sm:$0xff]  }
 0x36b   : > { %v3986_v8 = vmax.f32 %v3730_v56, 0.0  ;;  %v3988_v9 = vmax.f32 %v3732_v58, 0.0  ;;  %v3734_v11 = vadd.f32 %v12243_v47, %v2795_v5  ;;  %v3736_v12 = vadd.f32 %v12247_v60, %v3148_v6  ;;  %v10779_v58 = vld [vmem:[#allocation4 + $0x40] ss:$16 sps:$4 sm:$0xff]  }
 0x36c   : > { %v4217_v16 = vmax.f32 %v3977_v35, %v3985_v1  ;;  %v4219_v17 = vmax.f32 %v3979_v36, %v3987_v2  ;;  %v3989_v18 = vmax.f32 %v3733_v3, 0.0  ;;  %v3991_v19 = vmax.f32 %v3735_v4, 0.0  ;;  %4977 = vmatmul.mubr.bf16.vlgmr.msra.gmra.mrb[128].mxu0 %v12275_v10  ;;  %5170 = vmatmul.mubr.bf16.vlgmr.msra.gmra.mrb[128].mxu1 %v12275_v10  ;;  %v10781_v35 = vld [vmem:[#allocation4 + $0x44] ss:$16 sps:$4 sm:$0xff]   ;;  %v10784_v36 = vld [vmem:[#allocation4 + $0x4c] ss:$16 sps:$4 sm:$0xff]  }
 0x36d   : > { %v4218_v20 = vmax.f32 %v3978_v37, %v3986_v8  ;;  %v4220_v48 = vmax.f32 %v3980_v38, %v3988_v9  ;;  %v3990_v21 = vmax.f32 %v3734_v11, 0.0  ;;  %v3992_v22 = vmax.f32 %v3736_v12, 0.0  ;;  %4986 = vmatprep.mubr.bf16.mxu0 %v12306_v27  ;;  %5179 = vmatprep.mubr.bf16.mxu1 %v12306_v27  ;;  %v10790_v1 = vld [vmem:[#allocation4 + $0x6c] ss:$16 sps:$4 sm:$0xff]   ;;  %v10785_v6 = vld [vmem:[#allocation4 + $0x60] ss:$16 sps:$4 sm:$0xff]  }
 0x36e   : > { %v4337_v24 = vmax.f32 %v4217_v16, %v4219_v17  ;;  %v4221_v25 = vmax.f32 %v3981_v41, %v3989_v18  ;;  %v4223_v26 = vmax.f32 %v3983_v42, %v3991_v19  ;;  %5651 = vmatpush1.bf16.msra.mxu0 %v10767_v63  ;;  %5844 = vmatpush1.bf16.msra.mxu1 %v10770_v7  ;;  %v10787_v63 = vld [vmem:[#allocation4 + $0x64] ss:$16 sps:$4 sm:$0xff]   ;;  %v10788_v12 = vld [vmem:[#allocation4 + $0x68] ss:$16 sps:$4 sm:$0xff]   ;;  %v10796_v17 = vld [vmem:[#allocation4 + $0x8c] ss:$16 sps:$4 sm:$0xff]  }
 0x36f   : > { %v4338_v30 = vmax.f32 %v4218_v20, %v4220_v48  ;;  %v4222_v31 = vmax.f32 %v3982_v52, %v3990_v21  ;;  %v4224_v32 = vmax.f32 %v3984_v46, %v3992_v22  ;;  %v2799_v33 = vpop.f32.mrb[24].mxu0  ;;  %v3152_v34 = vpop.f32.mrb[24].mxu1  ;;  %5652 = vmatprep.subr.bf16.mxu0 %v10775_v13  ;;  %5845 = vmatprep.subr.bf16.mxu1 %v10778_v15  ;;  %v10793_v16 = vld [vmem:[#allocation4 + $0x84] ss:$16 sps:$4 sm:$0xff]  }
 0x370   : > { %v4339_v37 = vmax.f32 %v4221_v25, %v4223_v26  ;;  %v2801_v38 = vpop.f32.mrb[25].mxu0  ;;  %v3154_v39 = vpop.f32.mrb[25].mxu1  ;;  %v12332_v41 = vadd.f32 %v12235_v57, %v2799_v33  ;;  %v12335_v42 = vadd.f32 %v12239_v59, %v3152_v34 }
 0x371   : > { %v4340_v40 = vmax.f32 %v4222_v31, %v4224_v32  ;;  %v2803_v43 = vpop.f32.mrb[26].mxu0  ;;  %v3156_v49 = vpop.f32.mrb[26].mxu1  ;;  %v12340_v51 = vadd.f32 %v12243_v47, %v2801_v38  ;;  %v12343_v52 = vadd.f32 %v12247_v60, %v3154_v39  ;;  %v10791_v31 = vld [vmem:[#allocation4 + $0x80] ss:$16 sps:$4 sm:$0xff]   ;;  %v10794_v38 = vld [vmem:[#allocation4 + $0x88] ss:$16 sps:$4 sm:$0xff]  }
 0x372   : > { %v12337_v50 = vpack.c.bf16 %v4339_v37, %v4337_v24  ;;  %v2805_v46 = vpop.f32.mrb[27].mxu0  ;;  %v3158_v56 = vpop.f32.mrb[27].mxu1  ;;  %5653 = vmatpush1.bf16.msra.mxu0 %v10773_v28  ;;  %5846 = vmatpush1.bf16.msra.mxu1 %v10776_v29  ;;  %v12348_v2 = vadd.f32 %v12235_v57, %v2803_v43  ;;  %v12351_v3 = vadd.f32 %v12239_v59, %v3156_v49  ;;  %v3993_v7 = vmax.f32 %v12332_v41, 0.0  ;;  %v10799_v43 = vld [vmem:[#allocation4 + $0xa4] ss:$16 sps:$4 sm:$0xff]  }
 0x373   : > { %v12345_v62 = vpack.c.bf16 %v4340_v40, %v4338_v30  ;;  %5654 = vmatprep.subr.bf16.mxu0 %v10781_v35  ;;  %5847 = vmatprep.subr.bf16.mxu1 %v10784_v36  ;;  %v12356_v4 = vadd.f32 %v12243_v47, %v2805_v46  ;;  %v12359_v5 = vadd.f32 %v12247_v60, %v3158_v56  ;;  %v3995_v8 = vmax.f32 %v12335_v42, 0.0  ;;  %v10802_v49 = vld [vmem:[#allocation4 + $0xac] ss:$16 sps:$4 sm:$0xff]  }
 0x374   : > { %4987 = vmatmul.mubr.bf16.gmra.mrb[132].mxu0 %v12303_v23  ;;  %5180 = vmatmul.mubr.bf16.gmra.mrb[132].mxu1 %v12303_v23  ;;  %v3994_v9 = vmax.f32 %v12340_v51, 0.0  ;;  %v3996_v11 = vmax.f32 %v12343_v52, 0.0  ;;  %v3997_v18 = vmax.f32 %v12348_v2, 0.0  ;;  %v3999_v19 = vmax.f32 %v12351_v3, 0.0 }
 0x375   : > { %4996 = vmatprep.mubr.bf16.mxu0 %v12345_v62  ;;  %5189 = vmatprep.mubr.bf16.mxu1 %v12345_v62  ;;  %v3998_v24 = vmax.f32 %v12356_v4, 0.0  ;;  %v4000_v25 = vmax.f32 %v12359_v5, 0.0  ;;  %v10797_v5 = vld [vmem:[#allocation4 + $0xa0] ss:$16 sps:$4 sm:$0xff]  }
 0x376   : > { %5655 = vmatpush1.bf16.msra.mxu0 %v10779_v58  ;;  %5848 = vmatpush1.bf16.msra.mxu1 %v10782_v61 }
 0x377   : > { %v2809_v13 = vpop.f32.mrb[28].mxu0  ;;  %v3162_v15 = vpop.f32.mrb[28].mxu1  ;;  %5656 = vmatprep.subr.bf16.mxu0 %v10787_v63  ;;  %5849 = vmatprep.subr.bf16.mxu1 %v10790_v1 }
 0x378   : > { %v3745_v20 = vadd.f32 %v12235_v57, %v2809_v13  ;;  %v3747_v48 = vadd.f32 %v12239_v59, %v3162_v15  ;;  %v2811_v21 = vpop.f32.mrb[29].mxu0  ;;  %v3164_v22 = vpop.f32.mrb[29].mxu1 }
 0x379   : > { %v3746_v26 = vadd.f32 %v12243_v47, %v2811_v21  ;;  %v3748_v28 = vadd.f32 %v12247_v60, %v3164_v22  ;;  %v2813_v29 = vpop.f32.mrb[30].mxu0  ;;  %v3166_v30 = vpop.f32.mrb[30].mxu1 }
 0x37a   : > { %v4001_v32 = vmax.f32 %v3745_v20, 0.0  ;;  %v4003_v33 = vmax.f32 %v3747_v48, 0.0  ;;  %v3749_v34 = vadd.f32 %v12235_v57, %v2813_v29  ;;  %v3751_v35 = vadd.f32 %v12239_v59, %v3166_v30  ;;  %v2815_v36 = vpop.f32.mrb[31].mxu0  ;;  %v3168_v37 = vpop.f32.mrb[31].mxu1  ;;  %5657 = vmatpush1.bf16.msra.mxu0 %v10785_v6  ;;  %5850 = vmatpush1.bf16.msra.mxu1 %v10788_v12  ;;  %v10800_v6 = vld [vmem:[#allocation4 + $0xa8] ss:$16 sps:$4 sm:$0xff]  }
 0x37b   : > { %v4002_v39 = vmax.f32 %v3746_v26, 0.0  ;;  %v4004_v40 = vmax.f32 %v3748_v28, 0.0  ;;  %v3750_v41 = vadd.f32 %v12243_v47, %v2815_v36  ;;  %v3752_v42 = vadd.f32 %v12247_v60, %v3168_v37  ;;  %5658 = vmatprep.subr.bf16.mxu0 %v10793_v16  ;;  %5851 = vmatprep.subr.bf16.mxu1 %v10796_v17 }
 0x37c   : > { %v4225_v51 = vmax.f32 %v3993_v7, %v4001_v32  ;;  %v4227_v52 = vmax.f32 %v3995_v8, %v4003_v33  ;;  %v4005_v46 = vmax.f32 %v3749_v34, 0.0  ;;  %v4007_v56 = vmax.f32 %v3751_v35, 0.0  ;;  %4997 = vmatmul.mubr.bf16.gmra.mrb[136].mxu0 %v12337_v50  ;;  %5190 = vmatmul.mubr.bf16.gmra.mrb[136].mxu1 %v12337_v50  ;;  %v10803_v32 = vld [vmem:[#allocation4 + $0xc0] ss:$16 sps:$4 sm:$0xff]   ;;  %v10806_v33 = vld [vmem:[#allocation4 + $0xc8] ss:$16 sps:$4 sm:$0xff]  }
 0x37d   : > { %v4226_v58 = vmax.f32 %v3994_v9, %v4002_v39  ;;  %v4228_v61 = vmax.f32 %v3996_v11, %v4004_v40  ;;  %v4006_v63 = vmax.f32 %v3750_v41, 0.0  ;;  %v4008_v1 = vmax.f32 %v3752_v42, 0.0  ;;  %v10808_v34 = vld [vmem:[#allocation4 + $0xcc] ss:$16 sps:$4 sm:$0xff]   ;;  %v10811_v41 = vld [vmem:[#allocation4 + $0xe4] ss:$16 sps:$4 sm:$0xff]  }
 0x37e   : > { %v4341_v2 = vmax.f32 %v4225_v51, %v4227_v52  ;;  %v4229_v3 = vmax.f32 %v3997_v18, %v4005_v46  ;;  %v4231_v4 = vmax.f32 %v3999_v19, %v4007_v56  ;;  %5659 = vmatpush1.bf16.msra.mxu0 %v10791_v31  ;;  %5852 = vmatpush1.bf16.msra.mxu1 %v10794_v38  ;;  %v10805_v31 = vld [vmem:[#allocation4 + $0xc4] ss:$16 sps:$4 sm:$0xff]   ;;  %v10814_v52 = vld [vmem:[#allocation4 + $0xec] ss:$16 sps:$4 sm:$0xff]  }
 0x37f   : > { %v4342_v12 = vmax.f32 %v4226_v58, %v4228_v61  ;;  %v4230_v7 = vmax.f32 %v3998_v24, %v4006_v63  ;;  %v4232_v8 = vmax.f32 %v4000_v25, %v4008_v1  ;;  %v2819_v13 = vpop.f32.mrb[32].mxu0  ;;  %v3172_v15 = vpop.f32.mrb[32].mxu1  ;;  %5660 = vmatprep.subr.bf16.mxu0 %v10799_v43  ;;  %5853 = vmatprep.subr.bf16.mxu1 %v10802_v49  ;;  %v10809_v63 = vld [vmem:[#allocation4 + $0xe0] ss:$16 sps:$4 sm:$0xff]   ;;  %v10812_v1 = vld [vmem:[#allocation4 + $0xe8] ss:$16 sps:$4 sm:$0xff]  }
 0x380   : > { %v4343_v16 = vmax.f32 %v4229_v3, %v4231_v4  ;;  %v2821_v17 = vpop.f32.mrb[33].mxu0  ;;  %v3174_v9 = vpop.f32.mrb[33].mxu1  ;;  %v12382_v20 = vadd.f32 %v12235_v57, %v2819_v13  ;;  %v12385_v18 = vadd.f32 %v12239_v59, %v3172_v15 }
 0x381   : > { %v4344_v11 = vmax.f32 %v4230_v7, %v4232_v8  ;;  %v2823_v19 = vpop.f32.mrb[34].mxu0  ;;  %v3176_v48 = vpop.f32.mrb[34].mxu1  ;;  %v12390_v22 = vadd.f32 %v12243_v47, %v2821_v17  ;;  %v12393_v24 = vadd.f32 %v12247_v60, %v3174_v9 }
 0x382   : > { %v12387_v21 = vpack.c.bf16 %v4343_v16, %v4341_v2  ;;  %v2825_v25 = vpop.f32.mrb[35].mxu0  ;;  %v3178_v26 = vpop.f32.mrb[35].mxu1  ;;  %5661 = vmatpush1.bf16.msra.mxu0 %v10797_v5  ;;  %5854 = vmatpush1.bf16.msra.mxu1 %v10800_v6  ;;  %v3757_v29 = vadd.f32 %v12235_v57, %v2823_v19  ;;  %v3759_v30 = vadd.f32 %v12239_v59, %v3176_v48  ;;  %v4009_v37 = vmax.f32 %v12382_v20, 0.0 }
 0x383   : > { %v12395_v28 = vpack.c.bf16 %v4344_v11, %v4342_v12  ;;  %v3758_v35 = vadd.f32 %v12243_v47, %v2825_v25  ;;  %v3760_v36 = vadd.f32 %v12247_v60, %v3178_v26  ;;  %v4011_v38 = vmax.f32 %v12385_v18, 0.0  ;;  %5662 = vmatprep.subr.bf16.mxu0 %v10805_v31  ;;  %5855 = vmatprep.subr.bf16.mxu1 %v10808_v34 }
 0x384   : > { %v4010_v39 = vmax.f32 %v12390_v22, 0.0  ;;  %v4012_v40 = vmax.f32 %v12393_v24, 0.0  ;;  %v4013_v42 = vmax.f32 %v3757_v29, 0.0  ;;  %v4015_v43 = vmax.f32 %v3759_v30, 0.0 }
 0x385   : > { %5006 = vmatprep.mubr.bf16.mxu0 %v12395_v28  ;;  %5199 = vmatprep.mubr.bf16.mxu1 %v12395_v28  ;;  %v4014_v2 = vmax.f32 %v3758_v35, 0.0  ;;  %v4016_v3 = vmax.f32 %v3760_v36, 0.0 }
 0x386   : > { %5007 = vmatmul.mubr.bf16.gmra.mrb[140].mxu0 %v12387_v21  ;;  %5200 = vmatmul.mubr.bf16.gmra.mrb[140].mxu1 %v12387_v21 }
 0x387   : > { %v2829_v49 = vpop.f32.mrb[36].mxu0  ;;  %v3182_v51 = vpop.f32.mrb[36].mxu1  ;;  %5663 = vmatpush1.bf16.msra.mxu0 %v10803_v32  ;;  %5856 = vmatpush1.bf16.msra.mxu1 %v10806_v33 }
 0x388   : > { %v3761_v46 = vadd.f32 %v12235_v57, %v2829_v49  ;;  %v3763_v56 = vadd.f32 %v12239_v59, %v3182_v51  ;;  %v2831_v58 = vpop.f32.mrb[37].mxu0  ;;  %v3184_v61 = vpop.f32.mrb[37].mxu1  ;;  %5664 = vmatprep.subr.bf16.mxu0 %v10811_v41  ;;  %5857 = vmatprep.subr.bf16.mxu1 %v10814_v52 }
 0x389   : > { %v3762_v4 = vadd.f32 %v12243_v47, %v2831_v58  ;;  %v3764_v5 = vadd.f32 %v12247_v60, %v3184_v61  ;;  %v2833_v6 = vpop.f32.mrb[38].mxu0  ;;  %v3186_v12 = vpop.f32.mrb[38].mxu1 }
 0x38a   : > { %v4017_v7 = vmax.f32 %v3761_v46, 0.0  ;;  %v4019_v8 = vmax.f32 %v3763_v56, 0.0  ;;  %v3765_v13 = vadd.f32 %v12235_v57, %v2833_v6  ;;  %v3767_v15 = vadd.f32 %v12239_v59, %v3186_v12  ;;  %v2835_v16 = vpop.f32.mrb[39].mxu0  ;;  %v3188_v17 = vpop.f32.mrb[39].mxu1  ;;  %v10818_v6 = vld [vmem:[#allocation4 + $0x108] ss:$16 sps:$4 sm:$0xff]  }
 0x38b   : > { %v4018_v9 = vmax.f32 %v3762_v4, 0.0  ;;  %v4020_v11 = vmax.f32 %v3764_v5, 0.0  ;;  %v3766_v20 = vadd.f32 %v12243_v47, %v2835_v16  ;;  %v3768_v18 = vadd.f32 %v12247_v60, %v3188_v17  ;;  %5665 = vmatpush1.bf16.msra.mxu0 %v10809_v63  ;;  %5858 = vmatpush1.bf16.msra.mxu1 %v10812_v1  ;;  %v10817_v4 = vld [vmem:[#allocation4 + $0x104] ss:$16 sps:$4 sm:$0xff]   ;;  %v10815_v5 = vld [vmem:[#allocation4 + $0x100] ss:$16 sps:$4 sm:$0xff]  }
 0x38c   : > { %v4233_v19 = vmax.f32 %v4009_v37, %v4017_v7  ;;  %v4235_v48 = vmax.f32 %v4011_v38, %v4019_v8  ;;  %v4021_v22 = vmax.f32 %v3765_v13, 0.0  ;;  %v4023_v24 = vmax.f32 %v3767_v15, 0.0  ;;  %v10820_v12 = vld [vmem:[#allocation4 + $0x10c] ss:$16 sps:$4 sm:$0xff]   ;;  %5666 = vmatprep.subr.bf16.mxu0 %v10817_v4 }
 0x38d   : > { %v4234_v25 = vmax.f32 %v4010_v39, %v4018_v9  ;;  %v4236_v26 = vmax.f32 %v4012_v40, %v4020_v11  ;;  %v4022_v29 = vmax.f32 %v3766_v20, 0.0  ;;  %v4024_v30 = vmax.f32 %v3768_v18, 0.0  ;;  %v10823_v9 = vld [vmem:[#allocation4 + $0x124] ss:$16 sps:$4 sm:$0xff]   ;;  %5859 = vmatprep.subr.bf16.mxu1 %v10820_v12 }
 0x38e   : > { %v4345_v31 = vmax.f32 %v4233_v19, %v4235_v48  ;;  %v4237_v32 = vmax.f32 %v4013_v42, %v4021_v22  ;;  %v4239_v33 = vmax.f32 %v4015_v43, %v4023_v24  ;;  %v10826_v48 = vld [vmem:[#allocation4 + $0x12c] ss:$16 sps:$4 sm:$0xff]  }
 0x38f   : > { %v4346_v34 = vmax.f32 %v4234_v25, %v4236_v26  ;;  %v4238_v35 = vmax.f32 %v4014_v2, %v4022_v29  ;;  %v4240_v36 = vmax.f32 %v4016_v3, %v4024_v30  ;;  %v2839_v41 = vpop.f32.mrb[40].mxu0  ;;  %v3192_v49 = vpop.f32.mrb[40].mxu1  ;;  %5667 = vmatpush1.bf16.msra.mxu0 %v10815_v5  ;;  %5860 = vmatpush1.bf16.msra.mxu1 %v10818_v6  ;;  %v10821_v29 = vld [vmem:[#allocation4 + $0x120] ss:$16 sps:$4 sm:$0xff]   ;;  %v10824_v30 = vld [vmem:[#allocation4 + $0x128] ss:$16 sps:$4 sm:$0xff]  }
 0x390   : > { %v4347_v51 = vmax.f32 %v4237_v32, %v4239_v33  ;;  %v2841_v52 = vpop.f32.mrb[41].mxu0  ;;  %v3194_v37 = vpop.f32.mrb[41].mxu1  ;;  %v3769_v46 = vadd.f32 %v12235_v57, %v2839_v41  ;;  %v3771_v40 = vadd.f32 %v12239_v59, %v3192_v49  ;;  %5668 = vmatprep.subr.bf16.mxu0 %v10823_v9  ;;  %5861 = vmatprep.subr.bf16.mxu1 %v10826_v48 }
 0x391   : > { %v4348_v38 = vmax.f32 %v4238_v35, %v4240_v36  ;;  %v2843_v56 = vpop.f32.mrb[42].mxu0  ;;  %v3196_v58 = vpop.f32.mrb[42].mxu1  ;;  %v3770_v42 = vadd.f32 %v12243_v47, %v2841_v52  ;;  %v3772_v43 = vadd.f32 %v12247_v60, %v3194_v37 }
 0x392   : > { %v12418_v39 = vpack.c.bf16 %v4347_v51, %v4345_v31  ;;  %v2845_v61 = vpop.f32.mrb[43].mxu0  ;;  %v3198_v63 = vpop.f32.mrb[43].mxu1  ;;  %v3773_v2 = vadd.f32 %v12235_v57, %v2843_v56  ;;  %v3775_v3 = vadd.f32 %v12239_v59, %v3196_v58  ;;  %v4025_v13 = vmax.f32 %v3769_v46, 0.0 }
 0x393   : > { %v12423_v1 = vpack.c.bf16 %v4348_v38, %v4346_v34  ;;  %v3774_v7 = vadd.f32 %v12243_v47, %v2845_v61  ;;  %v3776_v8 = vadd.f32 %v12247_v60, %v3198_v63  ;;  %v4027_v15 = vmax.f32 %v3771_v40, 0.0  ;;  %5669 = vmatpush1.bf16.msra.mxu0 %v10821_v29  ;;  %5862 = vmatpush1.bf16.msra.mxu1 %v10824_v30 }
 0x394   : > { %v4026_v16 = vmax.f32 %v3770_v42, 0.0  ;;  %v4028_v17 = vmax.f32 %v3772_v43, 0.0  ;;  %v4029_v11 = vmax.f32 %v3773_v2, 0.0  ;;  %v4031_v20 = vmax.f32 %v3775_v3, 0.0 }
 0x395   : > { %5016 = vmatprep.mubr.bf16.mxu0 %v12423_v1  ;;  %5209 = vmatprep.mubr.bf16.mxu1 %v12423_v1  ;;  %v4030_v31 = vmax.f32 %v3774_v7, 0.0  ;;  %v4032_v32 = vmax.f32 %v3776_v8, 0.0 }
 0x396   : > { %5017 = vmatmul.mubr.bf16.gmra.mrb[144].mxu0 %v12418_v39  ;;  %5210 = vmatmul.mubr.bf16.gmra.mrb[144].mxu1 %v12418_v39 }
 0x397   : > { %v2849_v18 = vpop.f32.mrb[44].mxu0  ;;  %v3202_v19 = vpop.f32.mrb[44].mxu1 }
 0x398   : > { %v3777_v22 = vadd.f32 %v12235_v57, %v2849_v18  ;;  %v3779_v24 = vadd.f32 %v12239_v59, %v3202_v19  ;;  %v2851_v25 = vpop.f32.mrb[45].mxu0  ;;  %v3204_v26 = vpop.f32.mrb[45].mxu1 }
 0x399   : > { %v3778_v33 = vadd.f32 %v12243_v47, %v2851_v25  ;;  %v3780_v34 = vadd.f32 %v12247_v60, %v3204_v26  ;;  %v2853_v35 = vpop.f32.mrb[46].mxu0  ;;  %v3206_v36 = vpop.f32.mrb[46].mxu1 }
 0x39a   : > { %v4033_v41 = vmax.f32 %v3777_v22, 0.0  ;;  %v4035_v49 = vmax.f32 %v3779_v24, 0.0  ;;  %v3781_v51 = vadd.f32 %v12235_v57, %v2853_v35  ;;  %v3783_v52 = vadd.f32 %v12239_v59, %v3206_v36  ;;  %v2855_v37 = vpop.f32.mrb[47].mxu0  ;;  %v3208_v38 = vpop.f32.mrb[47].mxu1  ;;  %v10829_v35 = vld [vmem:[#allocation4 + $0x144] ss:$16 sps:$4 sm:$0xff]  }
 0x39b   : > { %v4034_v46 = vmax.f32 %v3778_v33, 0.0  ;;  %v4036_v56 = vmax.f32 %v3780_v34, 0.0  ;;  %v3782_v58 = vadd.f32 %v12243_v47, %v2855_v37  ;;  %v3784_v40 = vadd.f32 %v12247_v60, %v3208_v38  ;;  %v10827_v36 = vld [vmem:[#allocation4 + $0x140] ss:$16 sps:$4 sm:$0xff]   ;;  %5670 = vmatprep.subr.bf16.mxu0 %v10829_v35 }
 0x39c   : > { %v4241_v42 = vmax.f32 %v4025_v13, %v4033_v41  ;;  %v4243_v43 = vmax.f32 %v4027_v15, %v4035_v49  ;;  %v4037_v61 = vmax.f32 %v3781_v51, 0.0  ;;  %v4039_v63 = vmax.f32 %v3783_v52, 0.0  ;;  %v10830_v41 = vld [vmem:[#allocation4 + $0x148] ss:$16 sps:$4 sm:$0xff]   ;;  %v10832_v49 = vld [vmem:[#allocation4 + $0x14c] ss:$16 sps:$4 sm:$0xff]   ;;  %5671 = vmatpush1.bf16.msra.mxu0 %v10827_v36 }
 0x39d   : > { %v4242_v2 = vmax.f32 %v4026_v16, %v4034_v46  ;;  %v4244_v3 = vmax.f32 %v4028_v17, %v4036_v56  ;;  %v4038_v4 = vmax.f32 %v3782_v58, 0.0  ;;  %v4040_v5 = vmax.f32 %v3784_v40, 0.0  ;;  %v10835_v58 = vld [vmem:[#allocation4 + $0x164] ss:$16 sps:$4 sm:$0xff]   ;;  %5863 = vmatprep.subr.bf16.mxu1 %v10832_v49 }
 0x39e   : > { %v4349_v6 = vmax.f32 %v4241_v42, %v4243_v43  ;;  %v4245_v12 = vmax.f32 %v4029_v11, %v4037_v61  ;;  %v4247_v7 = vmax.f32 %v4031_v20, %v4039_v63  ;;  %v10838_v63 = vld [vmem:[#allocation4 + $0x16c] ss:$16 sps:$4 sm:$0xff]   ;;  %5864 = vmatpush1.bf16.msra.mxu1 %v10830_v41  ;;  %5672 = vmatprep.subr.bf16.mxu0 %v10835_v58 }
 0x39f   : > { %v4350_v8 = vmax.f32 %v4242_v2, %v4244_v3  ;;  %v4246_v9 = vmax.f32 %v4030_v31, %v4038_v4  ;;  %v4248_v18 = vmax.f32 %v4032_v32, %v4040_v5  ;;  %v2859_v19 = vpop.f32.mrb[48].mxu0  ;;  %v3212_v48 = vpop.f32.mrb[48].mxu1  ;;  %5865 = vmatprep.subr.bf16.mxu1 %v10838_v63 }
 0x3a0   : > { %v4351_v22 = vmax.f32 %v4245_v12, %v4247_v7  ;;  %v2861_v24 = vpop.f32.mrb[49].mxu0  ;;  %v3214_v13 = vpop.f32.mrb[49].mxu1  ;;  %v3785_v25 = vadd.f32 %v12235_v57, %v2859_v19  ;;  %v3787_v17 = vadd.f32 %v12239_v59, %v3212_v48  ;;  %v10836_v12 = vld [vmem:[#allocation4 + $0x168] ss:$16 sps:$4 sm:$0xff]  }
 0x3a1   : > { %v4352_v15 = vmax.f32 %v4246_v9, %v4248_v18  ;;  %v2863_v26 = vpop.f32.mrb[50].mxu0  ;;  %v3216_v29 = vpop.f32.mrb[50].mxu1  ;;  %v3786_v11 = vadd.f32 %v12243_v47, %v2861_v24  ;;  %v3788_v20 = vadd.f32 %v12247_v60, %v3214_v13 }
 0x3a2   : > { %v12442_v16 = vpack.c.bf16 %v4351_v22, %v4349_v6  ;;  %v2865_v30 = vpop.f32.mrb[51].mxu0  ;;  %v3218_v31 = vpop.f32.mrb[51].mxu1  ;;  %v3789_v33 = vadd.f32 %v12235_v57, %v2863_v26  ;;  %v3791_v34 = vadd.f32 %v12239_v59, %v3216_v29  ;;  %v4041_v37 = vmax.f32 %v3785_v25, 0.0  ;;  %v10833_v6 = vld [vmem:[#allocation4 + $0x160] ss:$16 sps:$4 sm:$0xff]   ;;  %5866 = vmatpush1.bf16.msra.mxu1 %v10836_v12 }
 0x3a3   : > { %v12447_v32 = vpack.c.bf16 %v4352_v15, %v4350_v8  ;;  %v3790_v51 = vadd.f32 %v12243_v47, %v2865_v30  ;;  %v3792_v52 = vadd.f32 %v12247_v60, %v3218_v31  ;;  %v4043_v38 = vmax.f32 %v3787_v17, 0.0  ;;  %5673 = vmatpush1.bf16.msra.mxu0 %v10833_v6 }
 0x3a4   : > { %v4042_v46 = vmax.f32 %v3786_v11, 0.0  ;;  %v4044_v56 = vmax.f32 %v3788_v20, 0.0  ;;  %v4045_v40 = vmax.f32 %v3789_v33, 0.0  ;;  %v4047_v42 = vmax.f32 %v3791_v34, 0.0 }
 0x3a5   : > { %5026 = vmatprep.mubr.bf16.mxu0 %v12447_v32  ;;  %5219 = vmatprep.mubr.bf16.mxu1 %v12447_v32  ;;  %v4046_v7 = vmax.f32 %v3790_v51, 0.0  ;;  %v4048_v8 = vmax.f32 %v3792_v52, 0.0 }
 0x3a6   : > { %5027 = vmatmul.mubr.bf16.gmra.mrb[148].mxu0 %v12442_v16  ;;  %5220 = vmatmul.mubr.bf16.gmra.mrb[148].mxu1 %v12442_v16 }
 0x3a7   : > { %v2869_v43 = vpop.f32.mrb[52].mxu0  ;;  %v3222_v61 = vpop.f32.mrb[52].mxu1 }
 0x3a8   : > { %v3793_v2 = vadd.f32 %v12235_v57, %v2869_v43  ;;  %v3795_v3 = vadd.f32 %v12239_v59, %v3222_v61  ;;  %v2871_v4 = vpop.f32.mrb[53].mxu0  ;;  %v3224_v5 = vpop.f32.mrb[53].mxu1 }
 0x3a9   : > { %v3794_v9 = vadd.f32 %v12243_v47, %v2871_v4  ;;  %v3796_v18 = vadd.f32 %v12247_v60, %v3224_v5  ;;  %v2873_v19 = vpop.f32.mrb[54].mxu0  ;;  %v3226_v48 = vpop.f32.mrb[54].mxu1 }
 0x3aa   : > { %v4049_v22 = vmax.f32 %v3793_v2, 0.0  ;;  %v4051_v24 = vmax.f32 %v3795_v3, 0.0  ;;  %v3797_v13 = vadd.f32 %v12235_v57, %v2873_v19  ;;  %v3799_v15 = vadd.f32 %v12239_v59, %v3226_v48  ;;  %v2875_v25 = vpop.f32.mrb[55].mxu0  ;;  %v3228_v26 = vpop.f32.mrb[55].mxu1 }
 0x3ab   : > { %v4050_v29 = vmax.f32 %v3794_v9, 0.0  ;;  %v4052_v17 = vmax.f32 %v3796_v18, 0.0  ;;  %v3798_v11 = vadd.f32 %v12243_v47, %v2875_v25  ;;  %v3800_v20 = vadd.f32 %v12247_v60, %v3228_v26 }
 0x3ac   : > { %v4249_v30 = vmax.f32 %v4041_v37, %v4049_v22  ;;  %v4251_v31 = vmax.f32 %v4043_v38, %v4051_v24  ;;  %v4053_v33 = vmax.f32 %v3797_v13, 0.0  ;;  %v4055_v34 = vmax.f32 %v3799_v15, 0.0  ;;  %v10841_v22 = vld [vmem:[#allocation4 + $0x184] ss:$16 sps:$4 sm:$0xff]   ;;  %v10839_v24 = vld [vmem:[#allocation4 + $0x180] ss:$16 sps:$4 sm:$0xff]  }
 0x3ad   : > { %v4250_v35 = vmax.f32 %v4042_v46, %v4050_v29  ;;  %v4252_v36 = vmax.f32 %v4044_v56, %v4052_v17  ;;  %v4054_v41 = vmax.f32 %v3798_v11, 0.0  ;;  %v4056_v49 = vmax.f32 %v3800_v20, 0.0  ;;  %v10842_v13 = vld [vmem:[#allocation4 + $0x188] ss:$16 sps:$4 sm:$0xff]   ;;  %v10844_v15 = vld [vmem:[#allocation4 + $0x18c] ss:$16 sps:$4 sm:$0xff]   ;;  %5674 = vmatprep.subr.bf16.mxu0 %v10841_v22 }
 0x3ae   : > { %v4353_v51 = vmax.f32 %v4249_v30, %v4251_v31  ;;  %v4253_v52 = vmax.f32 %v4045_v40, %v4053_v33  ;;  %v4255_v58 = vmax.f32 %v4047_v42, %v4055_v34  ;;  %v10847_v30 = vld [vmem:[#allocation4 + $0x1a4] ss:$16 sps:$4 sm:$0xff]   ;;  %5867 = vmatprep.subr.bf16.mxu1 %v10844_v15  ;;  %5675 = vmatpush1.bf16.msra.mxu0 %v10839_v24 }
 0x3af   : > { %v4354_v43 = vmax.f32 %v4250_v35, %v4252_v36  ;;  %v4254_v61 = vmax.f32 %v4046_v7, %v4054_v41  ;;  %v4256_v63 = vmax.f32 %v4048_v8, %v4056_v49  ;;  %v2879_v2 = vpop.f32.mrb[56].mxu0  ;;  %v3232_v3 = vpop.f32.mrb[56].mxu1  ;;  %v10850_v36 = vld [vmem:[#allocation4 + $0x1ac] ss:$16 sps:$4 sm:$0xff]   ;;  %5868 = vmatpush1.bf16.msra.mxu1 %v10842_v13  ;;  %5676 = vmatprep.subr.bf16.mxu0 %v10847_v30 }
 0x3b0   : > { %v4355_v4 = vmax.f32 %v4253_v52, %v4255_v58  ;;  %v2881_v5 = vpop.f32.mrb[57].mxu0  ;;  %v3234_v37 = vpop.f32.mrb[57].mxu1  ;;  %v3801_v9 = vadd.f32 %v12235_v57, %v2879_v2  ;;  %v3803_v56 = vadd.f32 %v12239_v59, %v3232_v3  ;;  %v10845_v58 = vld [vmem:[#allocation4 + $0x1a0] ss:$16 sps:$4 sm:$0xff]   ;;  %5869 = vmatprep.subr.bf16.mxu1 %v10850_v36 }
 0x3b1   : > { %v4356_v38 = vmax.f32 %v4254_v61, %v4256_v63  ;;  %v2883_v6 = vpop.f32.mrb[58].mxu0  ;;  %v3236_v12 = vpop.f32.mrb[58].mxu1  ;;  %v3802_v40 = vadd.f32 %v12243_v47, %v2881_v5  ;;  %v3804_v42 = vadd.f32 %v12247_v60, %v3234_v37 }
 0x3b2   : > { %v12466_v46 = vpack.c.bf16 %v4355_v4, %v4353_v51  ;;  %v2885_v7 = vpop.f32.mrb[59].mxu0  ;;  %v3238_v8 = vpop.f32.mrb[59].mxu1  ;;  %v3805_v19 = vadd.f32 %v12235_v57, %v2883_v6  ;;  %v3807_v48 = vadd.f32 %v12239_v59, %v3236_v12  ;;  %v4057_v29 = vmax.f32 %v3801_v9, 0.0  ;;  %5677 = vmatpush1.bf16.msra.mxu0 %v10845_v58 }
 0x3b3   : > { %v12471_v18 = vpack.c.bf16 %v4356_v38, %v4354_v43  ;;  %v3806_v25 = vadd.f32 %v12243_v47, %v2885_v7  ;;  %v3808_v26 = vadd.f32 %v12247_v60, %v3238_v8  ;;  %v4059_v17 = vmax.f32 %v3803_v56, 0.0  ;;  %v10848_v43 = vld [vmem:[#allocation4 + $0x1a8] ss:$16 sps:$4 sm:$0xff]  }
 0x3b4   : > { %v4058_v11 = vmax.f32 %v3802_v40, 0.0  ;;  %v4060_v20 = vmax.f32 %v3804_v42, 0.0  ;;  %v4061_v31 = vmax.f32 %v3805_v19, 0.0  ;;  %v4063_v33 = vmax.f32 %v3807_v48, 0.0  ;;  %5870 = vmatpush1.bf16.msra.mxu1 %v10848_v43 }
 0x3b5   : > { %5036 = vmatprep.mubr.bf16.mxu0 %v12471_v18  ;;  %5229 = vmatprep.mubr.bf16.mxu1 %v12471_v18  ;;  %v4062_v61 = vmax.f32 %v3806_v25, 0.0  ;;  %v4064_v63 = vmax.f32 %v3808_v26, 0.0 }
 0x3b6   : > { %5037 = vmatmul.mubr.bf16.gmra.mrb[152].mxu0 %v12466_v46  ;;  %5230 = vmatmul.mubr.bf16.gmra.mrb[152].mxu1 %v12466_v46 }
 0x3b7   : > { %v2889_v34 = vpop.f32.mrb[60].mxu0  ;;  %v3242_v35 = vpop.f32.mrb[60].mxu1 }
 0x3b8   : > { %v3809_v41 = vadd.f32 %v12235_v57, %v2889_v34  ;;  %v3811_v49 = vadd.f32 %v12239_v59, %v3242_v35  ;;  %v2891_v51 = vpop.f32.mrb[61].mxu0  ;;  %v3244_v52 = vpop.f32.mrb[61].mxu1 }
 0x3b9   : > { %v3810_v2 = vadd.f32 %v12243_v47, %v2891_v51  ;;  %v3812_v3 = vadd.f32 %v12247_v60, %v3244_v52  ;;  %v2893_v4 = vpop.f32.mrb[62].mxu0  ;;  %v3246_v5 = vpop.f32.mrb[62].mxu1 }
 0x3ba   : > { %v4065_v37 = vmax.f32 %v3809_v41, 0.0  ;;  %v4067_v38 = vmax.f32 %v3811_v49, 0.0  ;;  %v3813_v9 = vadd.f32 %v12235_v57, %v2893_v4  ;;  %v3815_v6 = vadd.f32 %v12239_v59, %v3246_v5  ;;  %v2895_v12 = vpop.f32.mrb[63].mxu0  ;;  %v3248_v56 = vpop.f32.mrb[63].mxu1 }
 0x3bb   : > { %v4066_v40 = vmax.f32 %v3810_v2, 0.0  ;;  %v4068_v42 = vmax.f32 %v3812_v3, 0.0  ;;  %v3814_v7 = vadd.f32 %v12243_v47, %v2895_v12  ;;  %v3816_v8 = vadd.f32 %v12247_v60, %v3248_v56  ;;  %v10854_v12 = vld [vmem:[#allocation4 + $0x1c8] ss:$16 sps:$4 sm:$0xff]   ;;  %v10856_v56 = vld [vmem:[#allocation4 + $0x1cc] ss:$16 sps:$4 sm:$0xff]  }
 0x3bc   : > { %v4257_v19 = vmax.f32 %v4057_v29, %v4065_v37  ;;  %v4259_v48 = vmax.f32 %v4059_v17, %v4067_v38  ;;  %v4069_v22 = vmax.f32 %v3813_v9, 0.0  ;;  %v4071_v24 = vmax.f32 %v3815_v6, 0.0  ;;  %v10853_v9 = vld [vmem:[#allocation4 + $0x1c4] ss:$16 sps:$4 sm:$0xff]   ;;  %v10851_v6 = vld [vmem:[#allocation4 + $0x1c0] ss:$16 sps:$4 sm:$0xff]   ;;  %5871 = vmatprep.subr.bf16.mxu1 %v10856_v56 }
 0x3bd   : > { %v4258_v13 = vmax.f32 %v4058_v11, %v4066_v40  ;;  %v4260_v15 = vmax.f32 %v4060_v20, %v4068_v42  ;;  %v4070_v25 = vmax.f32 %v3814_v7, 0.0  ;;  %v4072_v26 = vmax.f32 %v3816_v8, 0.0  ;;  %5678 = vmatprep.subr.bf16.mxu0 %v10853_v9  ;;  %5872 = vmatpush1.bf16.msra.mxu1 %v10854_v12 }
 0x3be   : > { %v4357_v30 = vmax.f32 %v4257_v19, %v4259_v48  ;;  %v4261_v34 = vmax.f32 %v4061_v31, %v4069_v22  ;;  %v4263_v35 = vmax.f32 %v4063_v33, %v4071_v24  ;;  %v10859_v22 = vld [vmem:[#allocation4 + $0x1e4] ss:$16 sps:$4 sm:$0xff]   ;;  %5679 = vmatpush1.bf16.msra.mxu0 %v10851_v6 }
 0x3bf   : > { %v4358_v36 = vmax.f32 %v4258_v13, %v4260_v15  ;;  %v4262_v41 = vmax.f32 %v4062_v61, %v4070_v25  ;;  %v4264_v49 = vmax.f32 %v4064_v63, %v4072_v26  ;;  %v2899_v51 = vpop.f32.mrb[64].mxu0  ;;  %v3252_v52 = vpop.f32.mrb[64].mxu1  ;;  %v10862_v26 = vld [vmem:[#allocation4 + $0x1ec] ss:$16 sps:$4 sm:$0xff]   ;;  %5680 = vmatprep.subr.bf16.mxu0 %v10859_v22 }
 0x3c0   : > { %v4359_v2 = vmax.f32 %v4261_v34, %v4263_v35  ;;  %v2901_v3 = vpop.f32.mrb[65].mxu0  ;;  %v3254_v29 = vpop.f32.mrb[65].mxu1  ;;  %v3817_v4 = vadd.f32 %v12235_v57, %v2899_v51  ;;  %v3819_v20 = vadd.f32 %v12239_v59, %v3252_v52  ;;  %5873 = vmatprep.subr.bf16.mxu1 %v10862_v26 }
 0x3c1   : > { %v4360_v17 = vmax.f32 %v4262_v41, %v4264_v49  ;;  %v2903_v58 = vpop.f32.mrb[66].mxu0  ;;  %v3256_v43 = vpop.f32.mrb[66].mxu1  ;;  %v3818_v31 = vadd.f32 %v12243_v47, %v2901_v3  ;;  %v3820_v33 = vadd.f32 %v12247_v60, %v3254_v29  ;;  %v10857_v41 = vld [vmem:[#allocation4 + $0x1e0] ss:$16 sps:$4 sm:$0xff]   ;;  %v10860_v49 = vld [vmem:[#allocation4 + $0x1e8] ss:$16 sps:$4 sm:$0xff]  }
 0x3c2   : > { %v12490_v11 = vpack.c.bf16 %v4359_v2, %v4357_v30  ;;  %v2905_v61 = vpop.f32.mrb[67].mxu0  ;;  %v3258_v63 = vpop.f32.mrb[67].mxu1  ;;  %v3821_v37 = vadd.f32 %v12235_v57, %v2903_v58  ;;  %v3823_v38 = vadd.f32 %v12239_v59, %v3256_v43  ;;  %v4073_v7 = vmax.f32 %v3817_v4, 0.0  ;;  %5681 = vmatpush1.bf16.msra.mxu0 %v10857_v41  ;;  %5874 = vmatpush1.bf16.msra.mxu1 %v10860_v49 }
 0x3c3   : > { %v12495_v5 = vpack.c.bf16 %v4360_v17, %v4358_v36  ;;  %v3822_v40 = vadd.f32 %v12243_v47, %v2905_v61  ;;  %v3824_v42 = vadd.f32 %v12247_v60, %v3258_v63  ;;  %v4075_v8 = vmax.f32 %v3819_v20, 0.0 }
 0x3c4   : > { %v4074_v19 = vmax.f32 %v3818_v31, 0.0  ;;  %v4076_v48 = vmax.f32 %v3820_v33, 0.0  ;;  %v4077_v24 = vmax.f32 %v3821_v37, 0.0  ;;  %v4079_v13 = vmax.f32 %v3823_v38, 0.0 }
 0x3c5   : > { %5046 = vmatprep.mubr.bf16.mxu0 %v12495_v5  ;;  %5239 = vmatprep.mubr.bf16.mxu1 %v12495_v5  ;;  %v4078_v51 = vmax.f32 %v3822_v40, 0.0  ;;  %v4080_v52 = vmax.f32 %v3824_v42, 0.0 }
 0x3c6   : > { %5047 = vmatmul.mubr.bf16.gmra.mrb[156].mxu0 %v12490_v11  ;;  %5240 = vmatmul.mubr.bf16.gmra.mrb[156].mxu1 %v12490_v11 }
 0x3c7   : > { %v2909_v15 = vpop.f32.mrb[68].mxu0  ;;  %v3262_v25 = vpop.f32.mrb[68].mxu1 }
 0x3c8   : > { %v3825_v30 = vadd.f32 %v12235_v57, %v2909_v15  ;;  %v3827_v34 = vadd.f32 %v12239_v59, %v3262_v25  ;;  %v2911_v35 = vpop.f32.mrb[69].mxu0  ;;  %v3264_v36 = vpop.f32.mrb[69].mxu1 }
 0x3c9   : > { %v3826_v2 = vadd.f32 %v12243_v47, %v2911_v35  ;;  %v3828_v3 = vadd.f32 %v12247_v60, %v3264_v36  ;;  %v2913_v29 = vpop.f32.mrb[70].mxu0  ;;  %v3266_v17 = vpop.f32.mrb[70].mxu1 }
 0x3ca   : > { %v4081_v4 = vmax.f32 %v3825_v30, 0.0  ;;  %v4083_v58 = vmax.f32 %v3827_v34, 0.0  ;;  %v3829_v43 = vadd.f32 %v12235_v57, %v2913_v29  ;;  %v3831_v20 = vadd.f32 %v12239_v59, %v3266_v17  ;;  %v2915_v31 = vpop.f32.mrb[71].mxu0  ;;  %v3268_v33 = vpop.f32.mrb[71].mxu1  ;;  %v10865_v34 = vld [vmem:[#allocation4 + $0x404] ss:$16 sps:$4 sm:$0xff]  }
 0x3cb   : > { %v4082_v61 = vmax.f32 %v3826_v2, 0.0  ;;  %v4084_v63 = vmax.f32 %v3828_v3, 0.0  ;;  %v3830_v37 = vadd.f32 %v12243_v47, %v2915_v31  ;;  %v3832_v38 = vadd.f32 %v12247_v60, %v3268_v33  ;;  %v10868_v17 = vld [vmem:[#allocation4 + $0x40c] ss:$16 sps:$4 sm:$0xff]   ;;  %6453 = vmatprep.subr.bf16.mxu0 %v10865_v34 }
 0x3cc   : > { %v4265_v9 = vmax.f32 %v4073_v7, %v4081_v4  ;;  %v4267_v6 = vmax.f32 %v4075_v8, %v4083_v58  ;;  %v4085_v12 = vmax.f32 %v3829_v43, 0.0  ;;  %v4087_v56 = vmax.f32 %v3831_v20, 0.0  ;;  %6646 = vmatprep.subr.bf16.mxu1 %v10868_v17 }
 0x3cd   : > { %v4266_v40 = vmax.f32 %v4074_v19, %v4082_v61  ;;  %v4268_v42 = vmax.f32 %v4076_v48, %v4084_v63  ;;  %v4086_v22 = vmax.f32 %v3830_v37, 0.0  ;;  %v4088_v15 = vmax.f32 %v3832_v38, 0.0 }
 0x3ce   : > { %v4361_v25 = vmax.f32 %v4265_v9, %v4267_v6  ;;  %v4269_v26 = vmax.f32 %v4077_v24, %v4085_v12  ;;  %v4271_v30 = vmax.f32 %v4079_v13, %v4087_v56 }
 0x3cf   : > { %v4362_v35 = vmax.f32 %v4266_v40, %v4268_v42  ;;  %v4270_v36 = vmax.f32 %v4078_v51, %v4086_v22  ;;  %v4272_v2 = vmax.f32 %v4080_v52, %v4088_v15  ;;  %v2919_v3 = vpop.f32.mrb[72].mxu0  ;;  %v3272_v29 = vpop.f32.mrb[72].mxu1 }
 0x3d0   : > { %v4363_v7 = vmax.f32 %v4269_v26, %v4271_v30  ;;  %v2921_v8 = vpop.f32.mrb[73].mxu0  ;;  %v3274_v4 = vpop.f32.mrb[73].mxu1  ;;  %v3833_v24 = vadd.f32 %v12235_v57, %v2919_v3  ;;  %v3835_v51 = vadd.f32 %v12239_v59, %v3272_v29 }
 0x3d1   : > { %v4364_v41 = vmax.f32 %v4270_v36, %v4272_v2  ;;  %v2923_v49 = vpop.f32.mrb[74].mxu0  ;;  %v3276_v19 = vpop.f32.mrb[74].mxu1  ;;  %v3834_v52 = vadd.f32 %v12243_v47, %v2921_v8  ;;  %v3836_v20 = vadd.f32 %v12247_v60, %v3274_v4 }
 0x3d2   : > { %v12513_v48 = vpack.c.bf16 %v4363_v7, %v4361_v25  ;;  %v2925_v13 = vpop.f32.mrb[75].mxu0  ;;  %v3278_v58 = vpop.f32.mrb[75].mxu1  ;;  %v3837_v31 = vadd.f32 %v12235_v57, %v2923_v49  ;;  %v3839_v33 = vadd.f32 %v12239_v59, %v3276_v19  ;;  %v4089_v37 = vmax.f32 %v3833_v24, 0.0 }
 0x3d3   : > { %v12516_v43 = vpack.c.bf16 %v4364_v41, %v4362_v35  ;;  %v3838_v61 = vadd.f32 %v12243_v47, %v2925_v13  ;;  %v3840_v63 = vadd.f32 %v12247_v60, %v3278_v58  ;;  %v4091_v38 = vmax.f32 %v3835_v51, 0.0 }
 0x3d4   : > { %v4090_v9 = vmax.f32 %v3834_v52, 0.0  ;;  %v4092_v6 = vmax.f32 %v3836_v20, 0.0  ;;  %v4093_v40 = vmax.f32 %v3837_v31, 0.0  ;;  %v4095_v42 = vmax.f32 %v3839_v33, 0.0 }
 0x3d5   : > { %5056 = vmatprep.mubr.bf16.mxu0 %v12516_v43  ;;  %5249 = vmatprep.mubr.bf16.mxu1 %v12516_v43  ;;  %v4094_v30 = vmax.f32 %v3838_v61, 0.0  ;;  %v4096_v34 = vmax.f32 %v3840_v63, 0.0 }
 0x3d6   : > { %5057 = vmatmul.mubr.bf16.gmra.mrb[160].mxu0 %v12513_v48  ;;  %5250 = vmatmul.mubr.bf16.gmra.mrb[160].mxu1 %v12513_v48 }
 0x3d7   : > { %v2929_v12 = vpop.f32.mrb[76].mxu0  ;;  %v3282_v56 = vpop.f32.mrb[76].mxu1 }
 0x3d8   : > { %v3841_v22 = vadd.f32 %v12235_v57, %v2929_v12  ;;  %v3843_v15 = vadd.f32 %v12239_v59, %v3282_v56  ;;  %v2931_v25 = vpop.f32.mrb[77].mxu0  ;;  %v3284_v26 = vpop.f32.mrb[77].mxu1 }
 0x3d9   : > { %v3842_v35 = vadd.f32 %v12243_v47, %v2931_v25  ;;  %v3844_v36 = vadd.f32 %v12247_v60, %v3284_v26  ;;  %v2933_v2 = vpop.f32.mrb[78].mxu0  ;;  %v3286_v3 = vpop.f32.mrb[78].mxu1 }
 0x3da   : > { %v4097_v29 = vmax.f32 %v3841_v22, 0.0  ;;  %v4099_v17 = vmax.f32 %v3843_v15, 0.0  ;;  %v3845_v7 = vadd.f32 %v12235_v57, %v2933_v2  ;;  %v3847_v8 = vadd.f32 %v12239_v59, %v3286_v3  ;;  %v2935_v4 = vpop.f32.mrb[79].mxu0  ;;  %v3288_v41 = vpop.f32.mrb[79].mxu1 }
 0x3db   : > { %v4098_v49 = vmax.f32 %v3842_v35, 0.0  ;;  %v4100_v19 = vmax.f32 %v3844_v36, 0.0  ;;  %v3846_v24 = vadd.f32 %v12243_v47, %v2935_v4  ;;  %v3848_v13 = vadd.f32 %v12247_v60, %v3288_v41 }
 0x3dc   : > { %v4273_v58 = vmax.f32 %v4089_v37, %v4097_v29  ;;  %v4275_v51 = vmax.f32 %v4091_v38, %v4099_v17  ;;  %v4101_v52 = vmax.f32 %v3845_v7, 0.0  ;;  %v4103_v20 = vmax.f32 %v3847_v8, 0.0 }
 0x3dd   : > { %v4274_v31 = vmax.f32 %v4090_v9, %v4098_v49  ;;  %v4276_v33 = vmax.f32 %v4092_v6, %v4100_v19  ;;  %v4102_v61 = vmax.f32 %v3846_v24, 0.0  ;;  %v4104_v63 = vmax.f32 %v3848_v13, 0.0 }
 0x3de   : > { %v4365_v12 = vmax.f32 %v4273_v58, %v4275_v51  ;;  %v4277_v56 = vmax.f32 %v4093_v40, %v4101_v52  ;;  %v4279_v22 = vmax.f32 %v4095_v42, %v4103_v20 }
 0x3df   : > { %v4366_v15 = vmax.f32 %v4274_v31, %v4276_v33  ;;  %v4278_v25 = vmax.f32 %v4094_v30, %v4102_v61  ;;  %v4280_v26 = vmax.f32 %v4096_v34, %v4104_v63  ;;  %v2939_v35 = vpop.f32.mrb[80].mxu0  ;;  %v3292_v36 = vpop.f32.mrb[80].mxu1 }
 0x3e0   : > { %v4367_v2 = vmax.f32 %v4277_v56, %v4279_v22  ;;  %v2941_v3 = vpop.f32.mrb[81].mxu0  ;;  %v3294_v4 = vpop.f32.mrb[81].mxu1  ;;  %v3849_v9 = vadd.f32 %v12235_v57, %v2939_v35  ;;  %v3851_v40 = vadd.f32 %v12239_v59, %v3292_v36 }
 0x3e1   : > { %v4368_v41 = vmax.f32 %v4278_v25, %v4280_v26  ;;  %v2943_v37 = vpop.f32.mrb[82].mxu0  ;;  %v3296_v38 = vpop.f32.mrb[82].mxu1  ;;  %v3850_v42 = vadd.f32 %v12243_v47, %v2941_v3  ;;  %v3852_v30 = vadd.f32 %v12247_v60, %v3294_v4 }
 0x3e2   : > { %v12537_v29 = vpack.c.bf16 %v4367_v2, %v4365_v12  ;;  %v2945_v6 = vpop.f32.mrb[83].mxu0  ;;  %v3298_v17 = vpop.f32.mrb[83].mxu1  ;;  %v3853_v34 = vadd.f32 %v12235_v57, %v2943_v37  ;;  %v3855_v8 = vadd.f32 %v12239_v59, %v3296_v38  ;;  %v4105_v24 = vmax.f32 %v3849_v9, 0.0 }
 0x3e3   : > { %v12540_v7 = vpack.c.bf16 %v4368_v41, %v4366_v15  ;;  %v3854_v49 = vadd.f32 %v12243_v47, %v2945_v6  ;;  %v3856_v19 = vadd.f32 %v12247_v60, %v3298_v17  ;;  %v4107_v13 = vmax.f32 %v3851_v40, 0.0 }
 0x3e4   : > { %v4106_v58 = vmax.f32 %v3850_v42, 0.0  ;;  %v4108_v51 = vmax.f32 %v3852_v30, 0.0  ;;  %v4109_v31 = vmax.f32 %v3853_v34, 0.0  ;;  %v4111_v33 = vmax.f32 %v3855_v8, 0.0 }
 0x3e5   : > { %5066 = vmatprep.mubr.bf16.mxu0 %v12540_v7  ;;  %5259 = vmatprep.mubr.bf16.mxu1 %v12540_v7  ;;  %v4110_v22 = vmax.f32 %v3854_v49, 0.0  ;;  %v4112_v15 = vmax.f32 %v3856_v19, 0.0 }
 0x3e6   : > { %5067 = vmatmul.mubr.bf16.gmra.mrb[164].mxu0 %v12537_v29  ;;  %5260 = vmatmul.mubr.bf16.gmra.mrb[164].mxu1 %v12537_v29 }
 0x3e7   : > { %v2949_v52 = vpop.f32.mrb[84].mxu0  ;;  %v3302_v20 = vpop.f32.mrb[84].mxu1 }
 0x3e8   : > { %v3857_v61 = vadd.f32 %v12235_v57, %v2949_v52  ;;  %v3859_v63 = vadd.f32 %v12239_v59, %v3302_v20  ;;  %v2951_v12 = vpop.f32.mrb[85].mxu0  ;;  %v3304_v56 = vpop.f32.mrb[85].mxu1 }
 0x3e9   : > { %v3858_v25 = vadd.f32 %v12243_v47, %v2951_v12  ;;  %v3860_v26 = vadd.f32 %v12247_v60, %v3304_v56  ;;  %v2953_v35 = vpop.f32.mrb[86].mxu0  ;;  %v3306_v36 = vpop.f32.mrb[86].mxu1 }
 0x3ea   : > { %v4113_v2 = vmax.f32 %v3857_v61, 0.0  ;;  %v4115_v3 = vmax.f32 %v3859_v63, 0.0  ;;  %v3861_v4 = vadd.f32 %v12235_v57, %v2953_v35  ;;  %v3863_v41 = vadd.f32 %v12239_v59, %v3306_v36  ;;  %v2955_v37 = vpop.f32.mrb[87].mxu0  ;;  %v3308_v38 = vpop.f32.mrb[87].mxu1 }
 0x3eb   : > { %v4114_v9 = vmax.f32 %v3858_v25, 0.0  ;;  %v4116_v6 = vmax.f32 %v3860_v26, 0.0  ;;  %v3862_v17 = vadd.f32 %v12243_v47, %v2955_v37  ;;  %v3864_v40 = vadd.f32 %v12247_v60, %v3308_v38 }
 0x3ec   : > { %v4281_v42 = vmax.f32 %v4105_v24, %v4113_v2  ;;  %v4283_v30 = vmax.f32 %v4107_v13, %v4115_v3  ;;  %v4117_v34 = vmax.f32 %v3861_v4, 0.0  ;;  %v4119_v8 = vmax.f32 %v3863_v41, 0.0 }
 0x3ed   : > { %v4282_v49 = vmax.f32 %v4106_v58, %v4114_v9  ;;  %v4284_v19 = vmax.f32 %v4108_v51, %v4116_v6  ;;  %v4118_v52 = vmax.f32 %v3862_v17, 0.0  ;;  %v4120_v20 = vmax.f32 %v3864_v40, 0.0 }
 0x3ee   : > { %v4369_v61 = vmax.f32 %v4281_v42, %v4283_v30  ;;  %v4285_v63 = vmax.f32 %v4109_v31, %v4117_v34  ;;  %v4287_v12 = vmax.f32 %v4111_v33, %v4119_v8 }
 0x3ef   : > { %v4370_v56 = vmax.f32 %v4282_v49, %v4284_v19  ;;  %v4286_v35 = vmax.f32 %v4110_v22, %v4118_v52  ;;  %v4288_v36 = vmax.f32 %v4112_v15, %v4120_v20  ;;  %v2959_v25 = vpop.f32.mrb[88].mxu0  ;;  %v3312_v26 = vpop.f32.mrb[88].mxu1 }
 0x3f0   : > { %v4371_v55 = vmax.f32 %v4285_v63, %v4287_v12  ;;  %v2961_v37 = vpop.f32.mrb[89].mxu0  ;;  %v3314_v54 = vpop.f32.mrb[89].mxu1  ;;  %v3865_v58 = vadd.f32 %v12235_v57, %v2959_v25  ;;  %v3867_v31 = vadd.f32 %v12239_v59, %v3312_v26 }
 0x3f1   : > { %v4372_v38 = vmax.f32 %v4286_v35, %v4288_v36  ;;  %v2963_v24 = vpop.f32.mrb[90].mxu0  ;;  %v3316_v13 = vpop.f32.mrb[90].mxu1  ;;  %v3866_v33 = vadd.f32 %v12243_v47, %v2961_v37  ;;  %v3868_v22 = vadd.f32 %v12247_v60, %v3314_v54 }
 0x3f2   : > { %v12561_v2 = vpack.c.bf16 %v4371_v55, %v4369_v61  ;;  %v2965_v51 = vpop.f32.mrb[91].mxu0  ;;  %v3318_v3 = vpop.f32.mrb[91].mxu1  ;;  %v3869_v15 = vadd.f32 %v12235_v57, %v2963_v24  ;;  %v3871_v41 = vadd.f32 %v12239_v59, %v3316_v13  ;;  %v4121_v6 = vmax.f32 %v3865_v58, 0.0 }
 0x3f3   : > { %v12564_v4 = vpack.c.bf16 %v4372_v38, %v4370_v56  ;;  %v3870_v9 = vadd.f32 %v12243_v47, %v2965_v51  ;;  %v3872_v55 = vadd.f32 %v12247_v60, %v3318_v3  ;;  %v4123_v17 = vmax.f32 %v3867_v31, 0.0 }
 0x3f4   : > { %v4122_v40 = vmax.f32 %v3866_v33, 0.0  ;;  %v4124_v54 = vmax.f32 %v3868_v22, 0.0  ;;  %v4125_v34 = vmax.f32 %v3869_v15, 0.0  ;;  %v4127_v8 = vmax.f32 %v3871_v41, 0.0 }
 0x3f5   : > { %5076 = vmatprep.mubr.bf16.mxu0 %v12564_v4  ;;  %5269 = vmatprep.mubr.bf16.mxu1 %v12564_v4  ;;  %v4126_v61 = vmax.f32 %v3870_v9, 0.0  ;;  %v4128_v63 = vmax.f32 %v3872_v55, 0.0 }
 0x3f6   : > { %5077 = vmatmul.mubr.bf16.gmra.mrb[168].mxu0 %v12561_v2  ;;  %5270 = vmatmul.mubr.bf16.gmra.mrb[168].mxu1 %v12561_v2 }
 0x3f7   : > { %v2969_v42 = vpop.f32.mrb[92].mxu0  ;;  %v3322_v30 = vpop.f32.mrb[92].mxu1 }
 0x3f8   : > { %v3873_v49 = vadd.f32 %v12235_v57, %v2969_v42  ;;  %v3875_v19 = vadd.f32 %v12239_v59, %v3322_v30  ;;  %v2971_v52 = vpop.f32.mrb[93].mxu0  ;;  %v3324_v20 = vpop.f32.mrb[93].mxu1 }
 0x3f9   : > { %v3874_v12 = vadd.f32 %v12243_v47, %v2971_v52  ;;  %v3876_v56 = vadd.f32 %v12247_v60, %v3324_v20  ;;  %v2973_v35 = vpop.f32.mrb[94].mxu0  ;;  %v3326_v36 = vpop.f32.mrb[94].mxu1 }
 0x3fa   : > { %v4129_v25 = vmax.f32 %v3873_v49, 0.0  ;;  %v4131_v26 = vmax.f32 %v3875_v19, 0.0  ;;  %v3877_v37 = vadd.f32 %v12235_v57, %v2973_v35  ;;  %v3879_v38 = vadd.f32 %v12239_v59, %v3326_v36  ;;  %v2975_v24 = vpop.f32.mrb[95].mxu0  ;;  %v3328_v13 = vpop.f32.mrb[95].mxu1 }
 0x3fb   : > { %v4130_v58 = vmax.f32 %v3874_v12, 0.0  ;;  %v4132_v51 = vmax.f32 %v3876_v56, 0.0  ;;  %v3878_v3 = vadd.f32 %v12243_v47, %v2975_v24  ;;  %v3880_v31 = vadd.f32 %v12247_v60, %v3328_v13 }
 0x3fc   : > { %v4289_v33 = vmax.f32 %v4121_v6, %v4129_v25  ;;  %v4291_v22 = vmax.f32 %v4123_v17, %v4131_v26  ;;  %v4133_v15 = vmax.f32 %v3877_v37, 0.0  ;;  %v4135_v41 = vmax.f32 %v3879_v38, 0.0 }
 0x3fd   : > { %v4290_v9 = vmax.f32 %v4122_v40, %v4130_v58  ;;  %v4292_v55 = vmax.f32 %v4124_v54, %v4132_v51  ;;  %v4134_v42 = vmax.f32 %v3878_v3, 0.0  ;;  %v4136_v30 = vmax.f32 %v3880_v31, 0.0 }
 0x3fe   : > { %v4373_v49 = vmax.f32 %v4289_v33, %v4291_v22  ;;  %v4293_v19 = vmax.f32 %v4125_v34, %v4133_v15  ;;  %v4295_v52 = vmax.f32 %v4127_v8, %v4135_v41 }
 0x3ff   : > { %v4374_v20 = vmax.f32 %v4290_v9, %v4292_v55  ;;  %v4294_v35 = vmax.f32 %v4126_v61, %v4134_v42  ;;  %v4296_v36 = vmax.f32 %v4128_v63, %v4136_v30  ;;  %v2979_v12 = vpop.f32.mrb[96].mxu0  ;;  %v3332_v56 = vpop.f32.mrb[96].mxu1 }
 0x400   : > { %v4375_v45 = vmax.f32 %v4293_v19, %v4295_v52  ;;  %v2981_v24 = vpop.f32.mrb[97].mxu0  ;;  %v3334_v53 = vpop.f32.mrb[97].mxu1  ;;  %v3881_v40 = vadd.f32 %v12235_v57, %v2979_v12  ;;  %v3883_v34 = vadd.f32 %v12239_v59, %v3332_v56 }
 0x401   : > { %v4376_v13 = vmax.f32 %v4294_v35, %v4296_v36  ;;  %v2983_v6 = vpop.f32.mrb[98].mxu0  ;;  %v3336_v17 = vpop.f32.mrb[98].mxu1  ;;  %v3882_v8 = vadd.f32 %v12243_v47, %v2981_v24  ;;  %v3884_v61 = vadd.f32 %v12247_v60, %v3334_v53 }
 0x402   : > { %v12585_v25 = vpack.c.bf16 %v4375_v45, %v4373_v49  ;;  %v2985_v54 = vpop.f32.mrb[99].mxu0  ;;  %v3338_v26 = vpop.f32.mrb[99].mxu1  ;;  %v3885_v63 = vadd.f32 %v12235_v57, %v2983_v6  ;;  %v3887_v38 = vadd.f32 %v12239_v59, %v3336_v17  ;;  %v4137_v51 = vmax.f32 %v3881_v40, 0.0 }
 0x403   : > { %v12588_v37 = vpack.c.bf16 %v4376_v13, %v4374_v20  ;;  %v3886_v58 = vadd.f32 %v12243_v47, %v2985_v54  ;;  %v3888_v45 = vadd.f32 %v12247_v60, %v3338_v26  ;;  %v4139_v3 = vmax.f32 %v3883_v34, 0.0 }
 0x404   : > { %v4138_v31 = vmax.f32 %v3882_v8, 0.0  ;;  %v4140_v53 = vmax.f32 %v3884_v61, 0.0  ;;  %v4141_v15 = vmax.f32 %v3885_v63, 0.0  ;;  %v4143_v41 = vmax.f32 %v3887_v38, 0.0 }
 0x405   : > { %5086 = vmatprep.mubr.bf16.mxu0 %v12588_v37  ;;  %5279 = vmatprep.mubr.bf16.mxu1 %v12588_v37  ;;  %v4142_v49 = vmax.f32 %v3886_v58, 0.0  ;;  %v4144_v19 = vmax.f32 %v3888_v45, 0.0 }
 0x406   : > { %5087 = vmatmul.mubr.bf16.gmra.mrb[172].mxu0 %v12585_v25  ;;  %5280 = vmatmul.mubr.bf16.gmra.mrb[172].mxu1 %v12585_v25 }
 0x407   : > { %v2989_v33 = vpop.f32.mrb[100].mxu0  ;;  %v3342_v22 = vpop.f32.mrb[100].mxu1 }
 0x408   : > { %v3889_v9 = vadd.f32 %v12235_v57, %v2989_v33  ;;  %v3891_v55 = vadd.f32 %v12239_v59, %v3342_v22  ;;  %v2991_v42 = vpop.f32.mrb[101].mxu0  ;;  %v3344_v30 = vpop.f32.mrb[101].mxu1 }
 0x409   : > { %v3890_v52 = vadd.f32 %v12243_v47, %v2991_v42  ;;  %v3892_v20 = vadd.f32 %v12247_v60, %v3344_v30  ;;  %v2993_v35 = vpop.f32.mrb[102].mxu0  ;;  %v3346_v36 = vpop.f32.mrb[102].mxu1 }
 0x40a   : > { %v4145_v12 = vmax.f32 %v3889_v9, 0.0  ;;  %v4147_v56 = vmax.f32 %v3891_v55, 0.0  ;;  %v3893_v24 = vadd.f32 %v12235_v57, %v2993_v35  ;;  %v3895_v13 = vadd.f32 %v12239_v59, %v3346_v36  ;;  %v2995_v6 = vpop.f32.mrb[103].mxu0  ;;  %v3348_v17 = vpop.f32.mrb[103].mxu1 }
 0x40b   : > { %v4146_v40 = vmax.f32 %v3890_v52, 0.0  ;;  %v4148_v54 = vmax.f32 %v3892_v20, 0.0  ;;  %v3894_v26 = vadd.f32 %v12243_v47, %v2995_v6  ;;  %v3896_v34 = vadd.f32 %v12247_v60, %v3348_v17 }
 0x40c   : > { %v4297_v8 = vmax.f32 %v4137_v51, %v4145_v12  ;;  %v4299_v61 = vmax.f32 %v4139_v3, %v4147_v56  ;;  %v4149_v63 = vmax.f32 %v3893_v24, 0.0  ;;  %v4151_v38 = vmax.f32 %v3895_v13, 0.0 }
 0x40d   : > { %v4298_v58 = vmax.f32 %v4138_v31, %v4146_v40  ;;  %v4300_v45 = vmax.f32 %v4140_v53, %v4148_v54  ;;  %v4150_v33 = vmax.f32 %v3894_v26, 0.0  ;;  %v4152_v22 = vmax.f32 %v3896_v34, 0.0 }
 0x40e   : > { %v4377_v9 = vmax.f32 %v4297_v8, %v4299_v61  ;;  %v4301_v55 = vmax.f32 %v4141_v15, %v4149_v63  ;;  %v4303_v42 = vmax.f32 %v4143_v41, %v4151_v38 }
 0x40f   : > { %v4378_v30 = vmax.f32 %v4298_v58, %v4300_v45  ;;  %v4302_v35 = vmax.f32 %v4142_v49, %v4150_v33  ;;  %v4304_v36 = vmax.f32 %v4144_v19, %v4152_v22  ;;  %v2999_v52 = vpop.f32.mrb[104].mxu0  ;;  %v3352_v20 = vpop.f32.mrb[104].mxu1 }
 0x410   : > { %v4379_v0 = vmax.f32 %v4301_v55, %v4303_v42  ;;  %v3001_v6 = vpop.f32.mrb[105].mxu0  ;;  %v3354_v44 = vpop.f32.mrb[105].mxu1  ;;  %v3897_v31 = vadd.f32 %v12235_v57, %v2999_v52  ;;  %v3899_v15 = vadd.f32 %v12239_v59, %v3352_v20 }
 0x411   : > { %v4380_v17 = vmax.f32 %v4302_v35, %v4304_v36  ;;  %v3003_v51 = vpop.f32.mrb[106].mxu0  ;;  %v3356_v3 = vpop.f32.mrb[106].mxu1  ;;  %v3898_v41 = vadd.f32 %v12243_v47, %v3001_v6  ;;  %v3900_v49 = vadd.f32 %v12247_v60, %v3354_v44 }
 0x412   : > { %v12609_v12 = vpack.c.bf16 %v4379_v0, %v4377_v9  ;;  %v3005_v53 = vpop.f32.mrb[107].mxu0  ;;  %v3358_v56 = vpop.f32.mrb[107].mxu1  ;;  %v3901_v19 = vadd.f32 %v12235_v57, %v3003_v51  ;;  %v3903_v13 = vadd.f32 %v12239_v59, %v3356_v3  ;;  %v4153_v54 = vmax.f32 %v3897_v31, 0.0 }
 0x413   : > { %v12612_v24 = vpack.c.bf16 %v4380_v17, %v4378_v30  ;;  %v3902_v40 = vadd.f32 %v12243_v47, %v3005_v53  ;;  %v3904_v0 = vadd.f32 %v12247_v60, %v3358_v56  ;;  %v4155_v26 = vmax.f32 %v3899_v15, 0.0 }
 0x414   : > { %13130 = vst [vmem:[#allocation15_spill] sm:$0xff] %v12609_v12  ;;  %v4154_v34 = vmax.f32 %v3898_v41, 0.0  ;;  %v4156_v44 = vmax.f32 %v3900_v49, 0.0  ;;  %v4157_v63 = vmax.f32 %v3901_v19, 0.0  ;;  %v4159_v38 = vmax.f32 %v3903_v13, 0.0 }
 0x415   : > { %13131 = vst [vmem:[#allocation16_spill] sm:$0xff] %v12612_v24  ;;  %5096 = vmatprep.mubr.bf16.mxu0 %v12612_v24  ;;  %5289 = vmatprep.mubr.bf16.mxu1 %v12612_v24  ;;  %v4158_v9 = vmax.f32 %v3902_v40, 0.0  ;;  %v4160_v55 = vmax.f32 %v3904_v0, 0.0 }
 0x416   : > { %5097 = vmatmul.mubr.bf16.gmra.mrb[176].mxu0 %v12609_v12  ;;  %5290 = vmatmul.mubr.bf16.gmra.mrb[176].mxu1 %v12609_v12 }
 0x417   : > { %v3009_v8 = vpop.f32.mrb[108].mxu0  ;;  %v3362_v61 = vpop.f32.mrb[108].mxu1 }
 0x418   : > { %v3905_v58 = vadd.f32 %v12235_v57, %v3009_v8  ;;  %v3907_v45 = vadd.f32 %v12239_v59, %v3362_v61  ;;  %v3011_v33 = vpop.f32.mrb[109].mxu0  ;;  %v3364_v22 = vpop.f32.mrb[109].mxu1 }
 0x419   : > { %v3906_v42 = vadd.f32 %v12243_v47, %v3011_v33  ;;  %v3908_v30 = vadd.f32 %v12247_v60, %v3364_v22  ;;  %v3013_v35 = vpop.f32.mrb[110].mxu0  ;;  %v3366_v36 = vpop.f32.mrb[110].mxu1 }
 0x41a   : > { %v4161_v52 = vmax.f32 %v3905_v58, 0.0  ;;  %v4163_v20 = vmax.f32 %v3907_v45, 0.0  ;;  %v3909_v6 = vadd.f32 %v12235_v57, %v3013_v35  ;;  %v3911_v17 = vadd.f32 %v12239_v59, %v3366_v36  ;;  %v3015_v51 = vpop.f32.mrb[111].mxu0  ;;  %v3368_v3 = vpop.f32.mrb[111].mxu1 }
 0x41b   : > { %v4162_v31 = vmax.f32 %v3906_v42, 0.0  ;;  %v4164_v53 = vmax.f32 %v3908_v30, 0.0  ;;  %v3910_v56 = vadd.f32 %v12243_v47, %v3015_v51  ;;  %v3912_v15 = vadd.f32 %v12247_v60, %v3368_v3 }
 0x41c   : > { %v4305_v41 = vmax.f32 %v4153_v54, %v4161_v52  ;;  %v4307_v49 = vmax.f32 %v4155_v26, %v4163_v20  ;;  %v4165_v19 = vmax.f32 %v3909_v6, 0.0  ;;  %v4167_v13 = vmax.f32 %v3911_v17, 0.0 }
 0x41d   : > { %v4306_v40 = vmax.f32 %v4154_v34, %v4162_v31  ;;  %v4308_v0 = vmax.f32 %v4156_v44, %v4164_v53  ;;  %v4166_v8 = vmax.f32 %v3910_v56, 0.0  ;;  %v4168_v61 = vmax.f32 %v3912_v15, 0.0 }
 0x41e   : > { %v4381_v58 = vmax.f32 %v4305_v41, %v4307_v49  ;;  %v4309_v45 = vmax.f32 %v4157_v63, %v4165_v19  ;;  %v4311_v33 = vmax.f32 %v4159_v38, %v4167_v13 }
 0x41f   : > { %v4382_v22 = vmax.f32 %v4306_v40, %v4308_v0  ;;  %v4310_v35 = vmax.f32 %v4158_v9, %v4166_v8  ;;  %v4312_v36 = vmax.f32 %v4160_v55, %v4168_v61  ;;  %v3019_v42 = vpop.f32.mrb[112].mxu0  ;;  %v3372_v30 = vpop.f32.mrb[112].mxu1 }
 0x420   : > { %v4383_v12 = vmax.f32 %v4309_v45, %v4311_v33  ;;  %v3021_v51 = vpop.f32.mrb[113].mxu0  ;;  %v3374_v24 = vpop.f32.mrb[113].mxu1  ;;  %v3913_v34 = vadd.f32 %v12235_v57, %v3019_v42  ;;  %v3915_v63 = vadd.f32 %v12239_v59, %v3372_v30 }
 0x421   : > { %v4384_v3 = vmax.f32 %v4310_v35, %v4312_v36  ;;  %v3023_v54 = vpop.f32.mrb[114].mxu0  ;;  %v3376_v26 = vpop.f32.mrb[114].mxu1  ;;  %v3914_v38 = vadd.f32 %v12243_v47, %v3021_v51  ;;  %v3916_v9 = vadd.f32 %v12247_v60, %v3374_v24 }
 0x422   : > { %v12633_v52 = vpack.c.bf16 %v4383_v12, %v4381_v58  ;;  %v3025_v44 = vpop.f32.mrb[115].mxu0  ;;  %v3378_v20 = vpop.f32.mrb[115].mxu1  ;;  %v3917_v55 = vadd.f32 %v12235_v57, %v3023_v54  ;;  %v3919_v17 = vadd.f32 %v12239_v59, %v3376_v26  ;;  %v4169_v53 = vmax.f32 %v3913_v34, 0.0 }
 0x423   : > { %v12636_v6 = vpack.c.bf16 %v4384_v3, %v4382_v22  ;;  %v3918_v31 = vadd.f32 %v12243_v47, %v3025_v44  ;;  %v3920_v12 = vadd.f32 %v12247_v60, %v3378_v20  ;;  %v4171_v56 = vmax.f32 %v3915_v63, 0.0 }
 0x424   : > { %13132 = vst [vmem:[#allocation17_spill] sm:$0xff] %v12633_v52  ;;  %v4170_v15 = vmax.f32 %v3914_v38, 0.0  ;;  %v4172_v24 = vmax.f32 %v3916_v9, 0.0  ;;  %v4173_v19 = vmax.f32 %v3917_v55, 0.0  ;;  %v4175_v13 = vmax.f32 %v3919_v17, 0.0 }
 0x425   : > { %13133 = vst [vmem:[#allocation18_spill] sm:$0xff] %v12636_v6  ;;  %5106 = vmatprep.mubr.bf16.mxu0 %v12636_v6  ;;  %5299 = vmatprep.mubr.bf16.mxu1 %v12636_v6  ;;  %v4174_v58 = vmax.f32 %v3918_v31, 0.0  ;;  %v4176_v45 = vmax.f32 %v3920_v12, 0.0 }
 0x426   : > { %5107 = vmatmul.mubr.bf16.gmra.mrb[180].mxu0 %v12633_v52  ;;  %5300 = vmatmul.mubr.bf16.gmra.mrb[180].mxu1 %v12633_v52 }
 0x427   : > { %v3029_v41 = vpop.f32.mrb[116].mxu0  ;;  %v3382_v49 = vpop.f32.mrb[116].mxu1 }
 0x428   : > { %v3921_v40 = vadd.f32 %v12235_v57, %v3029_v41  ;;  %v3923_v0 = vadd.f32 %v12239_v59, %v3382_v49  ;;  %v3031_v8 = vpop.f32.mrb[117].mxu0  ;;  %v3384_v61 = vpop.f32.mrb[117].mxu1 }
 0x429   : > { %v3922_v33 = vadd.f32 %v12243_v47, %v3031_v8  ;;  %v3924_v22 = vadd.f32 %v12247_v60, %v3384_v61  ;;  %v3033_v35 = vpop.f32.mrb[118].mxu0  ;;  %v3386_v36 = vpop.f32.mrb[118].mxu1 }
 0x42a   : > { %v4177_v42 = vmax.f32 %v3921_v40, 0.0  ;;  %v4179_v30 = vmax.f32 %v3923_v0, 0.0  ;;  %v3925_v51 = vadd.f32 %v12235_v57, %v3033_v35  ;;  %v3927_v3 = vadd.f32 %v12239_v59, %v3386_v36  ;;  %v3035_v54 = vpop.f32.mrb[119].mxu0  ;;  %v3388_v26 = vpop.f32.mrb[119].mxu1 }
 0x42b   : > { %v4178_v34 = vmax.f32 %v3922_v33, 0.0  ;;  %v4180_v44 = vmax.f32 %v3924_v22, 0.0  ;;  %v3926_v20 = vadd.f32 %v12243_v47, %v3035_v54  ;;  %v3928_v63 = vadd.f32 %v12247_v60, %v3388_v26 }
 0x42c   : > { %v4313_v38 = vmax.f32 %v4169_v53, %v4177_v42  ;;  %v4315_v9 = vmax.f32 %v4171_v56, %v4179_v30  ;;  %v4181_v55 = vmax.f32 %v3925_v51, 0.0  ;;  %v4183_v17 = vmax.f32 %v3927_v3, 0.0 }
 0x42d   : > { %v4314_v31 = vmax.f32 %v4170_v15, %v4178_v34  ;;  %v4316_v12 = vmax.f32 %v4172_v24, %v4180_v44  ;;  %v4182_v41 = vmax.f32 %v3926_v20, 0.0  ;;  %v4184_v49 = vmax.f32 %v3928_v63, 0.0 }
 0x42e   : > { %v4385_v40 = vmax.f32 %v4313_v38, %v4315_v9  ;;  %v4317_v0 = vmax.f32 %v4173_v19, %v4181_v55  ;;  %v4319_v8 = vmax.f32 %v4175_v13, %v4183_v17 }
 0x42f   : > { %v4386_v61 = vmax.f32 %v4314_v31, %v4316_v12  ;;  %v4318_v35 = vmax.f32 %v4174_v58, %v4182_v41  ;;  %v4320_v36 = vmax.f32 %v4176_v45, %v4184_v49  ;;  %v3039_v33 = vpop.f32.mrb[120].mxu0  ;;  %v3392_v22 = vpop.f32.mrb[120].mxu1 }
 0x430   : > { %v4387_v52 = vmax.f32 %v4317_v0, %v4319_v8  ;;  %v3041_v54 = vpop.f32.mrb[121].mxu0  ;;  %v3394_v6 = vpop.f32.mrb[121].mxu1  ;;  %v3929_v15 = vadd.f32 %v12235_v57, %v3039_v33  ;;  %v3931_v19 = vadd.f32 %v12239_v59, %v3392_v22 }
 0x431   : > { %v4388_v26 = vmax.f32 %v4318_v35, %v4320_v36  ;;  %v3043_v53 = vpop.f32.mrb[122].mxu0  ;;  %v3396_v56 = vpop.f32.mrb[122].mxu1  ;;  %v3930_v13 = vadd.f32 %v12243_v47, %v3041_v54  ;;  %v3932_v58 = vadd.f32 %v12247_v60, %v3394_v6 }
 0x432   : > { %v12657_v42 = vpack.c.bf16 %v4387_v52, %v4385_v40  ;;  %v3045_v24 = vpop.f32.mrb[123].mxu0  ;;  %v3398_v30 = vpop.f32.mrb[123].mxu1  ;;  %v3933_v45 = vadd.f32 %v12235_v57, %v3043_v53  ;;  %v3935_v3 = vadd.f32 %v12239_v59, %v3396_v56  ;;  %v4185_v44 = vmax.f32 %v3929_v15, 0.0 }
 0x433   : > { %v12660_v51 = vpack.c.bf16 %v4388_v26, %v4386_v61  ;;  %v3934_v34 = vadd.f32 %v12243_v47, %v3045_v24  ;;  %v3936_v52 = vadd.f32 %v12247_v60, %v3398_v30  ;;  %v4187_v20 = vmax.f32 %v3931_v19, 0.0 }
 0x434   : > { %v4186_v63 = vmax.f32 %v3930_v13, 0.0  ;;  %v4188_v6 = vmax.f32 %v3932_v58, 0.0  ;;  %v4189_v55 = vmax.f32 %v3933_v45, 0.0  ;;  %v4191_v17 = vmax.f32 %v3935_v3, 0.0 }
 0x435   : > { %5116 = vmatprep.mubr.bf16.mxu0 %v12660_v51  ;;  %5309 = vmatprep.mubr.bf16.mxu1 %v12660_v51  ;;  %v4190_v40 = vmax.f32 %v3934_v34, 0.0  ;;  %v4192_v0 = vmax.f32 %v3936_v52, 0.0 }
 0x436   : > { %5117 = vmatmul.mubr.bf16.gmra.mrb[184].mxu0 %v12657_v42  ;;  %5310 = vmatmul.mubr.bf16.gmra.mrb[184].mxu1 %v12657_v42 }
 0x437   : > { %v3049_v38 = vpop.f32.mrb[124].mxu0  ;;  %v3402_v9 = vpop.f32.mrb[124].mxu1 }
 0x438   : > { %v3937_v31 = vadd.f32 %v12235_v57, %v3049_v38  ;;  %v3939_v12 = vadd.f32 %v12239_v59, %v3402_v9  ;;  %v3051_v41 = vpop.f32.mrb[125].mxu0  ;;  %v3404_v49 = vpop.f32.mrb[125].mxu1 }
 0x439   : > { %v3938_v8 = vadd.f32 %v12243_v47, %v3051_v41  ;;  %v3940_v61 = vadd.f32 %v12247_v60, %v3404_v49  ;;  %v3053_v35 = vpop.f32.mrb[126].mxu0  ;;  %v3406_v36 = vpop.f32.mrb[126].mxu1 }
 0x43a   : > { %v4193_v33 = vmax.f32 %v3937_v31, 0.0  ;;  %v4195_v22 = vmax.f32 %v3939_v12, 0.0  ;;  %v3941_v54 = vadd.f32 %v12235_v57, %v3053_v35  ;;  %v3943_v26 = vadd.f32 %v12239_v59, %v3406_v36  ;;  %v3055_v53 = vpop.f32.mrb[127].mxu0  ;;  %v3408_v56 = vpop.f32.mrb[127].mxu1  ;;  %v10875_v36 = vld [vmem:[#allocation4 + $0x440] ss:$16 sps:$4 sm:$0xff]  }
 0x43b   : > { %v4194_v15 = vmax.f32 %v3938_v8, 0.0  ;;  %v4196_v24 = vmax.f32 %v3940_v61, 0.0  ;;  %v3942_v30 = vadd.f32 %v12243_v47, %v3055_v53  ;;  %v3944_v19 = vadd.f32 %v12247_v60, %v3408_v56  ;;  %v10889_v53 = vld [vmem:[#allocation4 + $0x484] ss:$16 sps:$4 sm:$0xff]   ;;  %v10892_v56 = vld [vmem:[#allocation4 + $0x48c] ss:$16 sps:$4 sm:$0xff]  }
 0x43c   : > { %v4321_v13 = vmax.f32 %v4185_v44, %v4193_v33  ;;  %v4323_v58 = vmax.f32 %v4187_v20, %v4195_v22  ;;  %v4197_v45 = vmax.f32 %v3941_v54, 0.0  ;;  %v4199_v3 = vmax.f32 %v3943_v26, 0.0  ;;  %v10863_v44 = vld [vmem:[#allocation4 + $0x400] ss:$16 sps:$4 sm:$0xff]   ;;  %v10866_v20 = vld [vmem:[#allocation4 + $0x408] ss:$16 sps:$4 sm:$0xff]  }
 0x43d   : > { %v4322_v34 = vmax.f32 %v4186_v63, %v4194_v15  ;;  %v4324_v52 = vmax.f32 %v4188_v6, %v4196_v24  ;;  %v4198_v38 = vmax.f32 %v3942_v30, 0.0  ;;  %v4200_v9 = vmax.f32 %v3944_v19, 0.0  ;;  %v10871_v63 = vld [vmem:[#allocation4 + $0x424] ss:$16 sps:$4 sm:$0xff]   ;;  %v10874_v6 = vld [vmem:[#allocation4 + $0x42c] ss:$16 sps:$4 sm:$0xff]  }
 0x43e   : > { %v4389_v31 = vmax.f32 %v4321_v13, %v4323_v58  ;;  %v4325_v57 = vmax.f32 %v4189_v55, %v4197_v45  ;;  %v4327_v12 = vmax.f32 %v4191_v17, %v4199_v3  ;;  %v13134_v60 = vmov 0   ;;  %v10869_v55 = vld [vmem:[#allocation4 + $0x420] ss:$16 sps:$4 sm:$0xff]   ;;  %v10872_v17 = vld [vmem:[#allocation4 + $0x428] ss:$16 sps:$4 sm:$0xff]  }
 0x43f   : > { %v4390_v59 = vmax.f32 %v4322_v34, %v4324_v52  ;;  %v4326_v41 = vmax.f32 %v4190_v40, %v4198_v38  ;;  %v4328_v49 = vmax.f32 %v4192_v0, %v4200_v9  ;;  %v10877_v40 = vld [vmem:[#allocation4 + $0x444] ss:$16 sps:$4 sm:$0xff]   ;;  %v10880_v0 = vld [vmem:[#allocation4 + $0x44c] ss:$16 sps:$4 sm:$0xff]   ;;  %v10878_v33 = vld [vmem:[#allocation4 + $0x448] ss:$16 sps:$4 sm:$0xff]  }
 0x440   : > { %v4391_v8 = vmax.f32 %v4325_v57, %v4327_v12  ;;  %v10883_v22 = vld [vmem:[#allocation4 + $0x464] ss:$16 sps:$4 sm:$0xff]   ;;  %v10886_v54 = vld [vmem:[#allocation4 + $0x46c] ss:$16 sps:$4 sm:$0xff]   ;;  %v10884_v26 = vld [vmem:[#allocation4 + $0x468] ss:$16 sps:$4 sm:$0xff]  }
 0x441   : > { %v4392_v61 = vmax.f32 %v4326_v41, %v4328_v49  ;;  %v10887_v15 = vld [vmem:[#allocation4 + $0x480] ss:$16 sps:$4 sm:$0xff]   ;;  %v10890_v24 = vld [vmem:[#allocation4 + $0x488] ss:$16 sps:$4 sm:$0xff]   ;;  %v10895_v30 = vld [vmem:[#allocation4 + $0x4a4] ss:$16 sps:$4 sm:$0xff]  }
 0x442   : > { %v12681_v35 = vpack.c.bf16 %v4391_v8, %v4389_v31  ;;  %v10893_v19 = vld [vmem:[#allocation4 + $0x4a0] ss:$16 sps:$4 sm:$0xff]   ;;  %v10896_v13 = vld [vmem:[#allocation4 + $0x4a8] ss:$16 sps:$4 sm:$0xff]   ;;  %v10901_v58 = vld [vmem:[#allocation4 + $0x4c4] ss:$16 sps:$4 sm:$0xff]  }
 0x443   : > { %v12683_v47 = vpack.c.bf16 %v4392_v61, %v4390_v59  ;;  %v10904_v45 = vld [vmem:[#allocation4 + $0x4cc] ss:$16 sps:$4 sm:$0xff]   ;;  %v10899_v3 = vld [vmem:[#allocation4 + $0x4c0] ss:$16 sps:$4 sm:$0xff]   ;;  %v10902_v34 = vld [vmem:[#allocation4 + $0x4c8] ss:$16 sps:$4 sm:$0xff]  }
 0x444   : > { %v10907_v52 = vld [vmem:[#allocation4 + $0x4e4] ss:$16 sps:$4 sm:$0xff]   ;;  %v10910_v38 = vld [vmem:[#allocation4 + $0x4ec] ss:$16 sps:$4 sm:$0xff]   ;;  %v10905_v9 = vld [vmem:[#allocation4 + $0x4e0] ss:$16 sps:$4 sm:$0xff]  }
 0x445   : > { %5126 = vmatprep.mubr.bf16.mxu0 %v12683_v47  ;;  %5319 = vmatprep.mubr.bf16.mxu1 %v12683_v47  ;;  %v10908_v31 = vld [vmem:[#allocation4 + $0x4e8] ss:$16 sps:$4 sm:$0xff]   ;;  %v10913_v57 = vld [vmem:[#allocation4 + $0x504] ss:$16 sps:$4 sm:$0xff]   ;;  %v10916_v12 = vld [vmem:[#allocation4 + $0x50c] ss:$16 sps:$4 sm:$0xff]  }
 0x446   : > { %5127 = vmatmul.mubr.bf16.gmra.mrb[188].mxu0 %v12681_v35  ;;  %5320 = vmatmul.mubr.bf16.gmra.mrb[188].mxu1 %v12681_v35  ;;  %v10911_v59 = vld [vmem:[#allocation4 + $0x500] ss:$16 sps:$4 sm:$0xff]   ;;  %v10914_v41 = vld [vmem:[#allocation4 + $0x508] ss:$16 sps:$4 sm:$0xff]   ;;  %v10919_v49 = vld [vmem:[#allocation4 + $0x524] ss:$16 sps:$4 sm:$0xff]  }
 0x447   : > { %5682 = vmatprep.mubr.bf16.mxu0 %v13134_v60  ;;  %5875 = vmatprep.mubr.bf16.mxu1 %v13134_v60  ;;  %v10922_v8 = vld [vmem:[#allocation4 + $0x52c] ss:$16 sps:$4 sm:$0xff]   ;;  %v10917_v61 = vld [vmem:[#allocation4 + $0x520] ss:$16 sps:$4 sm:$0xff]  }
 0x44e   : > { %5683 = vmatmul.mubr.bf16.vlgmr.msra.gmra.mrb[128].mxu0 %v13134_v60  ;;  %5876 = vmatmul.mubr.bf16.vlgmr.msra.gmra.mrb[128].mxu1 %v13134_v60 }
 0x44f   : > { %5692 = vmatprep.mubr.bf16.mxu0 %v12278_v14  ;;  %5885 = vmatprep.mubr.bf16.mxu1 %v12278_v14  ;;  %v10881_v14 = vld [vmem:[#allocation4 + $0x460] ss:$16 sps:$4 sm:$0xff]  }
 0x450   : > { %6454 = vmatpush1.bf16.msra.mxu0 %v10863_v44  ;;  %6647 = vmatpush1.bf16.msra.mxu1 %v10866_v20  ;;  %v10920_v44 = vld [vmem:[#allocation4 + $0x528] ss:$16 sps:$4 sm:$0xff]   ;;  %v10925_v20 = vld [vmem:[#allocation4 + $0x544] ss:$16 sps:$4 sm:$0xff]  }
 0x451   : > { %6455 = vmatprep.subr.bf16.mxu0 %v10871_v63  ;;  %6648 = vmatprep.subr.bf16.mxu1 %v10874_v6  ;;  %v10928_v63 = vld [vmem:[#allocation4 + $0x54c] ss:$16 sps:$4 sm:$0xff]   ;;  %v10923_v6 = vld [vmem:[#allocation4 + $0x540] ss:$16 sps:$4 sm:$0xff]  }
 0x454   : > { %6456 = vmatpush1.bf16.msra.mxu0 %v10869_v55  ;;  %6649 = vmatpush1.bf16.msra.mxu1 %v10872_v17  ;;  %v10926_v55 = vld [vmem:[#allocation4 + $0x548] ss:$16 sps:$4 sm:$0xff]   ;;  %v10931_v17 = vld [vmem:[#allocation4 + $0x564] ss:$16 sps:$4 sm:$0xff]  }
 0x455   : > { %6457 = vmatprep.subr.bf16.mxu0 %v10877_v40  ;;  %6650 = vmatprep.subr.bf16.mxu1 %v10880_v0  ;;  %v10934_v40 = vld [vmem:[#allocation4 + $0x56c] ss:$16 sps:$4 sm:$0xff]   ;;  %v10929_v0 = vld [vmem:[#allocation4 + $0x560] ss:$16 sps:$4 sm:$0xff]  }
 0x456   : > { %5693 = vmatmul.mubr.bf16.gmra.mrb[132].mxu0 %v12275_v10  ;;  %5886 = vmatmul.mubr.bf16.gmra.mrb[132].mxu1 %v12275_v10  ;;  %v10898_v10 = vld [vmem:[#allocation4 + $0x4ac] ss:$16 sps:$4 sm:$0xff]  }
 0x457   : > { %5702 = vmatprep.mubr.bf16.mxu0 %v12306_v27  ;;  %5895 = vmatprep.mubr.bf16.mxu1 %v12306_v27 }
 0x458   : > { %6458 = vmatpush1.bf16.msra.mxu0 %v10875_v36  ;;  %6651 = vmatpush1.bf16.msra.mxu1 %v10878_v33  ;;  %v10932_v36 = vld [vmem:[#allocation4 + $0x568] ss:$16 sps:$4 sm:$0xff]   ;;  %v10937_v33 = vld [vmem:[#allocation4 + $0x584] ss:$16 sps:$4 sm:$0xff]  }
 0x459   : > { %6459 = vmatprep.subr.bf16.mxu0 %v10883_v22  ;;  %6652 = vmatprep.subr.bf16.mxu1 %v10886_v54  ;;  %v10940_v22 = vld [vmem:[#allocation4 + $0x58c] ss:$16 sps:$4 sm:$0xff]   ;;  %v10935_v54 = vld [vmem:[#allocation4 + $0x580] ss:$16 sps:$4 sm:$0xff]  }
 0x45c   : > { %6460 = vmatpush1.bf16.msra.mxu0 %v10881_v14  ;;  %6653 = vmatpush1.bf16.msra.mxu1 %v10884_v26  ;;  %v10938_v14 = vld [vmem:[#allocation4 + $0x588] ss:$16 sps:$4 sm:$0xff]   ;;  %v10943_v26 = vld [vmem:[#allocation4 + $0x5a4] ss:$16 sps:$4 sm:$0xff]  }
 0x45d   : > { %6461 = vmatprep.subr.bf16.mxu0 %v10889_v53  ;;  %6654 = vmatprep.subr.bf16.mxu1 %v10892_v56  ;;  %v10946_v53 = vld [vmem:[#allocation4 + $0x5ac] ss:$16 sps:$4 sm:$0xff]   ;;  %v10941_v56 = vld [vmem:[#allocation4 + $0x5a0] ss:$16 sps:$4 sm:$0xff]  }
 0x45e   : > { %5703 = vmatmul.mubr.bf16.gmra.mrb[136].mxu0 %v12303_v23  ;;  %5896 = vmatmul.mubr.bf16.gmra.mrb[136].mxu1 %v12303_v23 }
 0x45f   : > { %5712 = vmatprep.mubr.bf16.mxu0 %v12345_v62  ;;  %5905 = vmatprep.mubr.bf16.mxu1 %v12345_v62 }
 0x460   : > { %6462 = vmatpush1.bf16.msra.mxu0 %v10887_v15  ;;  %6655 = vmatpush1.bf16.msra.mxu1 %v10890_v24  ;;  %v10944_v15 = vld [vmem:[#allocation4 + $0x5a8] ss:$16 sps:$4 sm:$0xff]   ;;  %v10949_v24 = vld [vmem:[#allocation4 + $0x5c4] ss:$16 sps:$4 sm:$0xff]  }
 0x461   : > { %6463 = vmatprep.subr.bf16.mxu0 %v10895_v30  ;;  %6656 = vmatprep.subr.bf16.mxu1 %v10898_v10  ;;  %v10952_v30 = vld [vmem:[#allocation4 + $0x5cc] ss:$16 sps:$4 sm:$0xff]   ;;  %v10947_v10 = vld [vmem:[#allocation4 + $0x5c0] ss:$16 sps:$4 sm:$0xff]  }
 0x464   : > { %6464 = vmatpush1.bf16.msra.mxu0 %v10893_v19  ;;  %6657 = vmatpush1.bf16.msra.mxu1 %v10896_v13  ;;  %v10950_v19 = vld [vmem:[#allocation4 + $0x5c8] ss:$16 sps:$4 sm:$0xff]   ;;  %v10955_v13 = vld [vmem:[#allocation4 + $0x5e4] ss:$16 sps:$4 sm:$0xff]  }
 0x465   : > { %6465 = vmatprep.subr.bf16.mxu0 %v10901_v58  ;;  %6658 = vmatprep.subr.bf16.mxu1 %v10904_v45  ;;  %v10958_v58 = vld [vmem:[#allocation4 + $0x5ec] ss:$16 sps:$4 sm:$0xff]   ;;  %v10953_v45 = vld [vmem:[#allocation4 + $0x5e0] ss:$16 sps:$4 sm:$0xff]  }
 0x466   : > { %5713 = vmatmul.mubr.bf16.gmra.mrb[140].mxu0 %v12337_v50  ;;  %5906 = vmatmul.mubr.bf16.gmra.mrb[140].mxu1 %v12337_v50 }
 0x467   : > { %5722 = vmatprep.mubr.bf16.mxu0 %v12395_v28  ;;  %5915 = vmatprep.mubr.bf16.mxu1 %v12395_v28 }
 0x468   : > { %6466 = vmatpush1.bf16.msra.mxu0 %v10899_v3  ;;  %6659 = vmatpush1.bf16.msra.mxu1 %v10902_v34  ;;  %v10956_v3 = vld [vmem:[#allocation4 + $0x5e8] ss:$16 sps:$4 sm:$0xff]   ;;  %v13135_v34 = vld [vmem:[#allocation16_spill] sm:$0xff] }
 0x469   : > { %6467 = vmatprep.subr.bf16.mxu0 %v10907_v52  ;;  %6660 = vmatprep.subr.bf16.mxu1 %v10910_v38  ;;  %v13136_v52 = vld [vmem:[#allocation15_spill] sm:$0xff]  ;;  %v13137_v38 = vld [vmem:[#allocation18_spill] sm:$0xff] }
 0x46c   : > { %6468 = vmatpush1.bf16.msra.mxu0 %v10905_v9  ;;  %6661 = vmatpush1.bf16.msra.mxu1 %v10908_v31  ;;  %v13138_v9 = vld [vmem:[#allocation17_spill] sm:$0xff]  ;;  %v10959_v31 = vld [vmem:[#allocation7 + $0xc0] sm:$0xff]  }
 0x46d   : > { %6469 = vmatprep.subr.bf16.mxu0 %v10913_v57  ;;  %6662 = vmatprep.subr.bf16.mxu1 %v10916_v12  ;;  %v10961_v57 = vld [vmem:[#allocation7 + $0x40] sm:$0xff]  }
 0x46e   : > { %5723 = vmatmul.mubr.bf16.gmra.mrb[144].mxu0 %v12387_v21  ;;  %5916 = vmatmul.mubr.bf16.gmra.mrb[144].mxu1 %v12387_v21  ;;  %v10960_v12 = vld [vmem:[#allocation7 + $0x80] sm:$0xff]  }
 0x46f   : > { %5732 = vmatprep.mubr.bf16.mxu0 %v12423_v1  ;;  %5925 = vmatprep.mubr.bf16.mxu1 %v12423_v1 }
 0x470   : > { %6470 = vmatpush1.bf16.msra.mxu0 %v10911_v59  ;;  %6663 = vmatpush1.bf16.msra.mxu1 %v10914_v41  ;;  %v10962_v59 = vld [vmem:[#allocation7] sm:$0xff]   ;;  %v10963_v41 = vld [vmem:[#allocation7 + $0xc8] sm:$0xff]  }
 0x471   : > { %6471 = vmatprep.subr.bf16.mxu0 %v10919_v49  ;;  %6664 = vmatprep.subr.bf16.mxu1 %v10922_v8  ;;  %v10965_v49 = vld [vmem:[#allocation7 + $0x48] sm:$0xff]  }
 0x472   : > { %v10964_v8 = vld [vmem:[#allocation7 + $0x88] sm:$0xff]  }
 0x474   : > { %6472 = vmatpush1.bf16.msra.mxu0 %v10917_v61  ;;  %6665 = vmatpush1.bf16.msra.mxu1 %v10920_v44  ;;  %v10966_v61 = vld [vmem:[#allocation7 + $0x8] sm:$0xff]   ;;  %v10969_v44 = vld [vmem:[#allocation7 + $0x50] sm:$0xff]  }
 0x475   : > { %6473 = vmatprep.subr.bf16.mxu0 %v10925_v20  ;;  %6666 = vmatprep.subr.bf16.mxu1 %v10928_v63  ;;  %v10968_v20 = vld [vmem:[#allocation7 + $0x90] sm:$0xff]  }
 0x476   : > { %5733 = vmatmul.mubr.bf16.gmra.mrb[148].mxu0 %v12418_v39  ;;  %5926 = vmatmul.mubr.bf16.gmra.mrb[148].mxu1 %v12418_v39  ;;  %v10970_v63 = vld [vmem:[#allocation7 + $0x10] sm:$0xff]  }
 0x477   : > { %5742 = vmatprep.mubr.bf16.mxu0 %v12447_v32  ;;  %5935 = vmatprep.mubr.bf16.mxu1 %v12447_v32 }
 0x478   : > { %6474 = vmatpush1.bf16.msra.mxu0 %v10923_v6  ;;  %6667 = vmatpush1.bf16.msra.mxu1 %v10926_v55  ;;  %v10971_v6 = vld [vmem:[#allocation7 + $0xd8] sm:$0xff]  }
 0x479   : > { %6475 = vmatprep.subr.bf16.mxu0 %v10931_v17  ;;  %6668 = vmatprep.subr.bf16.mxu1 %v10934_v40  ;;  %v10974_v55 = vld [vmem:[#allocation7 + $0x18] sm:$0xff]   ;;  %v10975_v17 = vld [vmem:[#allocation7 + $0xe0] sm:$0xff]  }
 0x47a   : > { %v10977_v40 = vld [vmem:[#allocation7 + $0x60] sm:$0xff]  }
 0x47c   : > { %6476 = vmatpush1.bf16.msra.mxu0 %v10929_v0  ;;  %6669 = vmatpush1.bf16.msra.mxu1 %v10932_v36  ;;  %v10976_v0 = vld [vmem:[#allocation7 + $0xa0] sm:$0xff]  }
 0x47d   : > { %6477 = vmatprep.subr.bf16.mxu0 %v10937_v33  ;;  %6670 = vmatprep.subr.bf16.mxu1 %v10940_v22  ;;  %v10978_v36 = vld [vmem:[#allocation7 + $0x20] sm:$0xff]   ;;  %v10979_v33 = vld [vmem:[#allocation7 + $0xe8] sm:$0xff]  }
 0x47e   : > { %5743 = vmatmul.mubr.bf16.gmra.mrb[152].mxu0 %v12442_v16  ;;  %5936 = vmatmul.mubr.bf16.gmra.mrb[152].mxu1 %v12442_v16  ;;  %v10982_v22 = vld [vmem:[#allocation7 + $0x28] sm:$0xff]  }
 0x47f   : > { %5752 = vmatprep.mubr.bf16.mxu0 %v12471_v18  ;;  %5945 = vmatprep.mubr.bf16.mxu1 %v12471_v18 }
 0x480   : > { %6478 = vmatpush1.bf16.msra.mxu0 %v10935_v54  ;;  %6671 = vmatpush1.bf16.msra.mxu1 %v10938_v14 }
 0x481   : > { %6479 = vmatprep.subr.bf16.mxu0 %v10943_v26  ;;  %6672 = vmatprep.subr.bf16.mxu1 %v10946_v53 }
 0x484   : > { %6480 = vmatpush1.bf16.msra.mxu0 %v10941_v56  ;;  %6673 = vmatpush1.bf16.msra.mxu1 %v10944_v15 }
 0x485   : > { %6481 = vmatprep.subr.bf16.mxu0 %v10949_v24  ;;  %6674 = vmatprep.subr.bf16.mxu1 %v10952_v30 }
 0x486   : > { %5753 = vmatmul.mubr.bf16.gmra.mrb[156].mxu0 %v12466_v46  ;;  %5946 = vmatmul.mubr.bf16.gmra.mrb[156].mxu1 %v12466_v46 }
 0x487   : > { %5762 = vmatprep.mubr.bf16.mxu0 %v12495_v5  ;;  %5955 = vmatprep.mubr.bf16.mxu1 %v12495_v5 }
 0x488   : > { %6482 = vmatpush1.bf16.msra.mxu0 %v10947_v10  ;;  %6675 = vmatpush1.bf16.msra.mxu1 %v10950_v19 }
 0x489   : > { %6483 = vmatprep.subr.bf16.mxu0 %v10955_v13  ;;  %6676 = vmatprep.subr.bf16.mxu1 %v10958_v58 }
 0x48c   : > { %6484 = vmatpush1.bf16.msra.mxu0 %v10953_v45  ;;  %6677 = vmatpush1.bf16.msra.mxu1 %v10956_v3 }
 0x48d   : > { %9520 = vmatprep.subr.bf16.mxu0 %v10959_v31  ;;  %9542 = vmatprep.subr.bf16.mxu1 %v10961_v57 }
 0x48e   : > { %5763 = vmatmul.mubr.bf16.gmra.mrb[160].mxu0 %v12490_v11  ;;  %5956 = vmatmul.mubr.bf16.gmra.mrb[160].mxu1 %v12490_v11 }
 0x48f   : > { %5772 = vmatprep.mubr.bf16.mxu0 %v12516_v43  ;;  %5965 = vmatprep.mubr.bf16.mxu1 %v12516_v43 }
 0x496   : > { %5773 = vmatmul.mubr.bf16.gmra.mrb[164].mxu0 %v12513_v48  ;;  %5966 = vmatmul.mubr.bf16.gmra.mrb[164].mxu1 %v12513_v48 }
 0x497   : > { %5782 = vmatprep.mubr.bf16.mxu0 %v12540_v7  ;;  %5975 = vmatprep.mubr.bf16.mxu1 %v12540_v7 }
 0x49e   : > { %5783 = vmatmul.mubr.bf16.gmra.mrb[168].mxu0 %v12537_v29  ;;  %5976 = vmatmul.mubr.bf16.gmra.mrb[168].mxu1 %v12537_v29 }
 0x49f   : > { %5792 = vmatprep.mubr.bf16.mxu0 %v12564_v4  ;;  %5985 = vmatprep.mubr.bf16.mxu1 %v12564_v4 }
 0x4a6   : > { %5793 = vmatmul.mubr.bf16.gmra.mrb[172].mxu0 %v12561_v2  ;;  %5986 = vmatmul.mubr.bf16.gmra.mrb[172].mxu1 %v12561_v2 }
 0x4a7   : > { %5802 = vmatprep.mubr.bf16.mxu0 %v12588_v37  ;;  %5995 = vmatprep.mubr.bf16.mxu1 %v12588_v37 }
 0x4ae   : > { %5803 = vmatmul.mubr.bf16.gmra.mrb[176].mxu0 %v12585_v25  ;;  %5996 = vmatmul.mubr.bf16.gmra.mrb[176].mxu1 %v12585_v25 }
 0x4af   : > { %5812 = vmatprep.mubr.bf16.mxu0 %v13135_v34  ;;  %6005 = vmatprep.mubr.bf16.mxu1 %v13135_v34 }
 0x4b6   : > { %5813 = vmatmul.mubr.bf16.gmra.mrb[180].mxu0 %v13136_v52  ;;  %6006 = vmatmul.mubr.bf16.gmra.mrb[180].mxu1 %v13136_v52 }
 0x4b7   : > { %5822 = vmatprep.mubr.bf16.mxu0 %v13137_v38  ;;  %6015 = vmatprep.mubr.bf16.mxu1 %v13137_v38 }
 0x4be   : > { %5823 = vmatmul.mubr.bf16.gmra.mrb[184].mxu0 %v13138_v9  ;;  %6016 = vmatmul.mubr.bf16.gmra.mrb[184].mxu1 %v13138_v9 }
 0x4bf   : > { %5832 = vmatprep.mubr.bf16.mxu0 %v12660_v51  ;;  %6025 = vmatprep.mubr.bf16.mxu1 %v12660_v51 }
 0x4c6   : > { %5833 = vmatmul.mubr.bf16.gmra.mrb[188].mxu0 %v12657_v42  ;;  %6026 = vmatmul.mubr.bf16.gmra.mrb[188].mxu1 %v12657_v42 }
 0x4c7   : > { %6485 = vmatprep.mubr.bf16.mxu0 %v12306_v27  ;;  %6678 = vmatprep.mubr.bf16.mxu1 %v12306_v27  ;;  %v10967_v27 = vld [vmem:[#allocation7 + $0xd0] sm:$0xff]  }
 0x4ce   : > { %6486 = vmatmul.mubr.bf16.vlgmr.msra.gmra.mrb[128].mxu0 %v12303_v23  ;;  %6679 = vmatmul.mubr.bf16.vlgmr.msra.gmra.mrb[128].mxu1 %v12303_v23  ;;  %v10973_v23 = vld [vmem:[#allocation7 + $0x58] sm:$0xff]  }
 0x4cf   : > { %6495 = vmatprep.mubr.bf16.mxu0 %v12345_v62  ;;  %6688 = vmatprep.mubr.bf16.mxu1 %v12345_v62  ;;  %v10972_v62 = vld [vmem:[#allocation7 + $0x98] sm:$0xff]  }
 0x4d0   : > { %9521 = vmatpush3.bf16.msra.mxu0 %v10960_v12  ;;  %9543 = vmatpush3.bf16.msra.mxu1 %v10962_v59 }
 0x4d1   : > { %9522 = vmatprep.subr.bf16.mxu0 %v10963_v41  ;;  %9544 = vmatprep.subr.bf16.mxu1 %v10965_v49 }
 0x4d4   : > { %9523 = vmatpush3.bf16.msra.mxu0 %v10964_v8  ;;  %9545 = vmatpush3.bf16.msra.mxu1 %v10966_v61 }
 0x4d5   : > { %9524 = vmatprep.subr.bf16.mxu0 %v10967_v27  ;;  %9546 = vmatprep.subr.bf16.mxu1 %v10969_v44 }
 0x4d6   : > { %6496 = vmatmul.mubr.bf16.gmra.mrb[132].mxu0 %v12337_v50  ;;  %6689 = vmatmul.mubr.bf16.gmra.mrb[132].mxu1 %v12337_v50  ;;  %v10981_v50 = vld [vmem:[#allocation7 + $0x68] sm:$0xff]  }
 0x4d7   : > { %6505 = vmatprep.mubr.bf16.mxu0 %v12395_v28  ;;  %6698 = vmatprep.mubr.bf16.mxu1 %v12395_v28  ;;  %v10980_v28 = vld [vmem:[#allocation7 + $0xa8] sm:$0xff]  }
 0x4d8   : > { %9525 = vmatpush3.bf16.msra.mxu0 %v10968_v20  ;;  %9547 = vmatpush3.bf16.msra.mxu1 %v10970_v63 }
 0x4d9   : > { %9526 = vmatprep.subr.bf16.mxu0 %v10971_v6  ;;  %9548 = vmatprep.subr.bf16.mxu1 %v10973_v23 }
 0x4dc   : > { %9527 = vmatpush3.bf16.msra.mxu0 %v10972_v62  ;;  %9549 = vmatpush3.bf16.msra.mxu1 %v10974_v55 }
 0x4dd   : > { %9528 = vmatprep.subr.bf16.mxu0 %v10975_v17  ;;  %9550 = vmatprep.subr.bf16.mxu1 %v10977_v40 }
 0x4de   : > { %6506 = vmatmul.mubr.bf16.gmra.mrb[136].mxu0 %v12387_v21  ;;  %6699 = vmatmul.mubr.bf16.gmra.mrb[136].mxu1 %v12387_v21  ;;  %v10983_v21 = vld [vmem:[#allocation7 + $0xf0] sm:$0xff]  }
 0x4df   : > { %6515 = vmatprep.mubr.bf16.mxu0 %v12423_v1  ;;  %6708 = vmatprep.mubr.bf16.mxu1 %v12423_v1  ;;  %v10984_v1 = vld [vmem:[#allocation7 + $0xb0] sm:$0xff]  }
 0x4e0   : > { %9529 = vmatpush3.bf16.msra.mxu0 %v10976_v0  ;;  %9551 = vmatpush3.bf16.msra.mxu1 %v10978_v36 }
 0x4e1   : > { %9530 = vmatprep.subr.bf16.mxu0 %v10979_v33  ;;  %9552 = vmatprep.subr.bf16.mxu1 %v10981_v50 }
 0x4e4   : > { %9531 = vmatpush3.bf16.msra.mxu0 %v10980_v28  ;;  %9553 = vmatpush3.bf16.msra.mxu1 %v10982_v22 }
 0x4e5   : > { %9532 = vmatprep.subr.bf16.mxu0 %v10983_v21 }
 0x4e6   : > { %6516 = vmatmul.mubr.bf16.gmra.mrb[140].mxu0 %v12418_v39  ;;  %6709 = vmatmul.mubr.bf16.gmra.mrb[140].mxu1 %v12418_v39  ;;  %v10985_v39 = vld [vmem:[#allocation7 + $0x70] sm:$0xff]  }
 0x4e7   : > { %6525 = vmatprep.mubr.bf16.mxu0 %v12447_v32  ;;  %6718 = vmatprep.mubr.bf16.mxu1 %v12447_v32  ;;  %v10987_v32 = vld [vmem:[#allocation7 + $0x78] sm:$0xff]  }
 0x4e8   : > { %9554 = vmatprep.subr.bf16.mxu1 %v10985_v39  ;;  %9533 = vmatpush3.bf16.msra.mxu0 %v10984_v1 }
 0x4ee   : > { %6526 = vmatmul.mubr.bf16.gmra.mrb[144].mxu0 %v12442_v16  ;;  %6719 = vmatmul.mubr.bf16.gmra.mrb[144].mxu1 %v12442_v16  ;;  %v10986_v16 = vld [vmem:[#allocation7 + $0x30] sm:$0xff]  }
 0x4ef   : > { %6535 = vmatprep.mubr.bf16.mxu0 %v12471_v18  ;;  %6728 = vmatprep.mubr.bf16.mxu1 %v12471_v18  ;;  %v10989_v18 = vld [vmem:[#allocation7 + $0xf8] sm:$0xff]  }
 0x4f0   : > { %9555 = vmatpush3.bf16.msra.mxu1 %v10986_v16  ;;  %9534 = vmatprep.subr.bf16.mxu0 %v10989_v18 }
 0x4f1   : > { %9556 = vmatprep.subr.bf16.mxu1 %v10987_v32 }
 0x4f6   : > { %6536 = vmatmul.mubr.bf16.gmra.mrb[148].mxu0 %v12466_v46  ;;  %6729 = vmatmul.mubr.bf16.gmra.mrb[148].mxu1 %v12466_v46  ;;  %v10988_v46 = vld [vmem:[#allocation7 + $0x38] sm:$0xff]  }
 0x4f7   : > { %6545 = vmatprep.mubr.bf16.mxu0 %v12495_v5  ;;  %6738 = vmatprep.mubr.bf16.mxu1 %v12495_v5  ;;  %v10991_v5 = vld [vmem:[#allocation7 + $0x140] sm:$0xff]  }
 0x4f8   : > { %9557 = vmatpush3.bf16.msra.mxu1 %v10988_v46 }
 0x4fe   : > { %6546 = vmatmul.mubr.bf16.gmra.mrb[152].mxu0 %v12490_v11  ;;  %6739 = vmatmul.mubr.bf16.gmra.mrb[152].mxu1 %v12490_v11  ;;  %v10990_v11 = vld [vmem:[#allocation7 + $0xb8] sm:$0xff]  }
 0x4ff   : > { %6555 = vmatprep.mubr.bf16.mxu0 %v12516_v43  ;;  %6748 = vmatprep.mubr.bf16.mxu1 %v12516_v43  ;;  %v6967_v43 = vld [vmem:[%s13096_s4] sm:$0xf] }
 0x500   : > { %9535 = vmatpush3.bf16.msra.mxu0 %v10990_v11 }
 0x501   : > { %9564 = vmatprep.subr.bf16.mxu0 %v10991_v5 }
 0x506   : > { %6556 = vmatmul.mubr.bf16.gmra.mrb[156].mxu0 %v12513_v48  ;;  %6749 = vmatmul.mubr.bf16.gmra.mrb[156].mxu1 %v12513_v48  ;;  %v10993_v48 = vld [vmem:[#allocation7 + $0x1c0] sm:$0xff]  }
 0x507   : > { %6565 = vmatprep.mubr.bf16.mxu0 %v12540_v7  ;;  %6758 = vmatprep.mubr.bf16.mxu1 %v12540_v7  ;;  %v13139_v7 = vld [vmem:[#allocation14_spill] sm:$0xff] }
 0x508   : > { %9586 = vmatprep.subr.bf16.mxu1 %v10993_v48 }
 0x50e   : > { %6566 = vmatmul.mubr.bf16.gmra.mrb[160].mxu0 %v12537_v29  ;;  %6759 = vmatmul.mubr.bf16.gmra.mrb[160].mxu1 %v12537_v29 }
 0x50f   : > { %6575 = vmatprep.mubr.bf16.mxu0 %v12564_v4  ;;  %6768 = vmatprep.mubr.bf16.mxu1 %v12564_v4 }
 0x516   : > { %6576 = vmatmul.mubr.bf16.gmra.mrb[164].mxu0 %v12561_v2  ;;  %6769 = vmatmul.mubr.bf16.gmra.mrb[164].mxu1 %v12561_v2  ;;  %v13140_v2 = vsub.s32 0, %v13139_v7 }
 0x517   : > { %6585 = vmatprep.mubr.bf16.mxu0 %v12588_v37  ;;  %6778 = vmatprep.mubr.bf16.mxu1 %v12588_v37  ;;  %v13141_v37 = vsub.s32 2, %v13139_v7 }
 0x518   : > { %v12822_v4 = vrot.slane %v6967_v43, %v13140_v2 }
 0x51e   : > { %6586 = vmatmul.mubr.bf16.gmra.mrb[168].mxu0 %v12585_v25  ;;  %6779 = vmatmul.mubr.bf16.gmra.mrb[168].mxu1 %v12585_v25 }
 0x51f   : > { %6595 = vmatprep.mubr.bf16.mxu0 %v13135_v34  ;;  %6788 = vmatprep.mubr.bf16.mxu1 %v13135_v34 }
 0x526   : > { %6596 = vmatmul.mubr.bf16.gmra.mrb[172].mxu0 %v13136_v52  ;;  %6789 = vmatmul.mubr.bf16.gmra.mrb[172].mxu1 %v13136_v52 }
 0x527   : > { %6605 = vmatprep.mubr.bf16.mxu0 %v13137_v38  ;;  %6798 = vmatprep.mubr.bf16.mxu1 %v13137_v38 }
 0x52e   : > { %6606 = vmatmul.mubr.bf16.gmra.mrb[176].mxu0 %v13138_v9  ;;  %6799 = vmatmul.mubr.bf16.gmra.mrb[176].mxu1 %v13138_v9 }
 0x52f   : > { %6615 = vmatprep.mubr.bf16.mxu0 %v12660_v51  ;;  %6808 = vmatprep.mubr.bf16.mxu1 %v12660_v51  ;;  %v13142_v51 = vsub.s32 1, %v13139_v7 }
 0x536   : > { %6616 = vmatmul.mubr.bf16.gmra.mrb[180].mxu0 %v12657_v42  ;;  %6809 = vmatmul.mubr.bf16.gmra.mrb[180].mxu1 %v12657_v42  ;;  %v12826_v42 = vrot.slane %v6967_v43, %v13141_v37 }
 0x537   : > { %6625 = vmatprep.mubr.bf16.mxu0 %v12683_v47  ;;  %6818 = vmatprep.mubr.bf16.mxu1 %v12683_v47  ;;  %v13143_v47 = vsub.s32 3, %v13139_v7 }
 0x53e   : > { %6626 = vmatmul.mubr.bf16.gmra.mrb[184].mxu0 %v12681_v35  ;;  %6819 = vmatmul.mubr.bf16.gmra.mrb[184].mxu1 %v12681_v35  ;;  %v12830_v35 = vrot.slane %v6967_v43, %v13142_v51 }
 0x53f   : > { %6635 = vmatprep.mubr.bf16.mxu0 %v13134_v60  ;;  %6828 = vmatprep.mubr.bf16.mxu1 %v13134_v60 }
 0x546   : > { %6636 = vmatmul.mubr.bf16.gmra.mrb[188].mxu0 %v13134_v60  ;;  %6829 = vmatmul.mubr.bf16.gmra.mrb[188].mxu1 %v13134_v60  ;;  %v12834_v60 = vrot.slane %v6967_v43, %v13143_v47 }
 0x5a1   : > { %v6487_v29 = vpop.f32.mrb[128].mxu0  ;;  %v6680_v25 = vpop.f32.mrb[128].mxu1 }
 0x5a2   : > { %v6489_v54 = vpop.f32.mrb[129].mxu0  ;;  %v6682_v14 = vpop.f32.mrb[129].mxu1  ;;  %v6989_v24 = vadd.f32 %v12822_v4, %v6487_v29  ;;  %v6991_v30 = vadd.f32 %v12826_v42, %v6680_v25 }
 0x5a3   : > { %v6491_v26 = vpop.f32.mrb[130].mxu0  ;;  %v6684_v53 = vpop.f32.mrb[130].mxu1  ;;  %v6990_v10 = vadd.f32 %v12830_v35, %v6489_v54  ;;  %v6992_v19 = vadd.f32 %v12834_v60, %v6682_v14 }
 0x5a4   : > { %v6493_v56 = vpop.f32.mrb[131].mxu0  ;;  %v6686_v15 = vpop.f32.mrb[131].mxu1  ;;  %v6993_v13 = vadd.f32 %v12822_v4, %v6491_v26  ;;  %v6995_v58 = vadd.f32 %v12826_v42, %v6684_v53  ;;  %v7117_v34 = vmax.f32 %v6989_v24, 0.0  ;;  %v7119_v52 = vmax.f32 %v6991_v30, 0.0 }
 0x5a5   : > { %v6994_v45 = vadd.f32 %v12830_v35, %v6493_v56  ;;  %v6996_v3 = vadd.f32 %v12834_v60, %v6686_v15  ;;  %v7118_v38 = vmax.f32 %v6990_v10, 0.0  ;;  %v7120_v9 = vmax.f32 %v6992_v19, 0.0 }
 0x5a6   : > { %v7121_v12 = vmax.f32 %v6993_v13, 0.0  ;;  %v7123_v59 = vmax.f32 %v6995_v58, 0.0 }
 0x5a7   : > { %v7122_v27 = vmax.f32 %v6994_v45, 0.0  ;;  %v7124_v44 = vmax.f32 %v6996_v3, 0.0 }
 0x5a9   : > { %v6497_v31 = vpop.f32.mrb[132].mxu0  ;;  %v6690_v57 = vpop.f32.mrb[132].mxu1 }
 0x5aa   : > { %v6997_v41 = vadd.f32 %v12822_v4, %v6497_v31  ;;  %v6999_v49 = vadd.f32 %v12826_v42, %v6690_v57  ;;  %v6499_v8 = vpop.f32.mrb[133].mxu0  ;;  %v6692_v61 = vpop.f32.mrb[133].mxu1 }
 0x5ab   : > { %v6998_v20 = vadd.f32 %v12830_v35, %v6499_v8  ;;  %v7000_v63 = vadd.f32 %v12834_v60, %v6692_v61  ;;  %v6501_v6 = vpop.f32.mrb[134].mxu0  ;;  %v6694_v23 = vpop.f32.mrb[134].mxu1 }
 0x5ac   : > { %v7125_v62 = vmax.f32 %v6997_v41, 0.0  ;;  %v7127_v55 = vmax.f32 %v6999_v49, 0.0  ;;  %v7001_v17 = vadd.f32 %v12822_v4, %v6501_v6  ;;  %v7003_v40 = vadd.f32 %v12826_v42, %v6694_v23  ;;  %v6503_v0 = vpop.f32.mrb[135].mxu0  ;;  %v6696_v36 = vpop.f32.mrb[135].mxu1  ;;  %v10998_v6 = vld [vmem:[#allocation7 + $0x188] sm:$0xff]  }
 0x5ad   : > { %v7126_v33 = vmax.f32 %v6998_v20, 0.0  ;;  %v7128_v50 = vmax.f32 %v7000_v63, 0.0  ;;  %v7002_v28 = vadd.f32 %v12830_v35, %v6503_v0  ;;  %v7004_v22 = vadd.f32 %v12834_v60, %v6696_v36  ;;  %v11001_v36 = vld [vmem:[#allocation7 + $0x1d0] sm:$0xff]  }
 0x5ae   : > { %v7245_v21 = vmax.f32 %v7117_v34, %v7125_v62  ;;  %v7247_v39 = vmax.f32 %v7119_v52, %v7127_v55  ;;  %v7129_v1 = vmax.f32 %v7001_v17, 0.0  ;;  %v7131_v16 = vmax.f32 %v7003_v40, 0.0  ;;  %v10994_v34 = vld [vmem:[#allocation7 + $0x180] sm:$0xff]  }
 0x5af   : > { %v7246_v32 = vmax.f32 %v7118_v38, %v7126_v33  ;;  %v7248_v46 = vmax.f32 %v7120_v9, %v7128_v50  ;;  %v7130_v18 = vmax.f32 %v7002_v28, 0.0  ;;  %v7132_v11 = vmax.f32 %v7004_v22, 0.0  ;;  %v10997_v9 = vld [vmem:[#allocation7 + $0x1c8] sm:$0xff]  }
 0x5b0   : > { %v7309_v5 = vmax.f32 %v7245_v21, %v7247_v39  ;;  %v7249_v48 = vmax.f32 %v7121_v12, %v7129_v1  ;;  %v7251_v43 = vmax.f32 %v7123_v59, %v7131_v16 }
 0x5b1   : > { %v7310_v29 = vmax.f32 %v7246_v32, %v7248_v46  ;;  %v7250_v7 = vmax.f32 %v7122_v27, %v7130_v18  ;;  %v7252_v2 = vmax.f32 %v7124_v44, %v7132_v11  ;;  %v6507_v25 = vpop.f32.mrb[136].mxu0  ;;  %v6700_v37 = vpop.f32.mrb[136].mxu1 }
 0x5b2   : > { %v7311_v51 = vmax.f32 %v7249_v48, %v7251_v43  ;;  %v6509_v47 = vpop.f32.mrb[137].mxu0  ;;  %v6702_v54 = vpop.f32.mrb[137].mxu1  ;;  %v7005_v30 = vadd.f32 %v12822_v4, %v6507_v25  ;;  %v7007_v10 = vadd.f32 %v12826_v42, %v6700_v37  ;;  %v11002_v43 = vld [vmem:[#allocation7 + $0x190] sm:$0xff]   ;;  %v11005_v37 = vld [vmem:[#allocation7 + $0x1d8] sm:$0xff]  }
 0x5b3   : > { %v7312_v14 = vmax.f32 %v7250_v7, %v7252_v2  ;;  %v6511_v26 = vpop.f32.mrb[138].mxu0  ;;  %v6704_v53 = vpop.f32.mrb[138].mxu1  ;;  %v7006_v19 = vadd.f32 %v12830_v35, %v6509_v47  ;;  %v7008_v13 = vadd.f32 %v12834_v60, %v6702_v54 }
 0x5b4   : > { %v7341_v56 = vpack.c.bf16 %v7311_v51, %v7309_v5  ;;  %v6513_v15 = vpop.f32.mrb[139].mxu0  ;;  %v6706_v24 = vpop.f32.mrb[139].mxu1  ;;  %v7009_v58 = vadd.f32 %v12822_v4, %v6511_v26  ;;  %v7011_v45 = vadd.f32 %v12826_v42, %v6704_v53  ;;  %v7133_v31 = vmax.f32 %v7005_v30, 0.0 }
 0x5b5   : > { %v7342_v3 = vpack.c.bf16 %v7312_v14, %v7310_v29  ;;  %v7010_v52 = vadd.f32 %v12830_v35, %v6513_v15  ;;  %v7012_v38 = vadd.f32 %v12834_v60, %v6706_v24  ;;  %v7135_v57 = vmax.f32 %v7007_v10, 0.0 }
 0x5b6   : > { %v7134_v12 = vmax.f32 %v7006_v19, 0.0  ;;  %v7136_v59 = vmax.f32 %v7008_v13, 0.0  ;;  %v7137_v8 = vmax.f32 %v7009_v58, 0.0  ;;  %v7139_v61 = vmax.f32 %v7011_v45, 0.0  ;;  %v11006_v19 = vld [vmem:[#allocation7 + $0x198] sm:$0xff]  }
 0x5b7   : > { %7687 = vmatprep.mubr.bf16.mxu1 %v7342_v3  ;;  %v7138_v23 = vmax.f32 %v7010_v52, 0.0  ;;  %v7140_v62 = vmax.f32 %v7012_v38, 0.0  ;;  %v11009_v3 = vld [vmem:[#allocation7 + $0x1e0] sm:$0xff]  }
 0x5b8   : > { %7688 = vmatmul.mubr.bf16.vlgmr.msra.gmra.mrb[192].mxu1 %v7341_v56 }
 0x5b9   : > { %v6517_v41 = vpop.f32.mrb[140].mxu0  ;;  %v6710_v49 = vpop.f32.mrb[140].mxu1  ;;  %9587 = vmatpush3.bf16.msra.mxu1 %v10994_v34 }
 0x5ba   : > { %v7013_v27 = vadd.f32 %v12822_v4, %v6517_v41  ;;  %v7015_v44 = vadd.f32 %v12826_v42, %v6710_v49  ;;  %v6519_v20 = vpop.f32.mrb[141].mxu0  ;;  %v6712_v63 = vpop.f32.mrb[141].mxu1  ;;  %9588 = vmatprep.subr.bf16.mxu1 %v10997_v9 }
 0x5bb   : > { %v7014_v55 = vadd.f32 %v12830_v35, %v6519_v20  ;;  %v7016_v17 = vadd.f32 %v12834_v60, %v6712_v63  ;;  %v6521_v40 = vpop.f32.mrb[142].mxu0  ;;  %v6714_v0 = vpop.f32.mrb[142].mxu1  ;;  %v10995_v20 = vld [vmem:[#allocation7 + $0x148] sm:$0xff]  }
 0x5bc   : > { %v7141_v33 = vmax.f32 %v7013_v27, 0.0  ;;  %v7143_v50 = vmax.f32 %v7015_v44, 0.0  ;;  %v7017_v28 = vadd.f32 %v12822_v4, %v6521_v40  ;;  %v7019_v22 = vadd.f32 %v12826_v42, %v6714_v0  ;;  %v6523_v21 = vpop.f32.mrb[143].mxu0  ;;  %v6716_v39 = vpop.f32.mrb[143].mxu1  ;;  %v11013_v63 = vld [vmem:[#allocation7 + $0x1e8] sm:$0xff]  }
 0x5bd   : > { %v7142_v1 = vmax.f32 %v7014_v55, 0.0  ;;  %v7144_v16 = vmax.f32 %v7016_v17, 0.0  ;;  %v7018_v32 = vadd.f32 %v12830_v35, %v6523_v21  ;;  %v7020_v46 = vadd.f32 %v12834_v60, %v6716_v39  ;;  %9589 = vmatpush3.bf16.msra.mxu1 %v10998_v6  ;;  %v10996_v21 = vld [vmem:[#allocation7 + $0x108] sm:$0xff]  }
 0x5be   : > { %v7253_v18 = vmax.f32 %v7133_v31, %v7141_v33  ;;  %v7255_v11 = vmax.f32 %v7135_v57, %v7143_v50  ;;  %v7145_v5 = vmax.f32 %v7017_v28, 0.0  ;;  %v7147_v48 = vmax.f32 %v7019_v22, 0.0  ;;  %9590 = vmatprep.subr.bf16.mxu1 %v11001_v36  ;;  %v11014_v39 = vld [vmem:[#allocation7 + $0x1a8] sm:$0xff]  }
 0x5bf   : > { %v7254_v29 = vmax.f32 %v7134_v12, %v7142_v1  ;;  %v7256_v7 = vmax.f32 %v7136_v59, %v7144_v16  ;;  %v7146_v2 = vmax.f32 %v7018_v32, 0.0  ;;  %v7148_v25 = vmax.f32 %v7020_v46, 0.0 }
 0x5c0   : > { %v7313_v51 = vmax.f32 %v7253_v18, %v7255_v11  ;;  %v7257_v47 = vmax.f32 %v7137_v8, %v7145_v5  ;;  %v7259_v54 = vmax.f32 %v7139_v61, %v7147_v48  ;;  %v10992_v8 = vld [vmem:[#allocation7 + $0x100] sm:$0xff]   ;;  %v10999_v5 = vld [vmem:[#allocation7 + $0x150] sm:$0xff]  }
 0x5c1   : > { %v7314_v14 = vmax.f32 %v7254_v29, %v7256_v7  ;;  %v7258_v26 = vmax.f32 %v7138_v23, %v7146_v2  ;;  %v7260_v53 = vmax.f32 %v7140_v62, %v7148_v25  ;;  %v6527_v56 = vpop.f32.mrb[144].mxu0  ;;  %v6720_v15 = vpop.f32.mrb[144].mxu1  ;;  %9591 = vmatpush3.bf16.msra.mxu1 %v11002_v43  ;;  %v11010_v61 = vld [vmem:[#allocation7 + $0x1a0] sm:$0xff]   ;;  %v11017_v48 = vld [vmem:[#allocation7 + $0x1f0] sm:$0xff]  }
 0x5c2   : > { %v7315_v24 = vmax.f32 %v7257_v47, %v7259_v54  ;;  %v6529_v30 = vpop.f32.mrb[145].mxu0  ;;  %v6722_v10 = vpop.f32.mrb[145].mxu1  ;;  %9592 = vmatprep.subr.bf16.mxu1 %v11005_v37  ;;  %v7021_v9 = vadd.f32 %v12822_v4, %v6527_v56  ;;  %v7023_v31 = vadd.f32 %v12826_v42, %v6720_v15 }
 0x5c3   : > { %v7316_v13 = vmax.f32 %v7258_v26, %v7260_v53  ;;  %v6531_v58 = vpop.f32.mrb[146].mxu0  ;;  %v6724_v45 = vpop.f32.mrb[146].mxu1  ;;  %v7022_v57 = vadd.f32 %v12830_v35, %v6529_v30  ;;  %v7024_v12 = vadd.f32 %v12834_v60, %v6722_v10  ;;  %v11018_v30 = vld [vmem:[#allocation7 + $0x1b0] sm:$0xff]  }
 0x5c4   : > { %v7343_v34 = vpack.c.bf16 %v7315_v24, %v7313_v51  ;;  %v6533_v52 = vpop.f32.mrb[147].mxu0  ;;  %v6726_v38 = vpop.f32.mrb[147].mxu1  ;;  %v12873_v59 = vadd.f32 %v12822_v4, %v6531_v58  ;;  %v12876_v41 = vadd.f32 %v12826_v42, %v6724_v45  ;;  %v7149_v6 = vmax.f32 %v7021_v9, 0.0  ;;  %v11000_v24 = vld [vmem:[#allocation7 + $0x110] sm:$0xff]   ;;  %v11003_v45 = vld [vmem:[#allocation7 + $0x158] sm:$0xff]  }
 0x5c5   : > { %v7344_v49 = vpack.c.bf16 %v7316_v13, %v7314_v14  ;;  %9593 = vmatpush3.bf16.msra.mxu1 %v11006_v19  ;;  %v12879_v27 = vadd.f32 %v12830_v35, %v6533_v52  ;;  %v12882_v44 = vadd.f32 %v12834_v60, %v6726_v38  ;;  %v7151_v23 = vmax.f32 %v7023_v31, 0.0 }
 0x5c6   : > { %9594 = vmatprep.subr.bf16.mxu1 %v11009_v3  ;;  %v7150_v62 = vmax.f32 %v7022_v57, 0.0  ;;  %v7152_v55 = vmax.f32 %v7024_v12, 0.0  ;;  %v7153_v0 = vmax.f32 %v12873_v59, 0.0  ;;  %v7155_v36 = vmax.f32 %v12876_v41, 0.0  ;;  %v11021_v3 = vld [vmem:[#allocation7 + $0x1f8] sm:$0xff]  }
 0x5c7   : > { %7550 = vmatprep.mubr.bf16.mxu0 %v7344_v49  ;;  %v7154_v1 = vmax.f32 %v12879_v27, 0.0  ;;  %v7156_v16 = vmax.f32 %v12882_v44, 0.0  ;;  %v11022_v27 = vld [vmem:[#allocation7 + $0x1b8] sm:$0xff]  }
 0x5c8   : > { %7551 = vmatmul.mubr.bf16.vlgmr.msra.gmra.mrb[192].mxu0 %v7343_v34 }
 0x5c9   : > { %v6537_v17 = vpop.f32.mrb[148].mxu0  ;;  %v6730_v40 = vpop.f32.mrb[148].mxu1  ;;  %9565 = vmatpush3.bf16.msra.mxu0 %v10992_v8  ;;  %9595 = vmatpush3.bf16.msra.mxu1 %v11010_v61  ;;  %v11004_v61 = vld [vmem:[#allocation7 + $0x118] sm:$0xff]  }
 0x5ca   : > { %v7029_v33 = vadd.f32 %v12822_v4, %v6537_v17  ;;  %v7031_v50 = vadd.f32 %v12826_v42, %v6730_v40  ;;  %v6539_v28 = vpop.f32.mrb[149].mxu0  ;;  %v6732_v22 = vpop.f32.mrb[149].mxu1  ;;  %9566 = vmatprep.subr.bf16.mxu0 %v10995_v20  ;;  %9596 = vmatprep.subr.bf16.mxu1 %v11013_v63 }
 0x5cb   : > { %v7030_v32 = vadd.f32 %v12830_v35, %v6539_v28  ;;  %v7032_v46 = vadd.f32 %v12834_v60, %v6732_v22  ;;  %v6541_v18 = vpop.f32.mrb[150].mxu0  ;;  %v6734_v11 = vpop.f32.mrb[150].mxu1 }
 0x5cc   : > { %v7157_v43 = vmax.f32 %v7029_v33, 0.0  ;;  %v7159_v29 = vmax.f32 %v7031_v50, 0.0  ;;  %v7033_v7 = vadd.f32 %v12822_v4, %v6541_v18  ;;  %v7035_v2 = vadd.f32 %v12826_v42, %v6734_v11  ;;  %v6543_v25 = vpop.f32.mrb[151].mxu0  ;;  %v6736_v37 = vpop.f32.mrb[151].mxu1 }
 0x5cd   : > { %v7158_v51 = vmax.f32 %v7030_v32, 0.0  ;;  %v7160_v47 = vmax.f32 %v7032_v46, 0.0  ;;  %v7034_v54 = vadd.f32 %v12830_v35, %v6543_v25  ;;  %v7036_v14 = vadd.f32 %v12834_v60, %v6736_v37  ;;  %9567 = vmatpush3.bf16.msra.mxu0 %v10996_v21  ;;  %9597 = vmatpush3.bf16.msra.mxu1 %v11014_v39  ;;  %v11008_v21 = vld [vmem:[#allocation7 + $0x120] sm:$0xff]  }
 0x5ce   : > { %v7261_v26 = vmax.f32 %v7149_v6, %v7157_v43  ;;  %v7263_v53 = vmax.f32 %v7151_v23, %v7159_v29  ;;  %v7161_v56 = vmax.f32 %v7033_v7, 0.0  ;;  %v7163_v15 = vmax.f32 %v7035_v2, 0.0  ;;  %9568 = vmatprep.subr.bf16.mxu0 %v10999_v5  ;;  %9598 = vmatprep.subr.bf16.mxu1 %v11017_v48  ;;  %v11007_v6 = vld [vmem:[#allocation7 + $0x160] sm:$0xff]  }
 0x5cf   : > { %v7262_v10 = vmax.f32 %v7150_v62, %v7158_v51  ;;  %v7264_v19 = vmax.f32 %v7152_v55, %v7160_v47  ;;  %v7162_v13 = vmax.f32 %v7034_v54, 0.0  ;;  %v7164_v58 = vmax.f32 %v7036_v14, 0.0  ;;  %v11025_v23 = vld [vmem:[#allocation7 + $0x2c0] sm:$0xff]   ;;  %v11012_v51 = vld [vmem:[#allocation7 + $0x128] sm:$0xff]  }
 0x5d0   : > { %v7317_v34 = vmax.f32 %v7261_v26, %v7263_v53  ;;  %v7265_v52 = vmax.f32 %v7153_v0, %v7161_v56  ;;  %v7267_v38 = vmax.f32 %v7155_v36, %v7163_v15  ;;  %v11015_v15 = vld [vmem:[#allocation7 + $0x170] sm:$0xff]  }
 0x5d1   : > { %v7318_v9 = vmax.f32 %v7262_v10, %v7264_v19  ;;  %v7266_v31 = vmax.f32 %v7154_v1, %v7162_v13  ;;  %v7268_v57 = vmax.f32 %v7156_v16, %v7164_v58  ;;  %v6547_v12 = vpop.f32.mrb[152].mxu0  ;;  %v6740_v59 = vpop.f32.mrb[152].mxu1  ;;  %9569 = vmatpush3.bf16.msra.mxu0 %v11000_v24  ;;  %9599 = vmatpush3.bf16.msra.mxu1 %v11018_v30  ;;  %v11011_v16 = vld [vmem:[#allocation7 + $0x168] sm:$0xff]  }
 0x5d2   : > { %v7319_v41 = vmax.f32 %v7265_v52, %v7267_v38  ;;  %v6549_v49 = vpop.f32.mrb[153].mxu0  ;;  %v6742_v8 = vpop.f32.mrb[153].mxu1  ;;  %9570 = vmatprep.subr.bf16.mxu0 %v11003_v45  ;;  %9600 = vmatprep.subr.bf16.mxu1 %v11021_v3  ;;  %v7037_v40 = vadd.f32 %v12822_v4, %v6547_v12  ;;  %v7039_v0 = vadd.f32 %v12826_v42, %v6740_v59  ;;  %v11016_v12 = vld [vmem:[#allocation7 + $0x130] sm:$0xff]  }
 0x5d3   : > { %v7320_v44 = vmax.f32 %v7266_v31, %v7268_v57  ;;  %v6551_v20 = vpop.f32.mrb[154].mxu0  ;;  %v6744_v63 = vpop.f32.mrb[154].mxu1  ;;  %v7038_v36 = vadd.f32 %v12830_v35, %v6549_v49  ;;  %v7040_v33 = vadd.f32 %v12834_v60, %v6742_v8 }
 0x5d4   : > { %v12896_v62 = vpack.c.bf16 %v7319_v41, %v7317_v34  ;;  %v6553_v55 = vpop.f32.mrb[155].mxu0  ;;  %v6746_v17 = vpop.f32.mrb[155].mxu1  ;;  %v7041_v50 = vadd.f32 %v12822_v4, %v6551_v20  ;;  %v7043_v28 = vadd.f32 %v12826_v42, %v6744_v63  ;;  %v7165_v32 = vmax.f32 %v7037_v40, 0.0 }
 0x5d5   : > { %9571 = vmatpush3.bf16.msra.mxu0 %v11004_v61  ;;  %v7346_v22 = vpack.c.bf16 %v7320_v44, %v7318_v9  ;;  %9601 = vmatpush3.bf16.msra.mxu1 %v11022_v27  ;;  %v7042_v39 = vadd.f32 %v12830_v35, %v6553_v55  ;;  %v7044_v1 = vadd.f32 %v12834_v60, %v6746_v17  ;;  %v7167_v46 = vmax.f32 %v7039_v0, 0.0  ;;  %v11019_v61 = vld [vmem:[#allocation7 + $0x178] sm:$0xff]  }
 0x5d6   : > { %9572 = vmatprep.subr.bf16.mxu0 %v11007_v6  ;;  %9630 = vmatprep.subr.bf16.mxu1 %v11025_v23  ;;  %v7166_v18 = vmax.f32 %v7038_v36, 0.0  ;;  %v7168_v11 = vmax.f32 %v7040_v33, 0.0  ;;  %v7169_v43 = vmax.f32 %v7041_v50, 0.0  ;;  %v7171_v29 = vmax.f32 %v7043_v28, 0.0  ;;  %v11020_v33 = vld [vmem:[#allocation7 + $0x138] sm:$0xff]  }
 0x5d7   : > { %7857 = vmatprep.mubr.bf16.mxu0 %v7346_v22  ;;  %v7170_v47 = vmax.f32 %v7042_v39, 0.0  ;;  %v7172_v54 = vmax.f32 %v7044_v1, 0.0 }
 0x5d9   : > { %v6557_v5 = vpop.f32.mrb[156].mxu0  ;;  %v6750_v48 = vpop.f32.mrb[156].mxu1  ;;  %9573 = vmatpush3.bf16.msra.mxu0 %v11008_v21  ;;  %v11023_v21 = vld [vmem:[#allocation7 + $0x240] sm:$0xff]  }
 0x5da   : > { %v7045_v7 = vadd.f32 %v12822_v4, %v6557_v5  ;;  %v7047_v2 = vadd.f32 %v12826_v42, %v6750_v48  ;;  %v6559_v25 = vpop.f32.mrb[157].mxu0  ;;  %v6752_v37 = vpop.f32.mrb[157].mxu1  ;;  %9574 = vmatprep.subr.bf16.mxu0 %v11011_v16 }
 0x5db   : > { %v7046_v14 = vadd.f32 %v12830_v35, %v6559_v25  ;;  %v7048_v26 = vadd.f32 %v12834_v60, %v6752_v37  ;;  %v6561_v53 = vpop.f32.mrb[158].mxu0  ;;  %v6754_v56 = vpop.f32.mrb[158].mxu1  ;;  %v11027_v37 = vld [vmem:[#allocation7 + $0x248] sm:$0xff]  }
 0x5dc   : > { %v7173_v24 = vmax.f32 %v7045_v7, 0.0  ;;  %v7175_v30 = vmax.f32 %v7047_v2, 0.0  ;;  %v7049_v10 = vadd.f32 %v12822_v4, %v6561_v53  ;;  %v7051_v19 = vadd.f32 %v12826_v42, %v6754_v56  ;;  %v6563_v13 = vpop.f32.mrb[159].mxu0  ;;  %v6756_v58 = vpop.f32.mrb[159].mxu1  ;;  %v11026_v7 = vld [vmem:[#allocation7 + $0x280] sm:$0xff]  }
 0x5dd   : > { %v7174_v45 = vmax.f32 %v7046_v14, 0.0  ;;  %v7176_v3 = vmax.f32 %v7048_v26, 0.0  ;;  %v7050_v34 = vadd.f32 %v12830_v35, %v6563_v13  ;;  %v7052_v52 = vadd.f32 %v12834_v60, %v6756_v58  ;;  %9575 = vmatpush3.bf16.msra.mxu0 %v11012_v51  ;;  %v11029_v51 = vld [vmem:[#allocation7 + $0x2c8] sm:$0xff]  }
 0x5de   : > { %v7269_v38 = vmax.f32 %v7165_v32, %v7173_v24  ;;  %v7271_v9 = vmax.f32 %v7167_v46, %v7175_v30  ;;  %v7177_v31 = vmax.f32 %v7049_v10, 0.0  ;;  %v7179_v57 = vmax.f32 %v7051_v19, 0.0  ;;  %9576 = vmatprep.subr.bf16.mxu0 %v11015_v15  ;;  %v11028_v58 = vld [vmem:[#allocation7 + $0x208] sm:$0xff]  }
 0x5df   : > { %v7270_v59 = vmax.f32 %v7166_v18, %v7174_v45  ;;  %v7272_v41 = vmax.f32 %v7168_v11, %v7176_v3  ;;  %v7178_v49 = vmax.f32 %v7050_v34, 0.0  ;;  %v7180_v8 = vmax.f32 %v7052_v52, 0.0  ;;  %v11030_v45 = vld [vmem:[#allocation7 + $0x288] sm:$0xff]  }
 0x5e0   : > { %v7321_v27 = vmax.f32 %v7269_v38, %v7271_v9  ;;  %v7273_v44 = vmax.f32 %v7169_v43, %v7177_v31  ;;  %v7275_v20 = vmax.f32 %v7171_v29, %v7179_v57  ;;  %v11024_v29 = vld [vmem:[#allocation7 + $0x200] sm:$0xff]   ;;  %v11031_v31 = vld [vmem:[#allocation7 + $0x250] sm:$0xff]  }
 0x5e1   : > { %v7322_v63 = vmax.f32 %v7270_v59, %v7272_v41  ;;  %v7274_v6 = vmax.f32 %v7170_v47, %v7178_v49  ;;  %v7276_v23 = vmax.f32 %v7172_v54, %v7180_v8  ;;  %v6567_v55 = vpop.f32.mrb[160].mxu0  ;;  %v6760_v17 = vpop.f32.mrb[160].mxu1  ;;  %9577 = vmatpush3.bf16.msra.mxu0 %v11016_v12  ;;  %v11033_v57 = vld [vmem:[#allocation7 + $0x2d0] sm:$0xff]  }
 0x5e2   : > { %v7323_v40 = vmax.f32 %v7273_v44, %v7275_v20  ;;  %v6569_v0 = vpop.f32.mrb[161].mxu0  ;;  %v6762_v36 = vpop.f32.mrb[161].mxu1  ;;  %9578 = vmatprep.subr.bf16.mxu0 %v11019_v61  ;;  %v7053_v32 = vadd.f32 %v12822_v4, %v6567_v55  ;;  %v7055_v46 = vadd.f32 %v12826_v42, %v6760_v17 }
 0x5e3   : > { %v7324_v50 = vmax.f32 %v7274_v6, %v7276_v23  ;;  %v6571_v28 = vpop.f32.mrb[162].mxu0  ;;  %v6764_v22 = vpop.f32.mrb[162].mxu1  ;;  %v7054_v18 = vadd.f32 %v12830_v35, %v6569_v0  ;;  %v7056_v11 = vadd.f32 %v12834_v60, %v6762_v36  ;;  %v11034_v0 = vld [vmem:[#allocation7 + $0x290] sm:$0xff]  }
 0x5e4   : > { %v7347_v39 = vpack.c.bf16 %v7323_v40, %v7321_v27  ;;  %v6573_v1 = vpop.f32.mrb[163].mxu0  ;;  %v6766_v16 = vpop.f32.mrb[163].mxu1  ;;  %v12919_v5 = vadd.f32 %v12822_v4, %v6571_v28  ;;  %v12922_v48 = vadd.f32 %v12826_v42, %v6764_v22  ;;  %v7181_v47 = vmax.f32 %v7053_v32, 0.0  ;;  %v11032_v40 = vld [vmem:[#allocation7 + $0x210] sm:$0xff]   ;;  %v11035_v22 = vld [vmem:[#allocation7 + $0x258] sm:$0xff]  }
 0x5e5   : > { %9579 = vmatpush3.bf16.msra.mxu0 %v11020_v33  ;;  %v7348_v43 = vpack.c.bf16 %v7324_v50, %v7322_v63  ;;  %v12925_v2 = vadd.f32 %v12830_v35, %v6573_v1  ;;  %v12928_v25 = vadd.f32 %v12834_v60, %v6766_v16  ;;  %v7183_v54 = vmax.f32 %v7055_v46, 0.0 }
 0x5e6   : > { %9608 = vmatprep.subr.bf16.mxu0 %v11023_v21  ;;  %v7182_v14 = vmax.f32 %v7054_v18, 0.0  ;;  %v7184_v26 = vmax.f32 %v7056_v11, 0.0  ;;  %v7185_v15 = vmax.f32 %v12919_v5, 0.0  ;;  %v7187_v24 = vmax.f32 %v12922_v48, 0.0  ;;  %v11037_v21 = vld [vmem:[#allocation7 + $0x2d8] sm:$0xff]  }
 0x5e7   : > { %8029 = vmatprep.mubr.bf16.mxu1 %v7348_v43  ;;  %v7186_v3 = vmax.f32 %v12925_v2, 0.0  ;;  %v11038_v2 = vld [vmem:[#allocation7 + $0x298] sm:$0xff]  }
 0x5e8   : > { %7858 = vmatmul.mubr.bf16.vlgmr.msra.gmra.mrb[196].mxu0 %v12896_v62  ;;  %8030 = vmatmul.mubr.bf16.vlgmr.msra.gmra.mrb[196].mxu1 %v7347_v39  ;;  %v7188_v62 = vmax.f32 %v12928_v25, 0.0 }
 0x5e9   : > { %v6577_v53 = vpop.f32.mrb[164].mxu0  ;;  %v6770_v56 = vpop.f32.mrb[164].mxu1  ;;  %9609 = vmatpush3.bf16.msra.mxu0 %v11024_v29  ;;  %9631 = vmatpush3.bf16.msra.mxu1 %v11026_v7  ;;  %v11036_v7 = vld [vmem:[#allocation7 + $0x218] sm:$0xff]  }
 0x5ea   : > { %v7061_v30 = vadd.f32 %v12822_v4, %v6577_v53  ;;  %v7063_v10 = vadd.f32 %v12826_v42, %v6770_v56  ;;  %v6579_v19 = vpop.f32.mrb[165].mxu0  ;;  %v6772_v13 = vpop.f32.mrb[165].mxu1  ;;  %9610 = vmatprep.subr.bf16.mxu0 %v11027_v37  ;;  %9632 = vmatprep.subr.bf16.mxu1 %v11029_v51 }
 0x5eb   : > { %v7062_v34 = vadd.f32 %v12830_v35, %v6579_v19  ;;  %v7064_v52 = vadd.f32 %v12834_v60, %v6772_v13  ;;  %v6581_v38 = vpop.f32.mrb[166].mxu0  ;;  %v6774_v9 = vpop.f32.mrb[166].mxu1 }
 0x5ec   : > { %v7189_v12 = vmax.f32 %v7061_v30, 0.0  ;;  %v7191_v59 = vmax.f32 %v7063_v10, 0.0  ;;  %v7065_v41 = vadd.f32 %v12822_v4, %v6581_v38  ;;  %v7067_v49 = vadd.f32 %v12826_v42, %v6774_v9  ;;  %v6583_v8 = vpop.f32.mrb[167].mxu0  ;;  %v6776_v61 = vpop.f32.mrb[167].mxu1 }
 0x5ed   : > { %v7190_v27 = vmax.f32 %v7062_v34, 0.0  ;;  %v7192_v44 = vmax.f32 %v7064_v52, 0.0  ;;  %v7066_v20 = vadd.f32 %v12830_v35, %v6583_v8  ;;  %v7068_v63 = vadd.f32 %v12834_v60, %v6776_v61  ;;  %9611 = vmatpush3.bf16.msra.mxu0 %v11028_v58  ;;  %9633 = vmatpush3.bf16.msra.mxu1 %v11030_v45  ;;  %v11040_v58 = vld [vmem:[#allocation7 + $0x220] sm:$0xff]   ;;  %v11043_v34 = vld [vmem:[#allocation7 + $0x268] sm:$0xff]  }
 0x5ee   : > { %v7277_v6 = vmax.f32 %v7181_v47, %v7189_v12  ;;  %v7279_v23 = vmax.f32 %v7183_v54, %v7191_v59  ;;  %v7193_v55 = vmax.f32 %v7065_v41, 0.0  ;;  %v7195_v17 = vmax.f32 %v7067_v49, 0.0  ;;  %9612 = vmatprep.subr.bf16.mxu0 %v11031_v31  ;;  %9634 = vmatprep.subr.bf16.mxu1 %v11033_v57  ;;  %v11039_v47 = vld [vmem:[#allocation7 + $0x260] sm:$0xff]   ;;  %v11045_v52 = vld [vmem:[#allocation7 + $0x2e8] sm:$0xff]  }
 0x5ef   : > { %v7278_v36 = vmax.f32 %v7182_v14, %v7190_v27  ;;  %v7280_v33 = vmax.f32 %v7184_v26, %v7192_v44  ;;  %v7194_v50 = vmax.f32 %v7066_v20, 0.0  ;;  %v7196_v28 = vmax.f32 %v7068_v63, 0.0  ;;  %v11041_v54 = vld [vmem:[#allocation7 + $0x2e0] sm:$0xff]   ;;  %v11044_v20 = vld [vmem:[#allocation7 + $0x228] sm:$0xff]  }
 0x5f0   : > { %v7325_v39 = vmax.f32 %v7277_v6, %v7279_v23  ;;  %v7281_v1 = vmax.f32 %v7185_v15, %v7193_v55  ;;  %v7283_v16 = vmax.f32 %v7187_v24, %v7195_v17  ;;  %v11042_v45 = vld [vmem:[#allocation7 + $0x2a0] sm:$0xff]   ;;  %v11046_v63 = vld [vmem:[#allocation7 + $0x2a8] sm:$0xff]  }
 0x5f1   : > { %v7326_v32 = vmax.f32 %v7278_v36, %v7280_v33  ;;  %v7282_v46 = vmax.f32 %v7186_v3, %v7194_v50  ;;  %v7284_v18 = vmax.f32 %v7188_v62, %v7196_v28  ;;  %v6587_v11 = vpop.f32.mrb[168].mxu0  ;;  %v6780_v5 = vpop.f32.mrb[168].mxu1  ;;  %9613 = vmatpush3.bf16.msra.mxu0 %v11032_v40  ;;  %9635 = vmatpush3.bf16.msra.mxu1 %v11034_v0  ;;  %v11047_v36 = vld [vmem:[#allocation7 + $0x270] sm:$0xff]  }
 0x5f2   : > { %v7327_v48 = vmax.f32 %v7281_v1, %v7283_v16  ;;  %v6589_v43 = vpop.f32.mrb[169].mxu0  ;;  %v6782_v29 = vpop.f32.mrb[169].mxu1  ;;  %9614 = vmatprep.subr.bf16.mxu0 %v11035_v22  ;;  %9636 = vmatprep.subr.bf16.mxu1 %v11037_v21  ;;  %v7069_v56 = vadd.f32 %v12822_v4, %v6587_v11  ;;  %v7071_v15 = vadd.f32 %v12826_v42, %v6780_v5  ;;  %v11049_v33 = vld [vmem:[#allocation7 + $0x2f0] sm:$0xff]  }
 0x5f3   : > { %v7328_v25 = vmax.f32 %v7282_v46, %v7284_v18  ;;  %v6591_v37 = vpop.f32.mrb[170].mxu0  ;;  %v6784_v51 = vpop.f32.mrb[170].mxu1  ;;  %v7070_v24 = vadd.f32 %v12830_v35, %v6589_v43  ;;  %v7072_v30 = vadd.f32 %v12834_v60, %v6782_v29  ;;  %v11048_v29 = vld [vmem:[#allocation7 + $0x230] sm:$0xff]  }
 0x5f4   : > { %v12943_v14 = vpack.c.bf16 %v7327_v48, %v7325_v39  ;;  %v6593_v26 = vpop.f32.mrb[171].mxu0  ;;  %v6786_v53 = vpop.f32.mrb[171].mxu1  ;;  %v12950_v10 = vadd.f32 %v12822_v4, %v6591_v37  ;;  %v12953_v19 = vadd.f32 %v12826_v42, %v6784_v51  ;;  %v7197_v38 = vmax.f32 %v7069_v56, 0.0 }
 0x5f5   : > { %9615 = vmatpush3.bf16.msra.mxu0 %v11036_v7  ;;  %9637 = vmatpush3.bf16.msra.mxu1 %v11038_v2  ;;  %v7350_v13 = vpack.c.bf16 %v7328_v25, %v7326_v32  ;;  %v12956_v3 = vadd.f32 %v12830_v35, %v6593_v26  ;;  %v12959_v62 = vadd.f32 %v12834_v60, %v6786_v53  ;;  %v7199_v9 = vmax.f32 %v7071_v15, 0.0  ;;  %v11050_v7 = vld [vmem:[#allocation7 + $0x2b0] sm:$0xff]  }
 0x5f6   : > { %9616 = vmatprep.subr.bf16.mxu0 %v11039_v47  ;;  %9638 = vmatprep.subr.bf16.mxu1 %v11041_v54  ;;  %v7198_v31 = vmax.f32 %v7070_v24, 0.0  ;;  %v7200_v57 = vmax.f32 %v7072_v30, 0.0  ;;  %v7201_v41 = vmax.f32 %v12950_v10, 0.0  ;;  %v7203_v49 = vmax.f32 %v12953_v19, 0.0  ;;  %v11051_v47 = vld [vmem:[#allocation7 + $0x278] sm:$0xff]  }
 0x5f7   : > { %8201 = vmatprep.mubr.bf16.mxu0 %v7350_v13  ;;  %v7202_v6 = vmax.f32 %v12956_v3, 0.0  ;;  %v7204_v23 = vmax.f32 %v12959_v62, 0.0  ;;  %v11053_v54 = vld [vmem:[#allocation7 + $0x2f8] sm:$0xff]  }
 0x5f8   : > { %v11052_v3 = vld [vmem:[#allocation7 + $0x238] sm:$0xff]  }
 0x5f9   : > { %v6597_v12 = vpop.f32.mrb[172].mxu0  ;;  %v6790_v59 = vpop.f32.mrb[172].mxu1  ;;  %9617 = vmatpush3.bf16.msra.mxu0 %v11040_v58  ;;  %9639 = vmatpush3.bf16.msra.mxu1 %v11042_v45  ;;  %v11054_v62 = vld [vmem:[#allocation7 + $0x2b8] sm:$0xff]  }
 0x5fa   : > { %v7077_v8 = vadd.f32 %v12822_v4, %v6597_v12  ;;  %v7079_v61 = vadd.f32 %v12826_v42, %v6790_v59  ;;  %v6599_v27 = vpop.f32.mrb[173].mxu0  ;;  %v6792_v44 = vpop.f32.mrb[173].mxu1  ;;  %9618 = vmatprep.subr.bf16.mxu0 %v11043_v34  ;;  %9640 = vmatprep.subr.bf16.mxu1 %v11045_v52 }
 0x5fb   : > { %v7078_v55 = vadd.f32 %v12830_v35, %v6599_v27  ;;  %v7080_v17 = vadd.f32 %v12834_v60, %v6792_v44  ;;  %v6601_v40 = vpop.f32.mrb[174].mxu0  ;;  %v6794_v0 = vpop.f32.mrb[174].mxu1 }
 0x5fc   : > { %v7205_v50 = vmax.f32 %v7077_v8, 0.0  ;;  %v7207_v28 = vmax.f32 %v7079_v61, 0.0  ;;  %v7081_v22 = vadd.f32 %v12822_v4, %v6601_v40  ;;  %v7083_v21 = vadd.f32 %v12826_v42, %v6794_v0  ;;  %v6603_v39 = vpop.f32.mrb[175].mxu0  ;;  %v6796_v1 = vpop.f32.mrb[175].mxu1  ;;  %v11061_v40 = vld [vmem:[#allocation7 + $0x3c8] sm:$0xff]  }
 0x5fd   : > { %v7206_v16 = vmax.f32 %v7078_v55, 0.0  ;;  %v7208_v32 = vmax.f32 %v7080_v17, 0.0  ;;  %v7082_v46 = vadd.f32 %v12830_v35, %v6603_v39  ;;  %v7084_v18 = vadd.f32 %v12834_v60, %v6796_v1  ;;  %9619 = vmatpush3.bf16.msra.mxu0 %v11044_v20  ;;  %9641 = vmatpush3.bf16.msra.mxu1 %v11046_v63  ;;  %v11056_v63 = vld [vmem:[#allocation7 + $0x300] sm:$0xff]   ;;  %v11059_v17 = vld [vmem:[#allocation7 + $0x348] sm:$0xff]  }
 0x5fe   : > { %v7285_v11 = vmax.f32 %v7197_v38, %v7205_v50  ;;  %v7287_v5 = vmax.f32 %v7199_v9, %v7207_v28  ;;  %v7209_v48 = vmax.f32 %v7081_v22, 0.0  ;;  %v7211_v43 = vmax.f32 %v7083_v21, 0.0  ;;  %9620 = vmatprep.subr.bf16.mxu0 %v11047_v36  ;;  %9642 = vmatprep.subr.bf16.mxu1 %v11049_v33  ;;  %v11055_v9 = vld [vmem:[#allocation7 + $0x340] sm:$0xff]  }
 0x5ff   : > { %v7286_v2 = vmax.f32 %v7198_v31, %v7206_v16  ;;  %v7288_v25 = vmax.f32 %v7200_v57, %v7208_v32  ;;  %v7210_v37 = vmax.f32 %v7082_v46, 0.0  ;;  %v7212_v51 = vmax.f32 %v7084_v18, 0.0  ;;  %v11057_v31 = vld [vmem:[#allocation7 + $0x3c0] sm:$0xff]   ;;  %v11060_v18 = vld [vmem:[#allocation7 + $0x308] sm:$0xff]  }
 0x600   : > { %v7329_v26 = vmax.f32 %v7285_v11, %v7287_v5  ;;  %v7289_v53 = vmax.f32 %v7201_v41, %v7209_v48  ;;  %v7291_v56 = vmax.f32 %v7203_v49, %v7211_v43  ;;  %v11062_v11 = vld [vmem:[#allocation7 + $0x388] sm:$0xff]  }
 0x601   : > { %v7330_v15 = vmax.f32 %v7286_v2, %v7288_v25  ;;  %v7290_v24 = vmax.f32 %v7202_v6, %v7210_v37  ;;  %v7292_v30 = vmax.f32 %v7204_v23, %v7212_v51  ;;  %v6607_v10 = vpop.f32.mrb[176].mxu0  ;;  %v6800_v19 = vpop.f32.mrb[176].mxu1  ;;  %9621 = vmatpush3.bf16.msra.mxu0 %v11048_v29  ;;  %9643 = vmatpush3.bf16.msra.mxu1 %v11050_v7  ;;  %v11058_v6 = vld [vmem:[#allocation7 + $0x380] sm:$0xff]   ;;  %v11063_v2 = vld [vmem:[#allocation7 + $0x350] sm:$0xff]  }
 0x602   : > { %v7331_v13 = vmax.f32 %v7289_v53, %v7291_v56  ;;  %v6609_v58 = vpop.f32.mrb[177].mxu0  ;;  %v6802_v45 = vpop.f32.mrb[177].mxu1  ;;  %9622 = vmatprep.subr.bf16.mxu0 %v11051_v47  ;;  %9644 = vmatprep.subr.bf16.mxu1 %v11053_v54  ;;  %v7085_v41 = vadd.f32 %v12822_v4, %v6607_v10  ;;  %v7087_v49 = vadd.f32 %v12826_v42, %v6800_v19  ;;  %v11065_v25 = vld [vmem:[#allocation7 + $0x3d0] sm:$0xff]  }
 0x603   : > { %v7332_v34 = vmax.f32 %v7290_v24, %v7292_v30  ;;  %v6611_v52 = vpop.f32.mrb[178].mxu0  ;;  %v6804_v38 = vpop.f32.mrb[178].mxu1  ;;  %v12976_v8 = vadd.f32 %v12830_v35, %v6609_v58  ;;  %v12979_v61 = vadd.f32 %v12834_v60, %v6802_v45  ;;  %v11064_v45 = vld [vmem:[#allocation7 + $0x310] sm:$0xff]  }
 0x604   : > { %v7351_v57 = vpack.c.bf16 %v7331_v13, %v7329_v26  ;;  %v6613_v12 = vpop.f32.mrb[179].mxu0  ;;  %v6806_v59 = vpop.f32.mrb[179].mxu1  ;;  %v12982_v27 = vadd.f32 %v12822_v4, %v6611_v52  ;;  %v12985_v44 = vadd.f32 %v12826_v42, %v6804_v38  ;;  %v7213_v0 = vmax.f32 %v7085_v41, 0.0 }
 0x605   : > { %9623 = vmatpush3.bf16.msra.mxu0 %v11052_v3  ;;  %9645 = vmatpush3.bf16.msra.mxu1 %v11054_v62  ;;  %v7352_v20 = vpack.c.bf16 %v7332_v34, %v7330_v15  ;;  %v12988_v23 = vadd.f32 %v12830_v35, %v6613_v12  ;;  %v12991_v55 = vadd.f32 %v12834_v60, %v6806_v59  ;;  %v7215_v36 = vmax.f32 %v7087_v49, 0.0  ;;  %v11066_v3 = vld [vmem:[#allocation7 + $0x390] sm:$0xff]  }
 0x606   : > { %9652 = vmatprep.subr.bf16.mxu0 %v11055_v9  ;;  %9674 = vmatprep.subr.bf16.mxu1 %v11057_v31  ;;  %v7214_v33 = vmax.f32 %v12976_v8, 0.0  ;;  %v7216_v50 = vmax.f32 %v12979_v61, 0.0  ;;  %v7217_v21 = vmax.f32 %v12982_v27, 0.0  ;;  %v7219_v39 = vmax.f32 %v12985_v44, 0.0  ;;  %v11067_v9 = vld [vmem:[#allocation7 + $0x358] sm:$0xff]  }
 0x607   : > { %8373 = vmatprep.mubr.bf16.mxu1 %v7352_v20  ;;  %v7218_v5 = vmax.f32 %v12988_v23, 0.0  ;;  %v11069_v31 = vld [vmem:[#allocation7 + $0x3d8] sm:$0xff]  }
 0x608   : > { %8202 = vmatmul.mubr.bf16.vlgmr.msra.gmra.mrb[200].mxu0 %v12943_v14  ;;  %8374 = vmatmul.mubr.bf16.vlgmr.msra.gmra.mrb[200].mxu1 %v7351_v57  ;;  %v7220_v14 = vmax.f32 %v12991_v55, 0.0  ;;  %v11070_v23 = vld [vmem:[#allocation7 + $0x398] sm:$0xff]  }
 0x609   : > { %v6617_v28 = vpop.f32.mrb[180].mxu0  ;;  %v6810_v22 = vpop.f32.mrb[180].mxu1  ;;  %9653 = vmatpush3.bf16.msra.mxu0 %v11056_v63  ;;  %9675 = vmatpush3.bf16.msra.mxu1 %v11058_v6  ;;  %v11068_v6 = vld [vmem:[#allocation7 + $0x318] sm:$0xff]  }
 0x60a   : > { %v7093_v1 = vadd.f32 %v12822_v4, %v6617_v28  ;;  %v7095_v16 = vadd.f32 %v12826_v42, %v6810_v22  ;;  %v6619_v32 = vpop.f32.mrb[181].mxu0  ;;  %v6812_v46 = vpop.f32.mrb[181].mxu1  ;;  %9654 = vmatprep.subr.bf16.mxu0 %v11059_v17  ;;  %9676 = vmatprep.subr.bf16.mxu1 %v11061_v40 }
 0x60b   : > { %v7094_v48 = vadd.f32 %v12830_v35, %v6619_v32  ;;  %v7096_v43 = vadd.f32 %v12834_v60, %v6812_v46  ;;  %v6621_v29 = vpop.f32.mrb[182].mxu0  ;;  %v6814_v7 = vpop.f32.mrb[182].mxu1 }
 0x60c   : > { %v7221_v37 = vmax.f32 %v7093_v1, 0.0  ;;  %v7223_v51 = vmax.f32 %v7095_v16, 0.0  ;;  %v7097_v47 = vadd.f32 %v12822_v4, %v6621_v29  ;;  %v7099_v54 = vadd.f32 %v12826_v42, %v6814_v7  ;;  %v6623_v26 = vpop.f32.mrb[183].mxu0  ;;  %v6816_v53 = vpop.f32.mrb[183].mxu1 }
 0x60d   : > { %v7222_v56 = vmax.f32 %v7094_v48, 0.0  ;;  %v7224_v15 = vmax.f32 %v7096_v43, 0.0  ;;  %v7098_v24 = vadd.f32 %v12830_v35, %v6623_v26  ;;  %v7100_v30 = vadd.f32 %v12834_v60, %v6816_v53  ;;  %9655 = vmatpush3.bf16.msra.mxu0 %v11060_v18  ;;  %9677 = vmatpush3.bf16.msra.mxu1 %v11062_v11  ;;  %v11072_v18 = vld [vmem:[#allocation7 + $0x320] sm:$0xff]   ;;  %v11075_v48 = vld [vmem:[#allocation7 + $0x368] sm:$0xff]  }
 0x60e   : > { %v7293_v10 = vmax.f32 %v7213_v0, %v7221_v37  ;;  %v7295_v19 = vmax.f32 %v7215_v36, %v7223_v51  ;;  %v7225_v13 = vmax.f32 %v7097_v47, 0.0  ;;  %v7227_v58 = vmax.f32 %v7099_v54, 0.0  ;;  %9656 = vmatprep.subr.bf16.mxu0 %v11063_v2  ;;  %9678 = vmatprep.subr.bf16.mxu1 %v11065_v25  ;;  %v11071_v0 = vld [vmem:[#allocation7 + $0x360] sm:$0xff]   ;;  %v11077_v43 = vld [vmem:[#allocation7 + $0x3e8] sm:$0xff]  }
 0x60f   : > { %v7294_v62 = vmax.f32 %v7214_v33, %v7222_v56  ;;  %v7296_v34 = vmax.f32 %v7216_v50, %v7224_v15  ;;  %v7226_v52 = vmax.f32 %v7098_v24, 0.0  ;;  %v7228_v38 = vmax.f32 %v7100_v30, 0.0  ;;  %v11073_v36 = vld [vmem:[#allocation7 + $0x3e0] sm:$0xff]   ;;  %v11076_v24 = vld [vmem:[#allocation7 + $0x328] sm:$0xff]  }
 0x610   : > { %v7333_v57 = vmax.f32 %v7293_v10, %v7295_v19  ;;  %v7297_v12 = vmax.f32 %v7217_v21, %v7225_v13  ;;  %v7299_v59 = vmax.f32 %v7219_v39, %v7227_v58  ;;  %v11074_v11 = vld [vmem:[#allocation7 + $0x3a0] sm:$0xff]   ;;  %v11078_v30 = vld [vmem:[#allocation7 + $0x3a8] sm:$0xff]  }
 0x611   : > { %v7334_v41 = vmax.f32 %v7294_v62, %v7296_v34  ;;  %v7298_v49 = vmax.f32 %v7218_v5, %v7226_v52  ;;  %v7300_v8 = vmax.f32 %v7220_v14, %v7228_v38  ;;  %v6627_v61 = vpop.f32.mrb[184].mxu0  ;;  %v6820_v27 = vpop.f32.mrb[184].mxu1  ;;  %9657 = vmatpush3.bf16.msra.mxu0 %v11064_v45  ;;  %9679 = vmatpush3.bf16.msra.mxu1 %v11066_v3  ;;  %v11079_v62 = vld [vmem:[#allocation7 + $0x370] sm:$0xff]  }
 0x612   : > { %v7335_v44 = vmax.f32 %v7297_v12, %v7299_v59  ;;  %v6629_v20 = vpop.f32.mrb[185].mxu0  ;;  %v6822_v63 = vpop.f32.mrb[185].mxu1  ;;  %9658 = vmatprep.subr.bf16.mxu0 %v11067_v9  ;;  %9680 = vmatprep.subr.bf16.mxu1 %v11069_v31  ;;  %v7101_v22 = vadd.f32 %v12822_v4, %v6627_v61  ;;  %v7103_v21 = vadd.f32 %v12826_v42, %v6820_v27  ;;  %v11081_v34 = vld [vmem:[#allocation7 + $0x3f0] sm:$0xff]  }
 0x613   : > { %v7336_v55 = vmax.f32 %v7298_v49, %v7300_v8  ;;  %v6631_v17 = vpop.f32.mrb[186].mxu0  ;;  %v6824_v40 = vpop.f32.mrb[186].mxu1  ;;  %v7102_v39 = vadd.f32 %v12830_v35, %v6629_v20  ;;  %v7104_v1 = vadd.f32 %v12834_v60, %v6822_v63  ;;  %v11080_v63 = vld [vmem:[#allocation7 + $0x330] sm:$0xff]  }
 0x614   : > { %v13008_v33 = vpack.c.bf16 %v7335_v44, %v7333_v57  ;;  %v6633_v50 = vpop.f32.mrb[187].mxu0  ;;  %v6826_v28 = vpop.f32.mrb[187].mxu1  ;;  %v13015_v16 = vadd.f32 %v12822_v4, %v6631_v17  ;;  %v13018_v32 = vadd.f32 %v12826_v42, %v6824_v40  ;;  %v7229_v29 = vmax.f32 %v7101_v22, 0.0  ;;  %v11083_v17 = vld [vmem:[#allocation7 + $0x378] sm:$0xff]  }
 0x615   : > { %9659 = vmatpush3.bf16.msra.mxu0 %v11068_v6  ;;  %9681 = vmatpush3.bf16.msra.mxu1 %v11070_v23  ;;  %v7354_v46 = vpack.c.bf16 %v7336_v55, %v7334_v41  ;;  %v13021_v5 = vadd.f32 %v12830_v35, %v6633_v50  ;;  %v13024_v14 = vadd.f32 %v12834_v60, %v6826_v28  ;;  %v7231_v7 = vmax.f32 %v7103_v21, 0.0  ;;  %v11082_v6 = vld [vmem:[#allocation7 + $0x3b0] sm:$0xff]   ;;  %v11085_v40 = vld [vmem:[#allocation7 + $0x3f8] sm:$0xff]  }
 0x616   : > { %9660 = vmatprep.subr.bf16.mxu0 %v11071_v0  ;;  %9682 = vmatprep.subr.bf16.mxu1 %v11073_v36  ;;  %v7230_v2 = vmax.f32 %v7102_v39, 0.0  ;;  %v7232_v25 = vmax.f32 %v7104_v1, 0.0  ;;  %v7233_v47 = vmax.f32 %v13015_v16, 0.0  ;;  %v7235_v54 = vmax.f32 %v13018_v32, 0.0  ;;  %v11084_v21 = vld [vmem:[#allocation7 + $0x338] sm:$0xff]  }
 0x617   : > { %8545 = vmatprep.mubr.bf16.mxu0 %v7354_v46  ;;  %v7234_v10 = vmax.f32 %v13021_v5, 0.0  ;;  %v7236_v19 = vmax.f32 %v13024_v14, 0.0  ;;  %v11086_v39 = vld [vmem:[#allocation7 + $0x3b8] sm:$0xff]  }
 0x619   : > { %v6637_v37 = vpop.f32.mrb[188].mxu0  ;;  %v6830_v51 = vpop.f32.mrb[188].mxu1  ;;  %9661 = vmatpush3.bf16.msra.mxu0 %v11072_v18  ;;  %9683 = vmatpush3.bf16.msra.mxu1 %v11074_v11 }
 0x61a   : > { %v7109_v26 = vadd.f32 %v12822_v4, %v6637_v37  ;;  %v7111_v53 = vadd.f32 %v12826_v42, %v6830_v51  ;;  %v6639_v56 = vpop.f32.mrb[189].mxu0  ;;  %v6832_v15 = vpop.f32.mrb[189].mxu1  ;;  %9662 = vmatprep.subr.bf16.mxu0 %v11075_v48  ;;  %9684 = vmatprep.subr.bf16.mxu1 %v11077_v43 }
 0x61b   : > { %v7110_v13 = vadd.f32 %v12830_v35, %v6639_v56  ;;  %v7112_v58 = vadd.f32 %v12834_v60, %v6832_v15  ;;  %v6641_v45 = vpop.f32.mrb[190].mxu0  ;;  %v6834_v3 = vpop.f32.mrb[190].mxu1 }
 0x61c   : > { %v7237_v52 = vmax.f32 %v7109_v26, 0.0  ;;  %v7239_v38 = vmax.f32 %v7111_v53, 0.0  ;;  %v7113_v9 = vadd.f32 %v12822_v4, %v6641_v45  ;;  %v7115_v31 = vadd.f32 %v12826_v42, %v6834_v3  ;;  %v6643_v57 = vpop.f32.mrb[191].mxu0  ;;  %v6836_v12 = vpop.f32.mrb[191].mxu1 }
 0x61d   : > { %v7238_v59 = vmax.f32 %v7110_v13, 0.0  ;;  %v7240_v41 = vmax.f32 %v7112_v58, 0.0  ;;  %v7114_v49 = vadd.f32 %v12830_v35, %v6643_v57  ;;  %v7116_v8 = vadd.f32 %v12834_v60, %v6836_v12  ;;  %9663 = vmatpush3.bf16.msra.mxu0 %v11076_v24  ;;  %9685 = vmatpush3.bf16.msra.mxu1 %v11078_v30 }
 0x61e   : > { %v7301_v61 = vmax.f32 %v7229_v29, %v7237_v52  ;;  %v7303_v27 = vmax.f32 %v7231_v7, %v7239_v38  ;;  %v7241_v44 = vmax.f32 %v7113_v9, 0.0  ;;  %v7243_v20 = vmax.f32 %v7115_v31, 0.0  ;;  %9664 = vmatprep.subr.bf16.mxu0 %v11079_v62  ;;  %9686 = vmatprep.subr.bf16.mxu1 %v11081_v34 }
 0x61f   : > { %v7302_v23 = vmax.f32 %v7230_v2, %v7238_v59  ;;  %v7304_v4 = vmax.f32 %v7232_v25, %v7240_v41  ;;  %v7242_v55 = vmax.f32 %v7114_v49, 0.0  ;;  %v7244_v42 = vmax.f32 %v7116_v8, 0.0 }
 0x620   : > { %v7337_v0 = vmax.f32 %v7301_v61, %v7303_v27  ;;  %v7305_v35 = vmax.f32 %v7233_v47, %v7241_v44  ;;  %v7307_v36 = vmax.f32 %v7235_v54, %v7243_v20 }
 0x621   : > { %v7338_v60 = vmax.f32 %v7302_v23, %v7304_v4  ;;  %v7306_v50 = vmax.f32 %v7234_v10, %v7242_v55  ;;  %v7308_v28 = vmax.f32 %v7236_v19, %v7244_v42  ;;  %9665 = vmatpush3.bf16.msra.mxu0 %v11080_v63  ;;  %9687 = vmatpush3.bf16.msra.mxu1 %v11082_v6 }
 0x622   : > { %v7339_v22 = vmax.f32 %v7305_v35, %v7307_v36  ;;  %9666 = vmatprep.subr.bf16.mxu0 %v11083_v17  ;;  %9688 = vmatprep.subr.bf16.mxu1 %v11085_v40 }
 0x623   : > { %v7340_v1 = vmax.f32 %v7306_v50, %v7308_v28 }
 0x624   : > { %v7355_v16 = vpack.c.bf16 %v7339_v22, %v7337_v0 }
 0x625   : > { %v7356_v32 = vpack.c.bf16 %v7340_v1, %v7338_v60  ;;  %9667 = vmatpush3.bf16.msra.mxu0 %v11084_v21  ;;  %9689 = vmatpush3.bf16.msra.mxu1 %v11086_v39  ;;  %v9512_v21 = vld [vmem:[%s13098_s6] ss:$0 sm:$0xff] }
 0x627   : > { %8717 = vmatprep.mubr.bf16.mxu1 %v7356_v32 }
 0x628   : > { %8546 = vmatmul.mubr.bf16.vlgmr.msra.gmra.mrb[204].mxu0 %v13008_v33  ;;  %8718 = vmatmul.mubr.bf16.vlgmr.msra.gmra.mrb[204].mxu1 %v7355_v16 }
 0x68b   : > { %v9558_v46 = vpop.f32.mrb[192].mxu1 }
 0x68c   : > { %v9559_v18 = vpop.f32.mrb[193].mxu1 }
 0x68d   : > { %v9560_v11 = vadd.f32 %v9559_v18, %v9558_v46  ;;  %v9561_v5 = vpop.f32.mrb[194].mxu1 }
 0x68e   : > { %v9562_v14 = vpop.f32.mrb[195].mxu1 }
 0x68f   : > { %v9563_v48 = vadd.f32 %v9562_v14, %v9561_v5 }
 0x69b   : > { %v9536_v43 = vpop.f32.mrb[192].mxu0 }
 0x69c   : > { %v9537_v29 = vpop.f32.mrb[193].mxu0 }
 0x69d   : > { %v9538_v7 = vadd.f32 %v9537_v29, %v9536_v43  ;;  %v9539_v2 = vpop.f32.mrb[194].mxu0 }
 0x69e   : > { %v9540_v25 = vpop.f32.mrb[195].mxu0 }
 0x69f   : > { %v7690_v37 = vadd.f32 %v9560_v11, %v9538_v7  ;;  %v9541_v51 = vadd.f32 %v9540_v25, %v9539_v2 }
 0x6a1   : > { %v7693_v47 = vadd.f32 %v9563_v48, %v9541_v51 }
 0x6bb   : > { %v9580_v54 = vpop.f32.mrb[196].mxu0  ;;  %v9602_v26 = vpop.f32.mrb[196].mxu1 }
 0x6bc   : > { %v9581_v53 = vpop.f32.mrb[197].mxu0  ;;  %v9603_v56 = vpop.f32.mrb[197].mxu1 }
 0x6bd   : > { %v9582_v33 = vadd.f32 %v9581_v53, %v9580_v54  ;;  %v9583_v15 = vpop.f32.mrb[198].mxu0  ;;  %v9604_v24 = vadd.f32 %v9603_v56, %v9602_v26  ;;  %v9605_v30 = vpop.f32.mrb[198].mxu1 }
 0x6be   : > { %v9584_v10 = vpop.f32.mrb[199].mxu0  ;;  %v9606_v19 = vpop.f32.mrb[199].mxu1 }
 0x6bf   : > { %v7866_v13 = vadd.f32 %v9582_v33, %v7690_v37  ;;  %v9585_v58 = vadd.f32 %v9584_v10, %v9583_v15  ;;  %v9607_v45 = vadd.f32 %v9606_v19, %v9605_v30 }
 0x6c1   : > { %v8038_v3 = vadd.f32 %v9604_v24, %v7866_v13  ;;  %v7867_v62 = vadd.f32 %v9585_v58, %v7693_v47 }
 0x6c3   : > { %v8039_v34 = vadd.f32 %v9607_v45, %v7867_v62 }
 0x6db   : > { %v9624_v52 = vpop.f32.mrb[200].mxu0  ;;  %v9646_v38 = vpop.f32.mrb[200].mxu1 }
 0x6dc   : > { %v9625_v9 = vpop.f32.mrb[201].mxu0  ;;  %v9647_v31 = vpop.f32.mrb[201].mxu1 }
 0x6dd   : > { %v9626_v57 = vadd.f32 %v9625_v9, %v9624_v52  ;;  %v9627_v12 = vpop.f32.mrb[202].mxu0  ;;  %v9648_v59 = vadd.f32 %v9647_v31, %v9646_v38  ;;  %v9649_v41 = vpop.f32.mrb[202].mxu1 }
 0x6de   : > { %v9628_v49 = vpop.f32.mrb[203].mxu0  ;;  %v9650_v8 = vpop.f32.mrb[203].mxu1 }
 0x6df   : > { %v8210_v61 = vadd.f32 %v9626_v57, %v8038_v3  ;;  %v9629_v27 = vadd.f32 %v9628_v49, %v9627_v12  ;;  %v9651_v44 = vadd.f32 %v9650_v8, %v9649_v41 }
 0x6e1   : > { %v8382_v20 = vadd.f32 %v9648_v59, %v8210_v61  ;;  %v8211_v63 = vadd.f32 %v9629_v27, %v8039_v34 }
 0x6e3   : > { %v8383_v6 = vadd.f32 %v9651_v44, %v8211_v63 }
 0x6fb   : > { %v9668_v23 = vpop.f32.mrb[204].mxu0  ;;  %v9690_v4 = vpop.f32.mrb[204].mxu1 }
 0x6fc   : > { %v9669_v55 = vpop.f32.mrb[205].mxu0  ;;  %v9691_v42 = vpop.f32.mrb[205].mxu1 }
 0x6fd   : > { %v9670_v17 = vadd.f32 %v9669_v55, %v9668_v23  ;;  %v9671_v40 = vpop.f32.mrb[206].mxu0  ;;  %v9692_v0 = vadd.f32 %v9691_v42, %v9690_v4  ;;  %v9693_v35 = vpop.f32.mrb[206].mxu1 }
 0x6fe   : > { %v9672_v36 = vpop.f32.mrb[207].mxu0  ;;  %v9694_v60 = vpop.f32.mrb[207].mxu1 }
 0x6ff   : > { %v8554_v50 = vadd.f32 %v9670_v17, %v8382_v20  ;;  %v9673_v28 = vadd.f32 %v9672_v36, %v9671_v40  ;;  %v9695_v22 = vadd.f32 %v9694_v60, %v9693_v35 }
 0x701   : > { %v8726_v39 = vadd.f32 %v9692_v0, %v8554_v50  ;;  %v8555_v1 = vadd.f32 %v9673_v28, %v8383_v6 }
 0x703   : > { %v8735_v16 = vadd.f32 %v9512_v21, %v8726_v39  ;;  %v8727_v32 = vadd.f32 %v9695_v22, %v8555_v1 }
 0x705   : > { %8737 = vst [vmem:[%s301_s10] sm:$0xff] %v8735_v16  ;;  %v8736_v46 = vadd.f32 %v9512_v21, %v8727_v32 }
 0x707   : > { %8738 = vst [vmem:[%s301_s10 + $0x8] sm:$0xff] %v8736_v46 }
 0x708   : > { %11180 = shalt.err (!%p11177_p11)
}
 0x709   : > { %s11181_s23 = scalar_lea.hbm %s13049_s16, 256  ;;  %s11185_s20 = scalar_lea.hbm %s13099_s7, 512 }
 0x70a   : > { %p11182_p13 = scmp.ne.s32.totalorder %s13049_s16, %s11181_s23  ;;  %p11186_p6 = scmp.lt.u32.totalorder %s13049_s16, %s13099_s7 }
 0x70b   : > { %p11187_p9 = scmp.lt.u32.totalorder %s11185_s20, %s11181_s23  ;;  %p11189_p10 = scmp.lt.u32.totalorder %s11181_s23, %s13049_s16 }
 0x70c   : > { %p11183_p0 = pnand %p11182_p13, %p13144_p1 }
 0x70d   : > { %p11188_p12 = por %p11187_p9, %p11186_p6 }
 0x70e   : > { %p11184_p5 = pneg %p11183_p0 }
 0x70f   : > { %p11190_p2 = por %p11189_p10, %p11188_p12 }
 0x711   : > { %p11191_p3 = pnand %p11190_p2, %p11184_p5 }
 0x713   : > { %11194 = shalt.err (!%p11191_p3)
}
 0x714   : > { %s11247_s17 = smov 128   ;;  %s11248_s13 = smov 8  }
 0x715   : > { %10472 = dma.vmem_to_hbm [thread:$0]  (%p13144_p1), %s13044_s14, 256, %s13049_s16, %s13051_s18, %s11247_s17, %s11247_s17, %s11248_s13  }
 0x716 PF: > { %p10489_p4 = scmp.ge.s32.totalorder %s11237_s27, 2  ;;  %s8768_s15 = sand.u32 1, %s11225_s24  }
 0x717   : > { %p13145_p7 = scmp.ne.s32.totalorder %s13121_s12, 0  ;;  %s8769_s19 = scalar_lea.sflag [#allocation6], %s8768_s15 }
 0x719   : > { %p10482_p8 = pnand %p10489_p4, %p13145_p7 }
 0x71b   : > { %11220 = dma.done.wait (!%p10482_p8), %s8769_s19, 256  }
 0x71c   : > { %11222 = vsyncadd (!%p10482_p8), %s8769_s19, 4294967040  ;;  %s13146_s28 = sld [smem:[#allocation13_spill]]  ;;  %p19_p11 = scmp.ge.s32.totalorder %s11314_s30, 4  }
 0x71d   : > { %s13147_s24 = smov %s11229_s25  ;;  %s13148_s25 = smov %s11233_s26 }
 0x71e   : > { %s13150_s27 = smov %s11314_s30  ;;  %21 = sbr.rel (!%p19_p11) target bundleno = 5 (0x5), region = 103 }
 0x722   : > { %s13149_s26 = smov %s13146_s28 }
 0x725   :  { %8774 = vsyncpa [#allocation5], 1 }
 0x726   :  { %8776 = vsyncpa [#allocation5 + $0x1], 1 }
 0x727   :  { %8777 = vsyncpa [#allocation8], 1 }
 0x728   :  { %8778 = vsyncpa [#allocation6], 1 }
 0x729   :  { %8780 = vsyncpa [#allocation6 + $0x1], 1 }

</bundles_post_ra>
